<compile_context>
chip_gen: v7x
topology: tpu7x:2x2x1
jax: 0.10.0
libtpu: 0.0.40
codegen_flags: <defaults>
</compile_context>

<pallas_src>
import functools

import jax
import jax.numpy as jnp
from jax.experimental import pallas as pl
from jax.experimental.pallas import tpu as pltpu

INPUT_DIM = 256
HIDDEN_DIM = 100
NUM_CLASSES = 10
HP = 128          # hidden dim padded to one lane tile
OP = 128          # head output padded to one lane tile
NEG_BIG = -1e30   # bias for padded logit lanes (exp() underflows to 0)


def _sigmoid(x):
    # exact sigmoid routed through the EUP tanh unit
    return 0.5 * (jnp.tanh(0.5 * x) + 1.0)


def _conv_dims(B, H, W):
    OH1, OW1 = H - 2, W - 6          # conv1 (3x7)
    PH, PW = OH1 // 2, OW1 // 2      # maxpool 2x2
    OH2, OW2 = PH - 2, PW - 5        # conv2 (3x6)
    OH3, OW3 = OH2 - 3, OW2 - 6      # conv3 (4x7)
    assert OH3 > 0 and OW3 > 0
    NP3 = OH3 * OW3                  # conv3 spatial positions per image
    assert INPUT_DIM % NP3 == 0 and (64 * NP3) % INPUT_DIM == 0
    CPT = INPUT_DIM // NP3           # conv3 channels per LSTM timestep
    T = (64 * NP3) // INPUT_DIM      # LSTM sequence length
    IMG = PH * PW                    # pooled-frame positions per image
    NPOS = B * IMG                   # lane (position) extent of the frame
    return dict(OH1=OH1, OW1=OW1, PH=PH, PW=PW, OH2=OH2, OW2=OW2,
                OH3=OH3, OW3=OW3, NP3=NP3, CPT=CPT, T=T, IMG=IMG, NPOS=NPOS)


# --------------------------- fused forward kernel ---------------------------

def _c3dlstm_kernel(slab_ref, w1_ref, b1_ref, w2_ref, b2_ref, w3_ref, b3_ref,
                    scale_ref, shift_ref, sel_ref, wih_ref, bih_ref, whh_ref,
                    h0_ref, c0_ref, wlin_ref, blin_ref,
                    logp_ref, hn_ref, cn_ref, *, dims, B):
    PW, NPOS, NP3, CPT, T = (dims["PW"], dims["NPOS"], dims["NP3"],
                             dims["CPT"], dims["T"])
    f32 = jnp.float32

    # ---- conv1 (3x7) + ReLU + 2x2 maxpool (one matmul, positions on lanes)
    # slab: (96, NPOS) stride-2 (4x8)-window patches.  w1: (32, 96) holds four
    # zero-padded copies of the conv1 weights, one per 2x2 pool offset, so a
    # single MXU matmul yields all four pool candidates.
    r = jnp.maximum(
        jnp.dot(w1_ref[...], slab_ref[...], preferred_element_type=f32)
        + b1_ref[...], 0.0)                                       # (32, NPOS)
    pooled = jnp.maximum(jnp.maximum(r[0:8], r[8:16]),
                         jnp.maximum(r[16:24], r[24:32]))         # (8, NPOS)
    # rows 0..5 = channels, rows 6..7 stay exactly zero (zero weights/bias).

    # ---- conv2 (3x6) + ReLU: patches = lane-shifted copies stacked on
    # sublanes (shift = kh*PW + kw in the pooled frame).  Zero-extended lanes
    # / "invalid" frame positions only ever feed outputs that the final
    # selection matrix never reads.
    at_ext = jnp.concatenate(
        [pooled, jnp.zeros((8, 2 * PW + 5), f32)], axis=1)
    p2 = jnp.concatenate(
        [at_ext[:, kh * PW + kw: kh * PW + kw + NPOS]
         for kh in range(3) for kw in range(6)], axis=0)          # (144, NPOS)
    a3 = jnp.maximum(
        jnp.dot(w2_ref[...], p2, preferred_element_type=f32) + b2_ref[...],
        0.0)                                                      # (16, NPOS)

    # ---- conv3 (4x7), accumulated per kernel-row chunk (keeps the live
    # patch slab at ~28 vregs instead of ~112).
    a3_ext = jnp.concatenate(
        [a3, jnp.zeros((16, 3 * PW + 6), f32)], axis=1)
    z0 = None
    for kh in range(4):
        chunk = jnp.concatenate(
            [a3_ext[:, kh * PW + kw: kh * PW + kw + NPOS] for kw in range(7)],
            axis=0)                                               # (112, NPOS)
        part = jnp.dot(w3_ref[:, kh * 112:(kh + 1) * 112], chunk,
                       preferred_element_type=f32)                # (64, NPOS)
        z0 = part if z0 is None else z0 + part
    # keep only the B*NP3 valid output positions (columns ordered (b, h, w)),
    # then bias -> ReLU -> eval-mode BatchNorm (PyTorch order: relu, then bn).
    z1 = jnp.dot(z0, sel_ref[...], preferred_element_type=f32)    # (64, B*NP3)
    z2 = jnp.maximum(z1 + b3_ref[...], 0.0)
    z3 = z2 * scale_ref[...] + shift_ref[...]

    # ---- reorganize to the LSTM input (T*B, 256): one tiny transpose plus
    # lane concatenation.  The resulting feature order is (position-major,
    # channel-minor); prepare_params() permuted W_ih's rows to compensate.
    zt = z3.T                                                     # (B*NP3, 64)
    rows = []
    for t in range(T):
        for b in range(B):
            rows.append(jnp.concatenate(
                [zt[b * NP3 + p: b * NP3 + p + 1, t * CPT:(t + 1) * CPT]
                 for p in range(NP3)], axis=1))                   # (1, 256)
    xfeat = jnp.concatenate(rows, axis=0)                         # (T*B, 256)

    # ---- LSTM: hoisted input projection, 128-lane gate tiles.
    # Pad-lane invariants: wih/whh/bias pad columns and whh/h0/c0 pad rows
    # are exactly zero, so h/c pad lanes stay zero through every step.
    xp = []
    for k in range(4):   # gate order (i, f, g, o), per-gate to limit vregs
        xp.append(jnp.dot(xfeat, wih_ref[:, k * HP:(k + 1) * HP],
                          preferred_element_type=f32)
                  + bih_ref[:, k * HP:(k + 1) * HP])              # (T*B, HP)

    h = h0_ref[...]                                               # (B, HP)
    c = c0_ref[...]
    hs_rows = [None] * (B * T)
    for t in range(T):
        lo = t * B
        gi = _sigmoid(xp[0][lo:lo + B] + jnp.dot(
            h, whh_ref[:, 0:HP], preferred_element_type=f32))
        gf = _sigmoid(xp[1][lo:lo + B] + jnp.dot(
            h, whh_ref[:, HP:2 * HP], preferred_element_type=f32))
        gg = jnp.tanh(xp[2][lo:lo + B] + jnp.dot(
            h, whh_ref[:, 2 * HP:3 * HP], preferred_element_type=f32))
        go = _sigmoid(xp[3][lo:lo + B] + jnp.dot(
            h, whh_ref[:, 3 * HP:4 * HP], preferred_element_type=f32))
        c = gf * c + gi * gg
        h = go * jnp.tanh(c)
        for b in range(B):
            hs_rows[b * T + t] = h[b:b + 1, :]   # PyTorch (b, t) output order

    # ---- classifier head, batched over all timesteps (one matmul) ----------
    hs = jnp.concatenate(hs_rows, axis=0)                         # (B*T, HP)
    logits = jnp.dot(jnp.tanh(hs), wlin_ref[...],
                     preferred_element_type=f32) + blin_ref[...]  # (B*T, OP)
    m = jnp.max(logits, axis=-1, keepdims=True)
    lse = m + jnp.log(jnp.sum(jnp.exp(logits - m), axis=-1, keepdims=True))
    logp_ref[...] = logits - lse      # single lane-dense (B*T, 128) store
    hn_ref[...] = h
    cn_ref[...] = c


# ------------------------ one-time parameter prep ---------------------------

def prepare_params(params, image_shape):
    """All weight re-layout / padding, hoisted out of the per-call forward."""
    B, _, H, W = image_shape
    d = _conv_dims(B, H, W)
    PW, IMG, NPOS, NP3, CPT = d["PW"], d["IMG"], d["NPOS"], d["NP3"], d["CPT"]
    OH3, OW3 = d["OH3"], d["OW3"]

    # conv1: four zero-padded copies (one per 2x2 pool offset) acting on a
    # shared stride-2 (4,8) input window, stacked along output channels.
    b1 = jnp.pad(params["conv1_b"].reshape(6, 1), ((0, 2), (0, 0)))
    w1_blocks, b1_blocks = [], []
    for di in range(2):
        for dj in range(2):
            wpad = jnp.pad(params["conv1_w"],
                           ((0, 0), (0, 0), (di, 1 - di), (dj, 1 - dj)))
            blk = wpad.transpose(0, 2, 3, 1).reshape(6, 96)
            w1_blocks.append(jnp.pad(blk, ((0, 2), (0, 0))))
            b1_blocks.append(b1)
    w1 = jnp.concatenate(w1_blocks, axis=0)                       # (32, 96)
    b1c = jnp.concatenate(b1_blocks, axis=0)                      # (32, 1)

    # conv2 / conv3 weights in "channels on sublanes" form (kernel-offset
    # major columns; conv2 input channels padded 6 -> 8 to match the kernel's
    # 8-row pooled activation blocks).
    w2 = jnp.pad(params["conv2_w"].transpose(0, 2, 3, 1),
                 ((0, 0), (0, 0), (0, 0), (0, 2))).reshape(16, 144)
    b2c = params["conv2_b"].reshape(16, 1)
    w3 = params["conv3_w"].transpose(0, 2, 3, 1).reshape(64, 448)
    b3c = params["conv3_b"].reshape(64, 1)

    eps = 1e-5
    scale = (params["bn_gamma"] / jnp.sqrt(params["bn_var"] + eps)).reshape(64, 1)
    shift = params["bn_beta"].reshape(64, 1) - params["bn_mean"].reshape(64, 1) * scale

    # selection matrix: pooled-frame position -> valid conv3 output column,
    # columns ordered (batch, spatial) to match the kernel's X construction.
    cols = [b * IMG + oh * PW + ow
            for b in range(B) for oh in range(OH3) for ow in range(OW3)]
    sel = jax.nn.one_hot(jnp.asarray(cols), NPOS, dtype=jnp.float32).T

    # LSTM weights, gates padded to 128 lanes (pad entries exactly zero so the
    # padded h/c lanes stay zero -- do not change this invariant).
    wih = jnp.pad(params["lstm_w_ih"].T.reshape(INPUT_DIM, 4, HIDDEN_DIM),
                  ((0, 0), (0, 0), (0, HP - HIDDEN_DIM))
                  ).reshape(INPUT_DIM, 4 * HP)
    # compensate the kernel's (position-major, channel-minor) feature order
    wih = wih.reshape(CPT, NP3, 4 * HP).transpose(1, 0, 2).reshape(INPUT_DIM, 4 * HP)
    whh = jnp.pad(params["lstm_w_hh"].T.reshape(HIDDEN_DIM, 4, HIDDEN_DIM),
                  ((0, HP - HIDDEN_DIM), (0, 0), (0, HP - HIDDEN_DIM))
                  ).reshape(HP, 4 * HP)
    bih = jnp.pad((params["lstm_b_ih"] + params["lstm_b_hh"]).reshape(4, HIDDEN_DIM),
                  ((0, 0), (0, HP - HIDDEN_DIM))).reshape(1, 4 * HP)

    wlin = jnp.pad(params["lin_w"].T,
                   ((0, HP - HIDDEN_DIM), (0, OP - NUM_CLASSES)))
    blin = jnp.pad(params["lin_b"], (0, OP - NUM_CLASSES),
                   constant_values=NEG_BIG).reshape(1, OP)

    return {"w1": w1, "b1": b1c, "w2": w2, "b2": b2c, "w3": w3, "b3": b3c,
            "scale": scale, "shift": shift, "sel": sel,
            "wih": wih, "bih": bih, "whh": whh, "wlin": wlin, "blin": blin}


# ----------------------------- model forward --------------------------------

def c3dlstm_forward(prep, image, hidden):
    B, _, H, W = image.shape
    d = _conv_dims(B, H, W)
    PH, PW, NPOS, T = d["PH"], d["PW"], d["NPOS"], d["T"]
    h0, c0 = hidden                                   # each (nl=1, B, H)

    # Per-call input prep only: stride-2 (4x8)-window patches of the image in
    # the "positions on lanes" layout (~80 KB), plus hidden-state padding.
    pieces = [image[:, :, ih: ih + 2 * (PH - 1) + 1: 2,
                    iw: iw + 2 * (PW - 1) + 1: 2]
              for ih in range(4) for iw in range(8)]       # (B, 3, PH, PW)
    slab = (jnp.stack(pieces, axis=0)                      # (32, B, 3, PH, PW)
            .transpose(0, 2, 1, 3, 4).reshape(96, NPOS))
    h0p = jnp.pad(h0[0], ((0, 0), (0, HP - HIDDEN_DIM)))
    c0p = jnp.pad(c0[0], ((0, 0), (0, HP - HIDDEN_DIM)))

    inputs = (slab, prep["w1"], prep["b1"], prep["w2"], prep["b2"],
              prep["w3"], prep["b3"], prep["scale"], prep["shift"],
              prep["sel"], prep["wih"], prep["bih"], prep["whh"],
              h0p, c0p, prep["wlin"], prep["blin"])

    def _fs(shape):
        nd = len(shape)
        return pl.BlockSpec(tuple(shape), lambda i, nd=nd: (0,) * nd)

    kernel = functools.partial(_c3dlstm_kernel, dims=d, B=B)
    logp_pad, hn_pad, cn_pad = pl.pallas_call(
        kernel,
        out_shape=(jax.ShapeDtypeStruct((B * T, OP), jnp.float32),
                   jax.ShapeDtypeStruct((B, HP), jnp.float32),
                   jax.ShapeDtypeStruct((B, HP), jnp.float32)),
        grid=(1,),
        in_specs=[_fs(x.shape) for x in inputs],
        out_specs=(_fs((B * T, OP)), _fs((B, HP)), _fs((B, HP))),
        compiler_params=pltpu.CompilerParams(
            dimension_semantics=("arbitrary",)),
    )(*inputs)

    logp = logp_pad[:, :NUM_CLASSES]                  # rows already (b, t)
    hn = hn_pad[:, :HIDDEN_DIM][None]
    cn = cn_pad[:, :HIDDEN_DIM][None]
    return logp, (hn, cn)


def init_params(key):
    ks = jax.random.split(key, 14)

    def w(k, shape, fan_in):
        return jax.random.normal(k, shape, jnp.float32) / jnp.sqrt(fan_in)

    return {
        "conv1_w": w(ks[0], (6, 3, 3, 7), 3 * 3 * 7),
        "conv1_b": w(ks[1], (6,), 3 * 3 * 7),
        "conv2_w": w(ks[2], (16, 6, 3, 6), 6 * 3 * 6),
        "conv2_b": w(ks[3], (16,), 6 * 3 * 6),
        "conv3_w": w(ks[4], (64, 16, 4, 7), 16 * 4 * 7),
        "conv3_b": w(ks[5], (64,), 16 * 4 * 7),
        "bn_gamma": jax.random.uniform(ks[6], (64,), jnp.float32, 0.5, 1.5),
        "bn_beta": 0.1 * jax.random.normal(ks[7], (64,), jnp.float32),
        "bn_mean": 0.1 * jax.random.normal(ks[8], (64,), jnp.float32),
        "bn_var": jax.random.uniform(ks[9], (64,), jnp.float32, 0.5, 1.5),
        "lstm_w_ih": w(ks[10], (4 * HIDDEN_DIM, INPUT_DIM), INPUT_DIM),
        "lstm_w_hh": w(ks[11], (4 * HIDDEN_DIM, HIDDEN_DIM), HIDDEN_DIM),
        "lstm_b_ih": jnp.zeros((4 * HIDDEN_DIM,), jnp.float32),
        "lstm_b_hh": jnp.zeros((4 * HIDDEN_DIM,), jnp.float32),
        "lin_w": w(ks[12], (NUM_CLASSES, HIDDEN_DIM), HIDDEN_DIM),
        "lin_b": jnp.zeros((NUM_CLASSES,), jnp.float32),
    }


if __name__ == "__main__":
    key = jax.random.PRNGKey(0)
    k_img, k_h, k_c, k_p = jax.random.split(key, 4)

    BS, NL = 2, 1
    # (16, 36) spatial -> conv1 (14,30) -> pool (7,15) -> conv2 (5,10)
    # -> conv3 (2,4); 64*2*4 = 512 per image -> seq_len T = 512/256 = 2.
    image = jax.random.normal(k_img, (BS, 3, 16, 36), jnp.float32)
    h0 = jax.random.normal(k_h, (NL, BS, HIDDEN_DIM), jnp.float32)
    c0 = jax.random.normal(k_c, (NL, BS, HIDDEN_DIM), jnp.float32)

    params = init_params(k_p)
    prep = prepare_params(params, image.shape)        # one-time, outside jit

    fwd = jax.jit(c3dlstm_forward)
    logp, (hn, cn) = fwd(prep, image, (h0, c0))
    jax.block_until_ready((logp, hn, cn))

    T = _conv_dims(BS, 16, 36)["T"]
    assert logp.shape == (BS * T, NUM_CLASSES)
    assert hn.shape == (NL, BS, HIDDEN_DIM) and cn.shape == (NL, BS, HIDDEN_DIM)
    print("KERNEL_OK")
</pallas_src>

<mosaic_0001>
module attributes {stable_mosaic.version = 11 : i64} {
  func.func @_c3dlstm_kernel(%arg0: i32, %arg1: memref<96x210xf32, #tpu.memory_space<vmem>>, %arg2: memref<32x96xf32, #tpu.memory_space<vmem>>, %arg3: memref<32x1xf32, #tpu.memory_space<vmem>>, %arg4: memref<16x144xf32, #tpu.memory_space<vmem>>, %arg5: memref<16x1xf32, #tpu.memory_space<vmem>>, %arg6: memref<64x448xf32, #tpu.memory_space<vmem>>, %arg7: memref<64x1xf32, #tpu.memory_space<vmem>>, %arg8: memref<64x1xf32, #tpu.memory_space<vmem>>, %arg9: memref<64x1xf32, #tpu.memory_space<vmem>>, %arg10: memref<210x16xf32, #tpu.memory_space<vmem>>, %arg11: memref<256x512xf32, #tpu.memory_space<vmem>>, %arg12: memref<1x512xf32, #tpu.memory_space<vmem>>, %arg13: memref<128x512xf32, #tpu.memory_space<vmem>>, %arg14: memref<2x128xf32, #tpu.memory_space<vmem>>, %arg15: memref<2x128xf32, #tpu.memory_space<vmem>>, %arg16: memref<128x128xf32, #tpu.memory_space<vmem>>, %arg17: memref<1x128xf32, #tpu.memory_space<vmem>>, %arg18: memref<4x128xf32, #tpu.memory_space<vmem>>, %arg19: memref<2x128xf32, #tpu.memory_space<vmem>>, %arg20: memref<2x128xf32, #tpu.memory_space<vmem>>) attributes {dimension_semantics = [#tpu.dimension_semantics<arbitrary>], iteration_bounds = array<i64: 1>, scalar_prefetch = 0 : i64, scratch_operands = 0 : i64, tpu.core_type = #tpu.core_type<tc>, window_params = [{pipeline_mode = #tpu.pipeline_mode<synchronous>, transform_indices = @transform_0, window_bounds = array<i64: 96, 210>}, {pipeline_mode = #tpu.pipeline_mode<synchronous>, transform_indices = @transform_1, window_bounds = array<i64: 32, 96>}, {pipeline_mode = #tpu.pipeline_mode<synchronous>, transform_indices = @transform_2, window_bounds = array<i64: 32, 1>}, {pipeline_mode = #tpu.pipeline_mode<synchronous>, transform_indices = @transform_3, window_bounds = array<i64: 16, 144>}, {pipeline_mode = #tpu.pipeline_mode<synchronous>, transform_indices = @transform_4, window_bounds = array<i64: 16, 1>}, {pipeline_mode = #tpu.pipeline_mode<synchronous>, transform_indices = @transform_5, window_bounds = array<i64: 64, 448>}, {pipeline_mode = #tpu.pipeline_mode<synchronous>, transform_indices = @transform_6, window_bounds = array<i64: 64, 1>}, {pipeline_mode = #tpu.pipeline_mode<synchronous>, transform_indices = @transform_7, window_bounds = array<i64: 64, 1>}, {pipeline_mode = #tpu.pipeline_mode<synchronous>, transform_indices = @transform_8, window_bounds = array<i64: 64, 1>}, {pipeline_mode = #tpu.pipeline_mode<synchronous>, transform_indices = @transform_9, window_bounds = array<i64: 210, 16>}, {pipeline_mode = #tpu.pipeline_mode<synchronous>, transform_indices = @transform_10, window_bounds = array<i64: 256, 512>}, {pipeline_mode = #tpu.pipeline_mode<synchronous>, transform_indices = @transform_11, window_bounds = array<i64: 1, 512>}, {pipeline_mode = #tpu.pipeline_mode<synchronous>, transform_indices = @transform_12, window_bounds = array<i64: 128, 512>}, {pipeline_mode = #tpu.pipeline_mode<synchronous>, transform_indices = @transform_13, window_bounds = array<i64: 2, 128>}, {pipeline_mode = #tpu.pipeline_mode<synchronous>, transform_indices = @transform_14, window_bounds = array<i64: 2, 128>}, {pipeline_mode = #tpu.pipeline_mode<synchronous>, transform_indices = @transform_15, window_bounds = array<i64: 128, 128>}, {pipeline_mode = #tpu.pipeline_mode<synchronous>, transform_indices = @transform_16, window_bounds = array<i64: 1, 128>}, {pipeline_mode = #tpu.pipeline_mode<synchronous>, transform_indices = @transform_17, window_bounds = array<i64: 4, 128>}, {pipeline_mode = #tpu.pipeline_mode<synchronous>, transform_indices = @transform_18, window_bounds = array<i64: 2, 128>}, {pipeline_mode = #tpu.pipeline_mode<synchronous>, transform_indices = @transform_19, window_bounds = array<i64: 2, 128>}]} {
    %c0 = arith.constant 0 : index
    %c0_0 = arith.constant 0 : index
    %0 = vector.load %arg2[%c0, %c0_0] : memref<32x96xf32, #tpu.memory_space<vmem>>, vector<32x96xf32>
    %c0_1 = arith.constant 0 : index
    %c0_2 = arith.constant 0 : index
    %1 = vector.load %arg1[%c0_1, %c0_2] : memref<96x210xf32, #tpu.memory_space<vmem>>, vector<96x210xf32>
    %cst = arith.constant dense<0.000000e+00> : vector<32x210xf32>
    %2 = tpu.matmul %0, %1, %cst {dimension_numbers = #tpu.dot_dimension_numbers<[1], [0], [0], [1], [0, 0, 1, 1], [], []>} : vector<32x96xf32>, vector<96x210xf32>, vector<32x210xf32> -> vector<32x210xf32>
    %c0_3 = arith.constant 0 : index
    %c0_4 = arith.constant 0 : index
    %3 = vector.load %arg3[%c0_3, %c0_4] : memref<32x1xf32, #tpu.memory_space<vmem>>, vector<32x1xf32>
    %4 = vector.broadcast %3 : vector<32x1xf32> to vector<32x210xf32>
    %5 = arith.addf %2, %4 : vector<32x210xf32>
    %cst_5 = arith.constant 0.000000e+00 : f32
    %6 = vector.broadcast %cst_5 : f32 to vector<32x210xf32>
    %7 = arith.maximumf %5, %6 : vector<32x210xf32>
    %8 = vector.extract_strided_slice %7 {offsets = [0, 0], sizes = [8, 210], strides = [1, 1]} : vector<32x210xf32> to vector<8x210xf32>
    %9 = vector.extract_strided_slice %7 {offsets = [8, 0], sizes = [8, 210], strides = [1, 1]} : vector<32x210xf32> to vector<8x210xf32>
    %10 = arith.maximumf %8, %9 : vector<8x210xf32>
    %11 = vector.extract_strided_slice %7 {offsets = [16, 0], sizes = [8, 210], strides = [1, 1]} : vector<32x210xf32> to vector<8x210xf32>
    %12 = vector.extract_strided_slice %7 {offsets = [24, 0], sizes = [8, 210], strides = [1, 1]} : vector<32x210xf32> to vector<8x210xf32>
    %13 = arith.maximumf %11, %12 : vector<8x210xf32>
    %14 = arith.maximumf %10, %13 : vector<8x210xf32>
    %cst_6 = arith.constant 0.000000e+00 : f32
    %15 = vector.broadcast %cst_6 : f32 to vector<8x35xf32>
    %16 = tpu.concatenate %14, %15 in 1 : vector<8x210xf32>, vector<8x35xf32> -> vector<8x245xf32>
    %17 = vector.extract_strided_slice %16 {offsets = [0, 0], sizes = [8, 210], strides = [1, 1]} : vector<8x245xf32> to vector<8x210xf32>
    %18 = vector.extract_strided_slice %16 {offsets = [0, 1], sizes = [8, 210], strides = [1, 1]} : vector<8x245xf32> to vector<8x210xf32>
    %19 = vector.extract_strided_slice %16 {offsets = [0, 2], sizes = [8, 210], strides = [1, 1]} : vector<8x245xf32> to vector<8x210xf32>
    %20 = vector.extract_strided_slice %16 {offsets = [0, 3], sizes = [8, 210], strides = [1, 1]} : vector<8x245xf32> to vector<8x210xf32>
    %21 = vector.extract_strided_slice %16 {offsets = [0, 4], sizes = [8, 210], strides = [1, 1]} : vector<8x245xf32> to vector<8x210xf32>
    %22 = vector.extract_strided_slice %16 {offsets = [0, 5], sizes = [8, 210], strides = [1, 1]} : vector<8x245xf32> to vector<8x210xf32>
    %23 = vector.extract_strided_slice %16 {offsets = [0, 15], sizes = [8, 210], strides = [1, 1]} : vector<8x245xf32> to vector<8x210xf32>
    %24 = vector.extract_strided_slice %16 {offsets = [0, 16], sizes = [8, 210], strides = [1, 1]} : vector<8x245xf32> to vector<8x210xf32>
    %25 = vector.extract_strided_slice %16 {offsets = [0, 17], sizes = [8, 210], strides = [1, 1]} : vector<8x245xf32> to vector<8x210xf32>
    %26 = vector.extract_strided_slice %16 {offsets = [0, 18], sizes = [8, 210], strides = [1, 1]} : vector<8x245xf32> to vector<8x210xf32>
    %27 = vector.extract_strided_slice %16 {offsets = [0, 19], sizes = [8, 210], strides = [1, 1]} : vector<8x245xf32> to vector<8x210xf32>
    %28 = vector.extract_strided_slice %16 {offsets = [0, 20], sizes = [8, 210], strides = [1, 1]} : vector<8x245xf32> to vector<8x210xf32>
    %29 = vector.extract_strided_slice %16 {offsets = [0, 30], sizes = [8, 210], strides = [1, 1]} : vector<8x245xf32> to vector<8x210xf32>
    %30 = vector.extract_strided_slice %16 {offsets = [0, 31], sizes = [8, 210], strides = [1, 1]} : vector<8x245xf32> to vector<8x210xf32>
    %31 = vector.extract_strided_slice %16 {offsets = [0, 32], sizes = [8, 210], strides = [1, 1]} : vector<8x245xf32> to vector<8x210xf32>
    %32 = vector.extract_strided_slice %16 {offsets = [0, 33], sizes = [8, 210], strides = [1, 1]} : vector<8x245xf32> to vector<8x210xf32>
    %33 = vector.extract_strided_slice %16 {offsets = [0, 34], sizes = [8, 210], strides = [1, 1]} : vector<8x245xf32> to vector<8x210xf32>
    %34 = vector.extract_strided_slice %16 {offsets = [0, 35], sizes = [8, 210], strides = [1, 1]} : vector<8x245xf32> to vector<8x210xf32>
    %35 = tpu.concatenate %17, %18, %19, %20, %21, %22, %23, %24, %25, %26, %27, %28, %29, %30, %31, %32 in 0 : vector<8x210xf32>, vector<8x210xf32>, vector<8x210xf32>, vector<8x210xf32>, vector<8x210xf32>, vector<8x210xf32>, vector<8x210xf32>, vector<8x210xf32>, vector<8x210xf32>, vector<8x210xf32>, vector<8x210xf32>, vector<8x210xf32>, vector<8x210xf32>, vector<8x210xf32>, vector<8x210xf32>, vector<8x210xf32> -> vector<128x210xf32>
    %36 = tpu.concatenate %33, %34 in 0 : vector<8x210xf32>, vector<8x210xf32> -> vector<16x210xf32>
    %37 = tpu.concatenate %35, %36 in 0 : vector<128x210xf32>, vector<16x210xf32> -> vector<144x210xf32>
    %c0_7 = arith.constant 0 : index
    %c0_8 = arith.constant 0 : index
    %38 = vector.load %arg4[%c0_7, %c0_8] : memref<16x144xf32, #tpu.memory_space<vmem>>, vector<16x144xf32>
    %cst_9 = arith.constant dense<0.000000e+00> : vector<16x210xf32>
    %39 = tpu.matmul %38, %37, %cst_9 {dimension_numbers = #tpu.dot_dimension_numbers<[1], [0], [0], [1], [0, 0, 1, 1], [], []>} : vector<16x144xf32>, vector<144x210xf32>, vector<16x210xf32> -> vector<16x210xf32>
    %c0_10 = arith.constant 0 : index
    %c0_11 = arith.constant 0 : index
    %40 = vector.load %arg5[%c0_10, %c0_11] : memref<16x1xf32, #tpu.memory_space<vmem>>, vector<16x1xf32>
    %41 = vector.broadcast %40 : vector<16x1xf32> to vector<16x210xf32>
    %42 = arith.addf %39, %41 : vector<16x210xf32>
    %cst_12 = arith.constant 0.000000e+00 : f32
    %43 = vector.broadcast %cst_12 : f32 to vector<16x210xf32>
    %44 = arith.maximumf %42, %43 : vector<16x210xf32>
    %cst_13 = arith.constant 0.000000e+00 : f32
    %45 = vector.broadcast %cst_13 : f32 to vector<16x51xf32>
    %46 = tpu.concatenate %44, %45 in 1 : vector<16x210xf32>, vector<16x51xf32> -> vector<16x261xf32>
    %47 = vector.extract_strided_slice %46 {offsets = [0, 0], sizes = [16, 210], strides = [1, 1]} : vector<16x261xf32> to vector<16x210xf32>
    %48 = vector.extract_strided_slice %46 {offsets = [0, 1], sizes = [16, 210], strides = [1, 1]} : vector<16x261xf32> to vector<16x210xf32>
    %49 = vector.extract_strided_slice %46 {offsets = [0, 2], sizes = [16, 210], strides = [1, 1]} : vector<16x261xf32> to vector<16x210xf32>
    %50 = vector.extract_strided_slice %46 {offsets = [0, 3], sizes = [16, 210], strides = [1, 1]} : vector<16x261xf32> to vector<16x210xf32>
    %51 = vector.extract_strided_slice %46 {offsets = [0, 4], sizes = [16, 210], strides = [1, 1]} : vector<16x261xf32> to vector<16x210xf32>
    %52 = vector.extract_strided_slice %46 {offsets = [0, 5], sizes = [16, 210], strides = [1, 1]} : vector<16x261xf32> to vector<16x210xf32>
    %53 = vector.extract_strided_slice %46 {offsets = [0, 6], sizes = [16, 210], strides = [1, 1]} : vector<16x261xf32> to vector<16x210xf32>
    %54 = tpu.concatenate %47, %48, %49, %50, %51, %52, %53 in 0 : vector<16x210xf32>, vector<16x210xf32>, vector<16x210xf32>, vector<16x210xf32>, vector<16x210xf32>, vector<16x210xf32>, vector<16x210xf32> -> vector<112x210xf32>
    %c0_14 = arith.constant 0 : index
    %c0_15 = arith.constant 0 : index
    %55 = vector.load %arg6[%c0_14, %c0_15] : memref<64x448xf32, #tpu.memory_space<vmem>>, vector<64x112xf32>
    %cst_16 = arith.constant dense<0.000000e+00> : vector<64x210xf32>
    %56 = tpu.matmul %55, %54, %cst_16 {dimension_numbers = #tpu.dot_dimension_numbers<[1], [0], [0], [1], [0, 0, 1, 1], [], []>} : vector<64x112xf32>, vector<112x210xf32>, vector<64x210xf32> -> vector<64x210xf32>
    %57 = vector.extract_strided_slice %46 {offsets = [0, 15], sizes = [16, 210], strides = [1, 1]} : vector<16x261xf32> to vector<16x210xf32>
    %58 = vector.extract_strided_slice %46 {offsets = [0, 16], sizes = [16, 210], strides = [1, 1]} : vector<16x261xf32> to vector<16x210xf32>
    %59 = vector.extract_strided_slice %46 {offsets = [0, 17], sizes = [16, 210], strides = [1, 1]} : vector<16x261xf32> to vector<16x210xf32>
    %60 = vector.extract_strided_slice %46 {offsets = [0, 18], sizes = [16, 210], strides = [1, 1]} : vector<16x261xf32> to vector<16x210xf32>
    %61 = vector.extract_strided_slice %46 {offsets = [0, 19], sizes = [16, 210], strides = [1, 1]} : vector<16x261xf32> to vector<16x210xf32>
    %62 = vector.extract_strided_slice %46 {offsets = [0, 20], sizes = [16, 210], strides = [1, 1]} : vector<16x261xf32> to vector<16x210xf32>
    %63 = vector.extract_strided_slice %46 {offsets = [0, 21], sizes = [16, 210], strides = [1, 1]} : vector<16x261xf32> to vector<16x210xf32>
    %64 = tpu.concatenate %57, %58, %59, %60, %61, %62, %63 in 0 : vector<16x210xf32>, vector<16x210xf32>, vector<16x210xf32>, vector<16x210xf32>, vector<16x210xf32>, vector<16x210xf32>, vector<16x210xf32> -> vector<112x210xf32>
    %c0_17 = arith.constant 0 : index
    %c112 = arith.constant 112 : index
    %65 = vector.load %arg6[%c0_17, %c112] : memref<64x448xf32, #tpu.memory_space<vmem>>, vector<64x112xf32>
    %cst_18 = arith.constant dense<0.000000e+00> : vector<64x210xf32>
    %66 = tpu.matmul %65, %64, %cst_18 {dimension_numbers = #tpu.dot_dimension_numbers<[1], [0], [0], [1], [0, 0, 1, 1], [], []>} : vector<64x112xf32>, vector<112x210xf32>, vector<64x210xf32> -> vector<64x210xf32>
    %67 = arith.addf %56, %66 : vector<64x210xf32>
    %68 = vector.extract_strided_slice %46 {offsets = [0, 30], sizes = [16, 210], strides = [1, 1]} : vector<16x261xf32> to vector<16x210xf32>
    %69 = vector.extract_strided_slice %46 {offsets = [0, 31], sizes = [16, 210], strides = [1, 1]} : vector<16x261xf32> to vector<16x210xf32>
    %70 = vector.extract_strided_slice %46 {offsets = [0, 32], sizes = [16, 210], strides = [1, 1]} : vector<16x261xf32> to vector<16x210xf32>
    %71 = vector.extract_strided_slice %46 {offsets = [0, 33], sizes = [16, 210], strides = [1, 1]} : vector<16x261xf32> to vector<16x210xf32>
    %72 = vector.extract_strided_slice %46 {offsets = [0, 34], sizes = [16, 210], strides = [1, 1]} : vector<16x261xf32> to vector<16x210xf32>
    %73 = vector.extract_strided_slice %46 {offsets = [0, 35], sizes = [16, 210], strides = [1, 1]} : vector<16x261xf32> to vector<16x210xf32>
    %74 = vector.extract_strided_slice %46 {offsets = [0, 36], sizes = [16, 210], strides = [1, 1]} : vector<16x261xf32> to vector<16x210xf32>
    %75 = tpu.concatenate %68, %69, %70, %71, %72, %73, %74 in 0 : vector<16x210xf32>, vector<16x210xf32>, vector<16x210xf32>, vector<16x210xf32>, vector<16x210xf32>, vector<16x210xf32>, vector<16x210xf32> -> vector<112x210xf32>
    %c0_19 = arith.constant 0 : index
    %c224 = arith.constant 224 : index
    %76 = vector.load %arg6[%c0_19, %c224] : memref<64x448xf32, #tpu.memory_space<vmem>>, vector<64x112xf32>
    %cst_20 = arith.constant dense<0.000000e+00> : vector<64x210xf32>
    %77 = tpu.matmul %76, %75, %cst_20 {dimension_numbers = #tpu.dot_dimension_numbers<[1], [0], [0], [1], [0, 0, 1, 1], [], []>} : vector<64x112xf32>, vector<112x210xf32>, vector<64x210xf32> -> vector<64x210xf32>
    %78 = arith.addf %67, %77 : vector<64x210xf32>
    %79 = vector.extract_strided_slice %46 {offsets = [0, 45], sizes = [16, 210], strides = [1, 1]} : vector<16x261xf32> to vector<16x210xf32>
    %80 = vector.extract_strided_slice %46 {offsets = [0, 46], sizes = [16, 210], strides = [1, 1]} : vector<16x261xf32> to vector<16x210xf32>
    %81 = vector.extract_strided_slice %46 {offsets = [0, 47], sizes = [16, 210], strides = [1, 1]} : vector<16x261xf32> to vector<16x210xf32>
    %82 = vector.extract_strided_slice %46 {offsets = [0, 48], sizes = [16, 210], strides = [1, 1]} : vector<16x261xf32> to vector<16x210xf32>
    %83 = vector.extract_strided_slice %46 {offsets = [0, 49], sizes = [16, 210], strides = [1, 1]} : vector<16x261xf32> to vector<16x210xf32>
    %84 = vector.extract_strided_slice %46 {offsets = [0, 50], sizes = [16, 210], strides = [1, 1]} : vector<16x261xf32> to vector<16x210xf32>
    %85 = vector.extract_strided_slice %46 {offsets = [0, 51], sizes = [16, 210], strides = [1, 1]} : vector<16x261xf32> to vector<16x210xf32>
    %86 = tpu.concatenate %79, %80, %81, %82, %83, %84, %85 in 0 : vector<16x210xf32>, vector<16x210xf32>, vector<16x210xf32>, vector<16x210xf32>, vector<16x210xf32>, vector<16x210xf32>, vector<16x210xf32> -> vector<112x210xf32>
    %c0_21 = arith.constant 0 : index
    %c336 = arith.constant 336 : index
    %87 = vector.load %arg6[%c0_21, %c336] : memref<64x448xf32, #tpu.memory_space<vmem>>, vector<64x112xf32>
    %cst_22 = arith.constant dense<0.000000e+00> : vector<64x210xf32>
    %88 = tpu.matmul %87, %86, %cst_22 {dimension_numbers = #tpu.dot_dimension_numbers<[1], [0], [0], [1], [0, 0, 1, 1], [], []>} : vector<64x112xf32>, vector<112x210xf32>, vector<64x210xf32> -> vector<64x210xf32>
    %89 = arith.addf %78, %88 : vector<64x210xf32>
    %c0_23 = arith.constant 0 : index
    %c0_24 = arith.constant 0 : index
    %90 = vector.load %arg10[%c0_23, %c0_24] : memref<210x16xf32, #tpu.memory_space<vmem>>, vector<210x16xf32>
    %cst_25 = arith.constant dense<0.000000e+00> : vector<64x16xf32>
    %91 = tpu.matmul %89, %90, %cst_25 {dimension_numbers = #tpu.dot_dimension_numbers<[1], [0], [0], [1], [0, 0, 1, 1], [], []>} : vector<64x210xf32>, vector<210x16xf32>, vector<64x16xf32> -> vector<64x16xf32>
    %c0_26 = arith.constant 0 : index
    %c0_27 = arith.constant 0 : index
    %92 = vector.load %arg7[%c0_26, %c0_27] : memref<64x1xf32, #tpu.memory_space<vmem>>, vector<64x1xf32>
    %93 = vector.broadcast %92 : vector<64x1xf32> to vector<64x16xf32>
    %94 = arith.addf %91, %93 : vector<64x16xf32>
    %cst_28 = arith.constant 0.000000e+00 : f32
    %95 = vector.broadcast %cst_28 : f32 to vector<64x16xf32>
    %96 = arith.maximumf %94, %95 : vector<64x16xf32>
    %c0_29 = arith.constant 0 : index
    %c0_30 = arith.constant 0 : index
    %97 = vector.load %arg8[%c0_29, %c0_30] : memref<64x1xf32, #tpu.memory_space<vmem>>, vector<64x1xf32>
    %98 = vector.broadcast %97 : vector<64x1xf32> to vector<64x16xf32>
    %99 = arith.mulf %96, %98 : vector<64x16xf32>
    %c0_31 = arith.constant 0 : index
    %c0_32 = arith.constant 0 : index
    %100 = vector.load %arg9[%c0_31, %c0_32] : memref<64x1xf32, #tpu.memory_space<vmem>>, vector<64x1xf32>
    %101 = vector.broadcast %100 : vector<64x1xf32> to vector<64x16xf32>
    %102 = arith.addf %99, %101 : vector<64x16xf32>
    %103 = tpu.transpose %102, [1, 0] : vector<64x16xf32> -> vector<16x64xf32>
    %104 = vector.extract_strided_slice %103 {offsets = [0, 0], sizes = [1, 32], strides = [1, 1]} : vector<16x64xf32> to vector<1x32xf32>
    %105 = vector.extract_strided_slice %103 {offsets = [1, 0], sizes = [1, 32], strides = [1, 1]} : vector<16x64xf32> to vector<1x32xf32>
    %106 = vector.extract_strided_slice %103 {offsets = [2, 0], sizes = [1, 32], strides = [1, 1]} : vector<16x64xf32> to vector<1x32xf32>
    %107 = vector.extract_strided_slice %103 {offsets = [3, 0], sizes = [1, 32], strides = [1, 1]} : vector<16x64xf32> to vector<1x32xf32>
    %108 = vector.extract_strided_slice %103 {offsets = [4, 0], sizes = [1, 32], strides = [1, 1]} : vector<16x64xf32> to vector<1x32xf32>
    %109 = vector.extract_strided_slice %103 {offsets = [5, 0], sizes = [1, 32], strides = [1, 1]} : vector<16x64xf32> to vector<1x32xf32>
    %110 = vector.extract_strided_slice %103 {offsets = [6, 0], sizes = [1, 32], strides = [1, 1]} : vector<16x64xf32> to vector<1x32xf32>
    %111 = vector.extract_strided_slice %103 {offsets = [7, 0], sizes = [1, 32], strides = [1, 1]} : vector<16x64xf32> to vector<1x32xf32>
    %112 = tpu.concatenate %104, %105, %106, %107, %108, %109, %110, %111 in 1 : vector<1x32xf32>, vector<1x32xf32>, vector<1x32xf32>, vector<1x32xf32>, vector<1x32xf32>, vector<1x32xf32>, vector<1x32xf32>, vector<1x32xf32> -> vector<1x256xf32>
    %113 = vector.extract_strided_slice %103 {offsets = [8, 0], sizes = [1, 32], strides = [1, 1]} : vector<16x64xf32> to vector<1x32xf32>
    %114 = vector.extract_strided_slice %103 {offsets = [9, 0], sizes = [1, 32], strides = [1, 1]} : vector<16x64xf32> to vector<1x32xf32>
    %115 = vector.extract_strided_slice %103 {offsets = [10, 0], sizes = [1, 32], strides = [1, 1]} : vector<16x64xf32> to vector<1x32xf32>
    %116 = vector.extract_strided_slice %103 {offsets = [11, 0], sizes = [1, 32], strides = [1, 1]} : vector<16x64xf32> to vector<1x32xf32>
    %117 = vector.extract_strided_slice %103 {offsets = [12, 0], sizes = [1, 32], strides = [1, 1]} : vector<16x64xf32> to vector<1x32xf32>
    %118 = vector.extract_strided_slice %103 {offsets = [13, 0], sizes = [1, 32], strides = [1, 1]} : vector<16x64xf32> to vector<1x32xf32>
    %119 = vector.extract_strided_slice %103 {offsets = [14, 0], sizes = [1, 32], strides = [1, 1]} : vector<16x64xf32> to vector<1x32xf32>
    %120 = vector.extract_strided_slice %103 {offsets = [15, 0], sizes = [1, 32], strides = [1, 1]} : vector<16x64xf32> to vector<1x32xf32>
    %121 = tpu.concatenate %113, %114, %115, %116, %117, %118, %119, %120 in 1 : vector<1x32xf32>, vector<1x32xf32>, vector<1x32xf32>, vector<1x32xf32>, vector<1x32xf32>, vector<1x32xf32>, vector<1x32xf32>, vector<1x32xf32> -> vector<1x256xf32>
    %122 = vector.extract_strided_slice %103 {offsets = [0, 32], sizes = [1, 32], strides = [1, 1]} : vector<16x64xf32> to vector<1x32xf32>
    %123 = vector.extract_strided_slice %103 {offsets = [1, 32], sizes = [1, 32], strides = [1, 1]} : vector<16x64xf32> to vector<1x32xf32>
    %124 = vector.extract_strided_slice %103 {offsets = [2, 32], sizes = [1, 32], strides = [1, 1]} : vector<16x64xf32> to vector<1x32xf32>
    %125 = vector.extract_strided_slice %103 {offsets = [3, 32], sizes = [1, 32], strides = [1, 1]} : vector<16x64xf32> to vector<1x32xf32>
    %126 = vector.extract_strided_slice %103 {offsets = [4, 32], sizes = [1, 32], strides = [1, 1]} : vector<16x64xf32> to vector<1x32xf32>
    %127 = vector.extract_strided_slice %103 {offsets = [5, 32], sizes = [1, 32], strides = [1, 1]} : vector<16x64xf32> to vector<1x32xf32>
    %128 = vector.extract_strided_slice %103 {offsets = [6, 32], sizes = [1, 32], strides = [1, 1]} : vector<16x64xf32> to vector<1x32xf32>
    %129 = vector.extract_strided_slice %103 {offsets = [7, 32], sizes = [1, 32], strides = [1, 1]} : vector<16x64xf32> to vector<1x32xf32>
    %130 = tpu.concatenate %122, %123, %124, %125, %126, %127, %128, %129 in 1 : vector<1x32xf32>, vector<1x32xf32>, vector<1x32xf32>, vector<1x32xf32>, vector<1x32xf32>, vector<1x32xf32>, vector<1x32xf32>, vector<1x32xf32> -> vector<1x256xf32>
    %131 = vector.extract_strided_slice %103 {offsets = [8, 32], sizes = [1, 32], strides = [1, 1]} : vector<16x64xf32> to vector<1x32xf32>
    %132 = vector.extract_strided_slice %103 {offsets = [9, 32], sizes = [1, 32], strides = [1, 1]} : vector<16x64xf32> to vector<1x32xf32>
    %133 = vector.extract_strided_slice %103 {offsets = [10, 32], sizes = [1, 32], strides = [1, 1]} : vector<16x64xf32> to vector<1x32xf32>
    %134 = vector.extract_strided_slice %103 {offsets = [11, 32], sizes = [1, 32], strides = [1, 1]} : vector<16x64xf32> to vector<1x32xf32>
    %135 = vector.extract_strided_slice %103 {offsets = [12, 32], sizes = [1, 32], strides = [1, 1]} : vector<16x64xf32> to vector<1x32xf32>
    %136 = vector.extract_strided_slice %103 {offsets = [13, 32], sizes = [1, 32], strides = [1, 1]} : vector<16x64xf32> to vector<1x32xf32>
    %137 = vector.extract_strided_slice %103 {offsets = [14, 32], sizes = [1, 32], strides = [1, 1]} : vector<16x64xf32> to vector<1x32xf32>
    %138 = vector.extract_strided_slice %103 {offsets = [15, 32], sizes = [1, 32], strides = [1, 1]} : vector<16x64xf32> to vector<1x32xf32>
    %139 = tpu.concatenate %131, %132, %133, %134, %135, %136, %137, %138 in 1 : vector<1x32xf32>, vector<1x32xf32>, vector<1x32xf32>, vector<1x32xf32>, vector<1x32xf32>, vector<1x32xf32>, vector<1x32xf32>, vector<1x32xf32> -> vector<1x256xf32>
    %140 = tpu.concatenate %112, %121, %130, %139 in 0 : vector<1x256xf32>, vector<1x256xf32>, vector<1x256xf32>, vector<1x256xf32> -> vector<4x256xf32>
    %c0_33 = arith.constant 0 : index
    %c0_34 = arith.constant 0 : index
    %141 = vector.load %arg11[%c0_33, %c0_34] : memref<256x512xf32, #tpu.memory_space<vmem>>, vector<256x128xf32>
    %cst_35 = arith.constant dense<0.000000e+00> : vector<4x128xf32>
    %142 = tpu.matmul %140, %141, %cst_35 {dimension_numbers = #tpu.dot_dimension_numbers<[1], [0], [0], [1], [0, 0, 1, 1], [], []>} : vector<4x256xf32>, vector<256x128xf32>, vector<4x128xf32> -> vector<4x128xf32>
    %c0_36 = arith.constant 0 : index
    %c0_37 = arith.constant 0 : index
    %143 = vector.load %arg12[%c0_36, %c0_37] : memref<1x512xf32, #tpu.memory_space<vmem>>, vector<1x128xf32>
    %144 = vector.broadcast %143 : vector<1x128xf32> to vector<4x128xf32>
    %145 = arith.addf %142, %144 : vector<4x128xf32>
    %c0_38 = arith.constant 0 : index
    %c128 = arith.constant 128 : index
    %146 = vector.load %arg11[%c0_38, %c128] : memref<256x512xf32, #tpu.memory_space<vmem>>, vector<256x128xf32>
    %cst_39 = arith.constant dense<0.000000e+00> : vector<4x128xf32>
    %147 = tpu.matmul %140, %146, %cst_39 {dimension_numbers = #tpu.dot_dimension_numbers<[1], [0], [0], [1], [0, 0, 1, 1], [], []>} : vector<4x256xf32>, vector<256x128xf32>, vector<4x128xf32> -> vector<4x128xf32>
    %c0_40 = arith.constant 0 : index
    %c128_41 = arith.constant 128 : index
    %148 = vector.load %arg12[%c0_40, %c128_41] : memref<1x512xf32, #tpu.memory_space<vmem>>, vector<1x128xf32>
    %149 = vector.broadcast %148 : vector<1x128xf32> to vector<4x128xf32>
    %150 = arith.addf %147, %149 : vector<4x128xf32>
    %c0_42 = arith.constant 0 : index
    %c256 = arith.constant 256 : index
    %151 = vector.load %arg11[%c0_42, %c256] : memref<256x512xf32, #tpu.memory_space<vmem>>, vector<256x128xf32>
    %cst_43 = arith.constant dense<0.000000e+00> : vector<4x128xf32>
    %152 = tpu.matmul %140, %151, %cst_43 {dimension_numbers = #tpu.dot_dimension_numbers<[1], [0], [0], [1], [0, 0, 1, 1], [], []>} : vector<4x256xf32>, vector<256x128xf32>, vector<4x128xf32> -> vector<4x128xf32>
    %c0_44 = arith.constant 0 : index
    %c256_45 = arith.constant 256 : index
    %153 = vector.load %arg12[%c0_44, %c256_45] : memref<1x512xf32, #tpu.memory_space<vmem>>, vector<1x128xf32>
    %154 = vector.broadcast %153 : vector<1x128xf32> to vector<4x128xf32>
    %155 = arith.addf %152, %154 : vector<4x128xf32>
    %c0_46 = arith.constant 0 : index
    %c384 = arith.constant 384 : index
    %156 = vector.load %arg11[%c0_46, %c384] : memref<256x512xf32, #tpu.memory_space<vmem>>, vector<256x128xf32>
    %cst_47 = arith.constant dense<0.000000e+00> : vector<4x128xf32>
    %157 = tpu.matmul %140, %156, %cst_47 {dimension_numbers = #tpu.dot_dimension_numbers<[1], [0], [0], [1], [0, 0, 1, 1], [], []>} : vector<4x256xf32>, vector<256x128xf32>, vector<4x128xf32> -> vector<4x128xf32>
    %c0_48 = arith.constant 0 : index
    %c384_49 = arith.constant 384 : index
    %158 = vector.load %arg12[%c0_48, %c384_49] : memref<1x512xf32, #tpu.memory_space<vmem>>, vector<1x128xf32>
    %159 = vector.broadcast %158 : vector<1x128xf32> to vector<4x128xf32>
    %160 = arith.addf %157, %159 : vector<4x128xf32>
    %c0_50 = arith.constant 0 : index
    %c0_51 = arith.constant 0 : index
    %161 = vector.load %arg14[%c0_50, %c0_51] : memref<2x128xf32, #tpu.memory_space<vmem>>, vector<2x128xf32>
    %c0_52 = arith.constant 0 : index
    %c0_53 = arith.constant 0 : index
    %162 = vector.load %arg15[%c0_52, %c0_53] : memref<2x128xf32, #tpu.memory_space<vmem>>, vector<2x128xf32>
    %163 = vector.extract_strided_slice %145 {offsets = [0, 0], sizes = [2, 128], strides = [1, 1]} : vector<4x128xf32> to vector<2x128xf32>
    %c0_54 = arith.constant 0 : index
    %c0_55 = arith.constant 0 : index
    %164 = vector.load %arg13[%c0_54, %c0_55] : memref<128x512xf32, #tpu.memory_space<vmem>>, vector<128x128xf32>
    %cst_56 = arith.constant dense<0.000000e+00> : vector<2x128xf32>
    %165 = tpu.matmul %161, %164, %cst_56 {dimension_numbers = #tpu.dot_dimension_numbers<[1], [0], [0], [1], [0, 0, 1, 1], [], []>} : vector<2x128xf32>, vector<128x128xf32>, vector<2x128xf32> -> vector<2x128xf32>
    %166 = arith.addf %163, %165 : vector<2x128xf32>
    %cst_57 = arith.constant 5.000000e-01 : f32
    %167 = vector.broadcast %cst_57 : f32 to vector<2x128xf32>
    %168 = arith.mulf %167, %166 : vector<2x128xf32>
    %169 = math.tanh %168 : vector<2x128xf32>
    %cst_58 = arith.constant 1.000000e+00 : f32
    %170 = vector.broadcast %cst_58 : f32 to vector<2x128xf32>
    %171 = arith.addf %169, %170 : vector<2x128xf32>
    %cst_59 = arith.constant 5.000000e-01 : f32
    %172 = vector.broadcast %cst_59 : f32 to vector<2x128xf32>
    %173 = arith.mulf %172, %171 : vector<2x128xf32>
    %174 = vector.extract_strided_slice %150 {offsets = [0, 0], sizes = [2, 128], strides = [1, 1]} : vector<4x128xf32> to vector<2x128xf32>
    %c0_60 = arith.constant 0 : index
    %c128_61 = arith.constant 128 : index
    %175 = vector.load %arg13[%c0_60, %c128_61] : memref<128x512xf32, #tpu.memory_space<vmem>>, vector<128x128xf32>
    %cst_62 = arith.constant dense<0.000000e+00> : vector<2x128xf32>
    %176 = tpu.matmul %161, %175, %cst_62 {dimension_numbers = #tpu.dot_dimension_numbers<[1], [0], [0], [1], [0, 0, 1, 1], [], []>} : vector<2x128xf32>, vector<128x128xf32>, vector<2x128xf32> -> vector<2x128xf32>
    %177 = arith.addf %174, %176 : vector<2x128xf32>
    %cst_63 = arith.constant 5.000000e-01 : f32
    %178 = vector.broadcast %cst_63 : f32 to vector<2x128xf32>
    %179 = arith.mulf %178, %177 : vector<2x128xf32>
    %180 = math.tanh %179 : vector<2x128xf32>
    %cst_64 = arith.constant 1.000000e+00 : f32
    %181 = vector.broadcast %cst_64 : f32 to vector<2x128xf32>
    %182 = arith.addf %180, %181 : vector<2x128xf32>
    %cst_65 = arith.constant 5.000000e-01 : f32
    %183 = vector.broadcast %cst_65 : f32 to vector<2x128xf32>
    %184 = arith.mulf %183, %182 : vector<2x128xf32>
    %185 = vector.extract_strided_slice %155 {offsets = [0, 0], sizes = [2, 128], strides = [1, 1]} : vector<4x128xf32> to vector<2x128xf32>
    %c0_66 = arith.constant 0 : index
    %c256_67 = arith.constant 256 : index
    %186 = vector.load %arg13[%c0_66, %c256_67] : memref<128x512xf32, #tpu.memory_space<vmem>>, vector<128x128xf32>
    %cst_68 = arith.constant dense<0.000000e+00> : vector<2x128xf32>
    %187 = tpu.matmul %161, %186, %cst_68 {dimension_numbers = #tpu.dot_dimension_numbers<[1], [0], [0], [1], [0, 0, 1, 1], [], []>} : vector<2x128xf32>, vector<128x128xf32>, vector<2x128xf32> -> vector<2x128xf32>
    %188 = arith.addf %185, %187 : vector<2x128xf32>
    %189 = math.tanh %188 : vector<2x128xf32>
    %190 = vector.extract_strided_slice %160 {offsets = [0, 0], sizes = [2, 128], strides = [1, 1]} : vector<4x128xf32> to vector<2x128xf32>
    %c0_69 = arith.constant 0 : index
    %c384_70 = arith.constant 384 : index
    %191 = vector.load %arg13[%c0_69, %c384_70] : memref<128x512xf32, #tpu.memory_space<vmem>>, vector<128x128xf32>
    %cst_71 = arith.constant dense<0.000000e+00> : vector<2x128xf32>
    %192 = tpu.matmul %161, %191, %cst_71 {dimension_numbers = #tpu.dot_dimension_numbers<[1], [0], [0], [1], [0, 0, 1, 1], [], []>} : vector<2x128xf32>, vector<128x128xf32>, vector<2x128xf32> -> vector<2x128xf32>
    %193 = arith.addf %190, %192 : vector<2x128xf32>
    %cst_72 = arith.constant 5.000000e-01 : f32
    %194 = vector.broadcast %cst_72 : f32 to vector<2x128xf32>
    %195 = arith.mulf %194, %193 : vector<2x128xf32>
    %196 = math.tanh %195 : vector<2x128xf32>
    %cst_73 = arith.constant 1.000000e+00 : f32
    %197 = vector.broadcast %cst_73 : f32 to vector<2x128xf32>
    %198 = arith.addf %196, %197 : vector<2x128xf32>
    %cst_74 = arith.constant 5.000000e-01 : f32
    %199 = vector.broadcast %cst_74 : f32 to vector<2x128xf32>
    %200 = arith.mulf %199, %198 : vector<2x128xf32>
    %201 = arith.mulf %184, %162 : vector<2x128xf32>
    %202 = arith.mulf %173, %189 : vector<2x128xf32>
    %203 = arith.addf %201, %202 : vector<2x128xf32>
    %204 = math.tanh %203 : vector<2x128xf32>
    %205 = arith.mulf %200, %204 : vector<2x128xf32>
    %206 = vector.extract_strided_slice %205 {offsets = [0, 0], sizes = [1, 128], strides = [1, 1]} : vector<2x128xf32> to vector<1x128xf32>
    %207 = vector.extract_strided_slice %205 {offsets = [1, 0], sizes = [1, 128], strides = [1, 1]} : vector<2x128xf32> to vector<1x128xf32>
    %208 = vector.extract_strided_slice %145 {offsets = [2, 0], sizes = [2, 128], strides = [1, 1]} : vector<4x128xf32> to vector<2x128xf32>
    %c0_75 = arith.constant 0 : index
    %c0_76 = arith.constant 0 : index
    %209 = vector.load %arg13[%c0_75, %c0_76] : memref<128x512xf32, #tpu.memory_space<vmem>>, vector<128x128xf32>
    %cst_77 = arith.constant dense<0.000000e+00> : vector<2x128xf32>
    %210 = tpu.matmul %205, %209, %cst_77 {dimension_numbers = #tpu.dot_dimension_numbers<[1], [0], [0], [1], [0, 0, 1, 1], [], []>} : vector<2x128xf32>, vector<128x128xf32>, vector<2x128xf32> -> vector<2x128xf32>
    %211 = arith.addf %208, %210 : vector<2x128xf32>
    %cst_78 = arith.constant 5.000000e-01 : f32
    %212 = vector.broadcast %cst_78 : f32 to vector<2x128xf32>
    %213 = arith.mulf %212, %211 : vector<2x128xf32>
    %214 = math.tanh %213 : vector<2x128xf32>
    %cst_79 = arith.constant 1.000000e+00 : f32
    %215 = vector.broadcast %cst_79 : f32 to vector<2x128xf32>
    %216 = arith.addf %214, %215 : vector<2x128xf32>
    %cst_80 = arith.constant 5.000000e-01 : f32
    %217 = vector.broadcast %cst_80 : f32 to vector<2x128xf32>
    %218 = arith.mulf %217, %216 : vector<2x128xf32>
    %219 = vector.extract_strided_slice %150 {offsets = [2, 0], sizes = [2, 128], strides = [1, 1]} : vector<4x128xf32> to vector<2x128xf32>
    %c0_81 = arith.constant 0 : index
    %c128_82 = arith.constant 128 : index
    %220 = vector.load %arg13[%c0_81, %c128_82] : memref<128x512xf32, #tpu.memory_space<vmem>>, vector<128x128xf32>
    %cst_83 = arith.constant dense<0.000000e+00> : vector<2x128xf32>
    %221 = tpu.matmul %205, %220, %cst_83 {dimension_numbers = #tpu.dot_dimension_numbers<[1], [0], [0], [1], [0, 0, 1, 1], [], []>} : vector<2x128xf32>, vector<128x128xf32>, vector<2x128xf32> -> vector<2x128xf32>
    %222 = arith.addf %219, %221 : vector<2x128xf32>
    %cst_84 = arith.constant 5.000000e-01 : f32
    %223 = vector.broadcast %cst_84 : f32 to vector<2x128xf32>
    %224 = arith.mulf %223, %222 : vector<2x128xf32>
    %225 = math.tanh %224 : vector<2x128xf32>
    %cst_85 = arith.constant 1.000000e+00 : f32
    %226 = vector.broadcast %cst_85 : f32 to vector<2x128xf32>
    %227 = arith.addf %225, %226 : vector<2x128xf32>
    %cst_86 = arith.constant 5.000000e-01 : f32
    %228 = vector.broadcast %cst_86 : f32 to vector<2x128xf32>
    %229 = arith.mulf %228, %227 : vector<2x128xf32>
    %230 = vector.extract_strided_slice %155 {offsets = [2, 0], sizes = [2, 128], strides = [1, 1]} : vector<4x128xf32> to vector<2x128xf32>
    %c0_87 = arith.constant 0 : index
    %c256_88 = arith.constant 256 : index
    %231 = vector.load %arg13[%c0_87, %c256_88] : memref<128x512xf32, #tpu.memory_space<vmem>>, vector<128x128xf32>
    %cst_89 = arith.constant dense<0.000000e+00> : vector<2x128xf32>
    %232 = tpu.matmul %205, %231, %cst_89 {dimension_numbers = #tpu.dot_dimension_numbers<[1], [0], [0], [1], [0, 0, 1, 1], [], []>} : vector<2x128xf32>, vector<128x128xf32>, vector<2x128xf32> -> vector<2x128xf32>
    %233 = arith.addf %230, %232 : vector<2x128xf32>
    %234 = math.tanh %233 : vector<2x128xf32>
    %235 = vector.extract_strided_slice %160 {offsets = [2, 0], sizes = [2, 128], strides = [1, 1]} : vector<4x128xf32> to vector<2x128xf32>
    %c0_90 = arith.constant 0 : index
    %c384_91 = arith.constant 384 : index
    %236 = vector.load %arg13[%c0_90, %c384_91] : memref<128x512xf32, #tpu.memory_space<vmem>>, vector<128x128xf32>
    %cst_92 = arith.constant dense<0.000000e+00> : vector<2x128xf32>
    %237 = tpu.matmul %205, %236, %cst_92 {dimension_numbers = #tpu.dot_dimension_numbers<[1], [0], [0], [1], [0, 0, 1, 1], [], []>} : vector<2x128xf32>, vector<128x128xf32>, vector<2x128xf32> -> vector<2x128xf32>
    %238 = arith.addf %235, %237 : vector<2x128xf32>
    %cst_93 = arith.constant 5.000000e-01 : f32
    %239 = vector.broadcast %cst_93 : f32 to vector<2x128xf32>
    %240 = arith.mulf %239, %238 : vector<2x128xf32>
    %241 = math.tanh %240 : vector<2x128xf32>
    %cst_94 = arith.constant 1.000000e+00 : f32
    %242 = vector.broadcast %cst_94 : f32 to vector<2x128xf32>
    %243 = arith.addf %241, %242 : vector<2x128xf32>
    %cst_95 = arith.constant 5.000000e-01 : f32
    %244 = vector.broadcast %cst_95 : f32 to vector<2x128xf32>
    %245 = arith.mulf %244, %243 : vector<2x128xf32>
    %246 = arith.mulf %229, %203 : vector<2x128xf32>
    %247 = arith.mulf %218, %234 : vector<2x128xf32>
    %248 = arith.addf %246, %247 : vector<2x128xf32>
    %249 = math.tanh %248 : vector<2x128xf32>
    %250 = arith.mulf %245, %249 : vector<2x128xf32>
    %251 = vector.extract_strided_slice %250 {offsets = [0, 0], sizes = [1, 128], strides = [1, 1]} : vector<2x128xf32> to vector<1x128xf32>
    %252 = vector.extract_strided_slice %250 {offsets = [1, 0], sizes = [1, 128], strides = [1, 1]} : vector<2x128xf32> to vector<1x128xf32>
    %253 = tpu.concatenate %206, %251, %207, %252 in 0 : vector<1x128xf32>, vector<1x128xf32>, vector<1x128xf32>, vector<1x128xf32> -> vector<4x128xf32>
    %254 = math.tanh %253 : vector<4x128xf32>
    %c0_96 = arith.constant 0 : index
    %c0_97 = arith.constant 0 : index
    %255 = vector.load %arg16[%c0_96, %c0_97] : memref<128x128xf32, #tpu.memory_space<vmem>>, vector<128x128xf32>
    %cst_98 = arith.constant dense<0.000000e+00> : vector<4x128xf32>
    %256 = tpu.matmul %254, %255, %cst_98 {dimension_numbers = #tpu.dot_dimension_numbers<[1], [0], [0], [1], [0, 0, 1, 1], [], []>} : vector<4x128xf32>, vector<128x128xf32>, vector<4x128xf32> -> vector<4x128xf32>
    %c0_99 = arith.constant 0 : index
    %c0_100 = arith.constant 0 : index
    %257 = vector.load %arg17[%c0_99, %c0_100] : memref<1x128xf32, #tpu.memory_space<vmem>>, vector<1x128xf32>
    %258 = vector.broadcast %257 : vector<1x128xf32> to vector<4x128xf32>
    %259 = arith.addf %256, %258 : vector<4x128xf32>
    %cst_101 = arith.constant dense<0xFF800000> : vector<4xf32>
    %260 = vector.multi_reduction <maximumf>, %259, %cst_101 [1] : vector<4x128xf32> to vector<4xf32>
    %261 = vector.shape_cast %260 : vector<4xf32> to vector<4x1xf32>
    %262 = vector.broadcast %261 : vector<4x1xf32> to vector<4x128xf32>
    %263 = arith.subf %259, %262 : vector<4x128xf32>
    %264 = math.exp %263 : vector<4x128xf32>
    %cst_102 = arith.constant dense<0.000000e+00> : vector<4xf32>
    %265 = vector.multi_reduction <add>, %264, %cst_102 [1] : vector<4x128xf32> to vector<4xf32>
    %266 = vector.shape_cast %265 : vector<4xf32> to vector<4x1xf32>
    %267 = math.log %266 : vector<4x1xf32>
    %268 = arith.addf %261, %267 : vector<4x1xf32>
    %269 = vector.broadcast %268 : vector<4x1xf32> to vector<4x128xf32>
    %270 = arith.subf %259, %269 : vector<4x128xf32>
    %c0_103 = arith.constant 0 : index
    %c0_104 = arith.constant 0 : index
    %271 = vector.load %arg18[%c0_103, %c0_104] : memref<4x128xf32, #tpu.memory_space<vmem>>, vector<4x128xf32>
    tpu.vector_store %arg18[%c0_103, %c0_104], %270 {strides = array<i32>} : memref<4x128xf32, #tpu.memory_space<vmem>>, vector<4x128xf32>,
    %c0_105 = arith.constant 0 : index
    %c0_106 = arith.constant 0 : index
    %272 = vector.load %arg19[%c0_105, %c0_106] : memref<2x128xf32, #tpu.memory_space<vmem>>, vector<2x128xf32>
    tpu.vector_store %arg19[%c0_105, %c0_106], %250 {strides = array<i32>} : memref<2x128xf32, #tpu.memory_space<vmem>>, vector<2x128xf32>,
    %c0_107 = arith.constant 0 : index
    %c0_108 = arith.constant 0 : index
    %273 = vector.load %arg20[%c0_107, %c0_108] : memref<2x128xf32, #tpu.memory_space<vmem>>, vector<2x128xf32>
    tpu.vector_store %arg20[%c0_107, %c0_108], %248 {strides = array<i32>} : memref<2x128xf32, #tpu.memory_space<vmem>>, vector<2x128xf32>,
    return
  }
  func.func @transform_0(%arg0: i32) -> (i32, i32) {
    %c0_i32 = arith.constant 0 : i32
    %c0_i32_0 = arith.constant 0 : i32
    %c0_i32_1 = arith.constant 0 : i32
    return %c0_i32, %c0_i32_0 : i32, i32
  }
  func.func @transform_1(%arg0: i32) -> (i32, i32) {
    %c0_i32 = arith.constant 0 : i32
    %c0_i32_0 = arith.constant 0 : i32
    %c0_i32_1 = arith.constant 0 : i32
    return %c0_i32, %c0_i32_0 : i32, i32
  }
  func.func @transform_2(%arg0: i32) -> (i32, i32) {
    %c0_i32 = arith.constant 0 : i32
    %c0_i32_0 = arith.constant 0 : i32
    %c0_i32_1 = arith.constant 0 : i32
    return %c0_i32, %c0_i32_0 : i32, i32
  }
  func.func @transform_3(%arg0: i32) -> (i32, i32) {
    %c0_i32 = arith.constant 0 : i32
    %c0_i32_0 = arith.constant 0 : i32
    %c0_i32_1 = arith.constant 0 : i32
    return %c0_i32, %c0_i32_0 : i32, i32
  }
  func.func @transform_4(%arg0: i32) -> (i32, i32) {
    %c0_i32 = arith.constant 0 : i32
    %c0_i32_0 = arith.constant 0 : i32
    %c0_i32_1 = arith.constant 0 : i32
    return %c0_i32, %c0_i32_0 : i32, i32
  }
  func.func @transform_5(%arg0: i32) -> (i32, i32) {
    %c0_i32 = arith.constant 0 : i32
    %c0_i32_0 = arith.constant 0 : i32
    %c0_i32_1 = arith.constant 0 : i32
    return %c0_i32, %c0_i32_0 : i32, i32
  }
  func.func @transform_6(%arg0: i32) -> (i32, i32) {
    %c0_i32 = arith.constant 0 : i32
    %c0_i32_0 = arith.constant 0 : i32
    %c0_i32_1 = arith.constant 0 : i32
    return %c0_i32, %c0_i32_0 : i32, i32
  }
  func.func @transform_7(%arg0: i32) -> (i32, i32) {
    %c0_i32 = arith.constant 0 : i32
    %c0_i32_0 = arith.constant 0 : i32
    %c0_i32_1 = arith.constant 0 : i32
    return %c0_i32, %c0_i32_0 : i32, i32
  }
  func.func @transform_8(%arg0: i32) -> (i32, i32) {
    %c0_i32 = arith.constant 0 : i32
    %c0_i32_0 = arith.constant 0 : i32
    %c0_i32_1 = arith.constant 0 : i32
    return %c0_i32, %c0_i32_0 : i32, i32
  }
  func.func @transform_9(%arg0: i32) -> (i32, i32) {
    %c0_i32 = arith.constant 0 : i32
    %c0_i32_0 = arith.constant 0 : i32
    %c0_i32_1 = arith.constant 0 : i32
    return %c0_i32, %c0_i32_0 : i32, i32
  }
  func.func @transform_10(%arg0: i32) -> (i32, i32) {
    %c0_i32 = arith.constant 0 : i32
    %c0_i32_0 = arith.constant 0 : i32
    %c0_i32_1 = arith.constant 0 : i32
    return %c0_i32, %c0_i32_0 : i32, i32
  }
  func.func @transform_11(%arg0: i32) -> (i32, i32) {
    %c0_i32 = arith.constant 0 : i32
    %c0_i32_0 = arith.constant 0 : i32
    %c0_i32_1 = arith.constant 0 : i32
    return %c0_i32, %c0_i32_0 : i32, i32
  }
  func.func @transform_12(%arg0: i32) -> (i32, i32) {
    %c0_i32 = arith.constant 0 : i32
    %c0_i32_0 = arith.constant 0 : i32
    %c0_i32_1 = arith.constant 0 : i32
    return %c0_i32, %c0_i32_0 : i32, i32
  }
  func.func @transform_13(%arg0: i32) -> (i32, i32) {
    %c0_i32 = arith.constant 0 : i32
    %c0_i32_0 = arith.constant 0 : i32
    %c0_i32_1 = arith.constant 0 : i32
    return %c0_i32, %c0_i32_0 : i32, i32
  }
  func.func @transform_14(%arg0: i32) -> (i32, i32) {
    %c0_i32 = arith.constant 0 : i32
    %c0_i32_0 = arith.constant 0 : i32
    %c0_i32_1 = arith.constant 0 : i32
    return %c0_i32, %c0_i32_0 : i32, i32
  }
  func.func @transform_15(%arg0: i32) -> (i32, i32) {
    %c0_i32 = arith.constant 0 : i32
    %c0_i32_0 = arith.constant 0 : i32
    %c0_i32_1 = arith.constant 0 : i32
    return %c0_i32, %c0_i32_0 : i32, i32
  }
  func.func @transform_16(%arg0: i32) -> (i32, i32) {
    %c0_i32 = arith.constant 0 : i32
    %c0_i32_0 = arith.constant 0 : i32
    %c0_i32_1 = arith.constant 0 : i32
    return %c0_i32, %c0_i32_0 : i32, i32
  }
  func.func @transform_17(%arg0: i32) -> (i32, i32) {
    %c0_i32 = arith.constant 0 : i32
    %c0_i32_0 = arith.constant 0 : i32
    %c0_i32_1 = arith.constant 0 : i32
    return %c0_i32, %c0_i32_0 : i32, i32
  }
  func.func @transform_18(%arg0: i32) -> (i32, i32) {
    %c0_i32 = arith.constant 0 : i32
    %c0_i32_0 = arith.constant 0 : i32
    %c0_i32_1 = arith.constant 0 : i32
    return %c0_i32, %c0_i32_0 : i32, i32
  }
  func.func @transform_19(%arg0: i32) -> (i32, i32) {
    %c0_i32 = arith.constant 0 : i32
    %c0_i32_0 = arith.constant 0 : i32
    %c0_i32_1 = arith.constant 0 : i32
    return %c0_i32, %c0_i32_0 : i32, i32
  }
}

</mosaic_0001>

<bundles_post_ra>
// kernel: c3dlstm_forward.1
= control target key start
LH: loop header
LB: loop body
LE: loop exit
PB: predicated region body
PF: predicated region fallthrough
CT: control target
= control target key end

     0   :  { %s7459_s0 = inlined_call_operand.vmem [shape: f32[96,210], index: 0, kind: input, shape index: {}]   ;;  %s7460_s1 = inlined_call_operand.vmem [shape: f32[32,96], index: 1, kind: input, shape index: {}]   ;;  %s7461_s2 = inlined_call_operand.vmem [shape: f32[32,1], index: 2, kind: input, shape index: {}]   ;;  %s7462_s3 = inlined_call_operand.vmem [shape: f32[16,144], index: 3, kind: input, shape index: {}]   ;;  %s7463_s4 = inlined_call_operand.vmem [shape: f32[16,1], index: 4, kind: input, shape index: {}]   ;;  %s7464_s5 = inlined_call_operand.vmem [shape: f32[64,448], index: 5, kind: input, shape index: {}]   ;;  %s7465_s6 = inlined_call_operand.vmem [shape: f32[64,1], index: 6, kind: input, shape index: {}]   ;;  %s7466_s7 = inlined_call_operand.vmem [shape: f32[64,1], index: 7, kind: input, shape index: {}]   ;;  %s7467_s8 = inlined_call_operand.vmem [shape: f32[64,1], index: 8, kind: input, shape index: {}]   ;;  %s7468_s9 = inlined_call_operand.vmem [shape: f32[210,16], index: 9, kind: input, shape index: {}]   ;;  %s7469_s10 = inlined_call_operand.vmem [shape: f32[256,512], index: 10, kind: input, shape index: {}]   ;;  %s7470_s11 = inlined_call_operand.vmem [shape: f32[1,512], index: 11, kind: input, shape index: {}]   ;;  %s7471_s12 = inlined_call_operand.vmem [shape: f32[128,512], index: 12, kind: input, shape index: {}]   ;;  %s7472_s13 = inlined_call_operand.vmem [shape: f32[2,128], index: 13, kind: input, shape index: {}]   ;;  %s7473_s14 = inlined_call_operand.vmem [shape: f32[2,128], index: 14, kind: input, shape index: {}]   ;;  %s7474_s15 = inlined_call_operand.vmem [shape: f32[128,128], index: 15, kind: input, shape index: {}]   ;;  %s7475_s16 = inlined_call_operand.vmem [shape: f32[1,128], index: 16, kind: input, shape index: {}]   ;;  %s7476_s17 = inlined_call_operand.hbm [shape: f32[4,128], index: 17, kind: output, shape index: {0}]   ;;  %s7477_s18 = inlined_call_operand.vmem [shape: f32[2,128], index: 18, kind: output, shape index: {1}]   ;;  %s7478_s19 = inlined_call_operand.vmem [shape: f32[2,128], index: 19, kind: output, shape index: {2}]  }
   0x1   :  { %7505 = sst [smem:[#allocation25_spill]] %s7459_s0 }
   0x2   :  { %7506 = sst [smem:[#allocation26_spill]] %s7460_s1 }
   0x3   :  { %7507 = sst [smem:[#allocation27_spill]] %s7461_s2 }
   0x4   :  { %7508 = sst [smem:[#allocation28_spill]] %s7462_s3 }
   0x5   :  { %s7509_s20 = sld [smem:[#allocation25_spill]]  ;;  %v7487_v7 = vmov 0.0   ;;  %v5175_v8 = vmov 0   ;;  %s7510_s25 = sld [smem:[#allocation27_spill]] }
   0x6   :  { %189 = vmatprep.mubr.f32.mxu1 %v7487_v7  ;;  %4707 = vset.pattern.permute.xlu0 %v5175_v8 }
   0x7   :  { %4708 = vset.pattern.permute.xlu1 %v5175_v8  ;;  %811 = vmatprep.mubr.f32.mxu0 %v7487_v7 }
   0xb   :  { %v65_v0 = vld [vmem:[%s7509_s20 + $0x8] sm:$0xff]  ;;  %v67_v1 = vld [vmem:[%s7509_s20 + $0x18] sm:$0xff]  ;;  %v64_v2 = vld [vmem:[%s7509_s20] sm:$0xff] }
   0xc   :  { %v4074_v3 = vpack.c.bf16 %v67_v1, %v65_v0  ;;  %v66_v4 = vld [vmem:[%s7509_s20 + $0x10] sm:$0xff]  ;;  %v69_v5 = vld [vmem:[%s7509_s20 + $0x28] sm:$0xff]  ;;  %v71_v6 = vld [vmem:[%s7509_s20 + $0x38] sm:$0xff] }
   0xd   :  { %v4076_v9 = vpack.c.bf16 %v66_v4, %v64_v2  ;;  %v4078_v10 = vpack.c.bf16 %v71_v6, %v69_v5  ;;  %v68_v11 = vld [vmem:[%s7509_s20 + $0x20] sm:$0xff]  ;;  %v70_v12 = vld [vmem:[%s7509_s20 + $0x30] sm:$0xff]  ;;  %v73_v13 = vld [vmem:[%s7509_s20 + $0x48] sm:$0xff] }
   0xe   :  { %4075 = vmatprep.subr.bf16.mxu1 %v4074_v3  ;;  %v75_v14 = vld [vmem:[%s7509_s20 + $0x58] sm:$0xff]  ;;  %v4080_v15 = vpack.c.bf16 %v70_v12, %v68_v11  ;;  %v72_v17 = vld [vmem:[%s7509_s20 + $0x40] sm:$0xff]  ;;  %v74_v18 = vld [vmem:[%s7509_s20 + $0x50] sm:$0xff] }
   0xf   :  { %4077 = vmatpush1.bf16.msra.mxu1 %v4076_v9  ;;  %v4082_v16 = vpack.c.bf16 %v75_v14, %v73_v13  ;;  %v77_v19 = vld [vmem:[%s7509_s20 + $0x68] sm:$0xff]  ;;  %v79_v20 = vld [vmem:[%s7509_s20 + $0x78] sm:$0xff]  ;;  %v4084_v21 = vpack.c.bf16 %v74_v18, %v72_v17  ;;  %v76_v22 = vld [vmem:[%s7509_s20 + $0x60] sm:$0xff] }
  0x10   :  { %4079 = vmatprep.subr.bf16.mxu1 %v4078_v10  ;;  %v4086_v23 = vpack.c.bf16 %v79_v20, %v77_v19  ;;  %v78_v24 = vld [vmem:[%s7509_s20 + $0x70] sm:$0xff]  ;;  %v81_v25 = vld [vmem:[%s7509_s20 + $0x88] sm:$0xff]  ;;  %v88_v26 = vld [vmem:[%s7510_s25] sm:$0xff] }
  0x11   :  { %v83_v27 = vld [vmem:[%s7509_s20 + $0x98] sm:$0xff]  ;;  %94 = vperm.xlu0 %4707, %v88_v26   ;;  %v90_v28 = vld [vmem:[%s7510_s25 + $0x10] sm:$0xff] }
  0x13   :  { %4081 = vmatpush1.bf16.msra.mxu1 %v4080_v15 }
  0x14   :  { %4083 = vmatprep.subr.bf16.mxu1 %v4082_v16 }
  0x15   :  { %25 = vsyncpa [#allocation3], 0  ;;  %v89_v29 = vld [vmem:[%s7510_s25 + $0x8] sm:$0xff]  ;;  %104 = vperm.xlu1 %4708, %v90_v28   ;;  %v4088_v30 = vpack.c.bf16 %v78_v24, %v76_v22  ;;  %v91_v31 = vld [vmem:[%s7510_s25 + $0x18] sm:$0xff]  ;;  %v4090_v32 = vpack.c.bf16 %v83_v27, %v81_v25  ;;  %s7511_s1 = sld [smem:[#allocation26_spill]]  ;;  %vm112_vm0 = vcmask 785408  }
  0x16   :  { %v80_v33 = vld [vmem:[%s7509_s20 + $0x80] sm:$0xff]  ;;  %v82_v34 = vld [vmem:[%s7509_s20 + $0x90] sm:$0xff]  ;;  %v85_v35 = vld [vmem:[%s7509_s20 + $0xa8] sm:$0xff]  ;;  %99 = vperm.xlu0 %4707, %v89_v29   ;;  %vm228_vm1 = vcmask 670720   ;;  %s5176_s26 = smov 126   ;;  %s5177_s27 = smov 127  }
  0x17   :  { %4085 = vmatpush1.bf16.msra.mxu1 %v4084_v21  ;;  %v87_v36 = vld [vmem:[%s7509_s20 + $0xb8] sm:$0xff]  ;;  %v4092_v37 = vpack.c.bf16 %v82_v34, %v80_v33  ;;  %v84_v39 = vld [vmem:[%s7509_s20 + $0xa0] sm:$0xff]  ;;  %v86_v40 = vld [vmem:[%s7509_s20 + $0xb0] sm:$0xff]  ;;  %s5178_s25 = smov 124   ;;  %s5179_s28 = smov 125   ;;  %vm382_vm2 = vcmask 130048  }
  0x18   :  { %4087 = vmatprep.subr.bf16.mxu1 %v4086_v23  ;;  %v4094_v38 = vpack.c.bf16 %v87_v36, %v85_v35  ;;  %v4096_v41 = vpack.c.bf16 %v86_v40, %v84_v39  ;;  %s7483_s29 = smov 113   ;;  %s5181_s0 = smov 123   ;;  %v370_v19 = vld [vmem:[%s7463_s4] sm:$0xff]  ;;  %vm236_vm3 = vcmask 1039360   ;;  %vm5192_vm4 = vmmov 1   ;;  %v371_v40 = vld [vmem:[%s7463_s4 + $0x8] sm:$0xff] }
  0x19   :  { %109 = vperm.xlu1 %4708, %v91_v31   ;;  %s5182_s30 = smov 111   ;;  %s5183_s21 = smov 112   ;;  %vm4099_vm5 = vmpackc.low %vm5192_vm4, %vm228_vm1  ;;  %vm244_vm6 = vcmask 1031168   ;;  %vm252_vm7 = vcmask 1022976   ;;  %vm260_vm8 = vcmask 1014784   ;;  %vm268_vm9 = vcmask 1006592  }
  0x1a   :  { %s5185_s22 = smov 110   ;;  %s7485_s2 = smov 98   ;;  %vm276_vm10 = vcmask 924672   ;;  %vm284_vm11 = vcmask 916480   ;;  %vm292_vm12 = vcmask 908288   ;;  %vm300_vm13 = vcmask 900096  }
  0x1b   :  { %4089 = vmatpush1.bf16.msra.mxu1 %v4088_v30  ;;  %v60_v42 = vld [vmem:[%s7511_s1] sm:$0xff]  ;;  %v61_v43 = vld [vmem:[%s7511_s1 + $0x8] sm:$0xff]  ;;  %v62_v44 = vld [vmem:[%s7511_s1 + $0x10] sm:$0xff]  ;;  %s5187_s20 = smov 108   ;;  %s5188_s23 = smov 96   ;;  %vm308_vm14 = vcmask 891904  }
  0x1c   :  { %4091 = vmatprep.subr.bf16.mxu1 %v4090_v32  ;;  %v63_v45 = vld [vmem:[%s7511_s1 + $0x18] sm:$0xff]  ;;  %s5184_s1 = smov 109   ;;  %s5189_s24 = smov 97   ;;  %vm316_vm15 = vcmask 883712   ;;  %vm324_vm4 = vcmask 801792  }
  0x1d   :  { %s5190_s3 = smov 94  }
  0x1f   :  { %4093 = vmatpush1.bf16.msra.mxu1 %v4092_v37 }
  0x20   :  { %4095 = vmatprep.subr.bf16.mxu1 %v4094_v38 }
  0x23   :  { %4097 = vmatpush1.bf16.msra.mxu1 %v4096_v41 }
  0x26   :  { %3411 = vmatmul.mubr.msk.f32.vlgmr.msra.gmra.mrb[0].mxu1 %vm112_vm0, %v60_v42 }
  0x27   :  { %195 = vmatprep.mubr.f32.mxu1 %v7487_v7 }
  0x2a   :  { %3412 = vmatmul.mubr.msk.f32.gmra.mrb[2].mxu1 %vm112_vm0, %v61_v43 }
  0x2b   :  { %201 = vmatprep.mubr.f32.mxu1 %v7487_v7 }
  0x2e   :  { %3413 = vmatmul.mubr.msk.f32.gmra.mrb[4].mxu1 %vm112_vm0, %v62_v44 }
  0x2f   :  { %207 = vmatprep.mubr.f32.mxu1 %v7487_v7 }
  0x32   :  { %3414 = vmatmul.mubr.msk.f32.gmra.mrb[6].mxu1 %vm112_vm0, %v63_v45 }
  0x90   :  { %v95_v46 = vpop.permute.xlu0 %94 }
  0x94   :  { %v105_v55 = vpop.permute.xlu1 %104 }
  0x95   :  { %v100_v49 = vpop.permute.xlu0 %99 }
  0x98   :  { %v110_v2 = vpop.permute.xlu1 %109 }
  0xf9   :  { %v191_v47 = vpop.f32.mrb[0].mxu1 }
  0xfa   :  { %v193_v48 = vpop.f32.mrb[1].mxu1  ;;  %v192_v50 = vadd.f32 %v191_v47, %v95_v46 }
  0xfb   :  { %v194_v51 = vadd.f32 %v193_v48, %v95_v46 }
  0xfc   :  { %v214_v57 = vmax.f32 %v192_v50, 0.0 }
  0xfd   :  { %v197_v52 = vpop.f32.mrb[2].mxu1  ;;  %v215_v59 = vmax.f32 %v194_v51, 0.0 }
  0xfe   :  { %v198_v53 = vadd.f32 %v197_v52, %v100_v49  ;;  %v199_v54 = vpop.f32.mrb[3].mxu1 }
  0xff   :  { %v200_v56 = vadd.f32 %v199_v54, %v100_v49 }
 0x100   :  { %v216_v58 = vmax.f32 %v198_v53, 0.0 }
 0x101   :  { %v217_v60 = vmax.f32 %v200_v56, 0.0  ;;  %v203_v61 = vpop.f32.mrb[4].mxu1 }
 0x102   :  { %v222_v62 = vmax.f32 %v214_v57, %v216_v58  ;;  %v205_v63 = vpop.f32.mrb[5].mxu1  ;;  %v204_v1 = vadd.f32 %v203_v61, %v105_v55 }
 0x103   :  { %v223_v0 = vmax.f32 %v215_v59, %v217_v60  ;;  %v206_v3 = vadd.f32 %v205_v63, %v105_v55 }
 0x104   :  { %v218_v9 = vmax.f32 %v204_v1, 0.0 }
 0x105   :  { %v209_v4 = vpop.f32.mrb[6].mxu1  ;;  %v219_v11 = vmax.f32 %v206_v3, 0.0 }
 0x106   :  { %v210_v5 = vadd.f32 %v209_v4, %v110_v2  ;;  %v211_v6 = vpop.f32.mrb[7].mxu1 }
 0x107   :  { %v212_v8 = vadd.f32 %v211_v6, %v110_v2 }
 0x108   :  { %v220_v10 = vmax.f32 %v210_v5, 0.0 }
 0x109   :  { %v221_v12 = vmax.f32 %v212_v8, 0.0 }
 0x10a   :  { %v224_v13 = vmax.f32 %v218_v9, %v220_v10 }
 0x10b   :  { %v225_v14 = vmax.f32 %v219_v11, %v221_v12 }
 0x10c   :  { %v5407_v15 = vmax.f32 %v222_v62, %v224_v13 }
 0x10d   :  { %v227_v16 = vmax.f32 %v223_v0, %v225_v14 }
 0x10f   :  { %v229_v17 = vsel %vm228_vm1, %v227_v16, 0.0 }
 0x110   :  { %v4714_v18 = vpack.i.bf16 %v229_v17, %v5407_v15 }
 0x112   :  { %4715 = vrot.lane.b32.xlu1 %v4714_v18, %s5176_s26  ;;  %4710 = vrot.lane.b32.xlu0 %v4714_v18, %s5177_s27 }
 0x116   :  { %4725 = vrot.lane.b32.xlu1 %v4714_v18, %s5178_s25  ;;  %4720 = vrot.lane.b32.xlu0 %v4714_v18, %s5179_s28 }
 0x11a   :  { %4735 = vrot.lane.b32.xlu1 %v4714_v18, %s7483_s29  ;;  %4730 = vrot.lane.b32.xlu0 %v4714_v18, %s5181_s0 }
 0x11e   :  { %4745 = vrot.lane.b32.xlu1 %v4714_v18, %s5182_s30  ;;  %4740 = vrot.lane.b32.xlu0 %v4714_v18, %s5183_s21  ;;  %s5191_s30 = smov 95  }
 0x122   :  { %4755 = vrot.lane.b32.xlu1 %v4714_v18, %s5184_s1  ;;  %4750 = vrot.lane.b32.xlu0 %v4714_v18, %s5185_s22 }
 0x126   :  { %4765 = vrot.lane.b32.xlu1 %v4714_v18, %s7485_s2  ;;  %4760 = vrot.lane.b32.xlu0 %v4714_v18, %s5187_s20  ;;  %s7512_s2 = sld [smem:[#allocation28_spill]]  ;;  %s5193_s20 = smov 16  }
 0x12a   :  { %4775 = vrot.lane.b32.xlu1 %v4714_v18, %s5188_s23  ;;  %4770 = vrot.lane.b32.xlu0 %v4714_v18, %s5189_s24 }
 0x12c   :  { %v367_v20 = vld [vmem:[%s7512_s2 + $0x8] sm:$0xff] }
 0x12d   :  { %3416 = vmatprep.mubr.msk.f32.mxu1 %vm382_vm2, %v367_v20 }
 0x12e   :  { %4785 = vrot.lane.b32.xlu1 %v4714_v18, %s5190_s3  ;;  %4780 = vrot.lane.b32.xlu0 %v4714_v18, %s5191_s30 }
 0x132   :  { %374 = vperm.xlu1 %4708, %v370_v19  }
 0x184   :  { %v4716_v21 = vpop.permute.xlu1 %4715  ;;  %v4711_v22 = vpop.permute.xlu0 %4710 }
 0x185   :  { %v4713_v23 = vunpack.i.h.bf16 %v4711_v22  ;;  %v4712_v24 = vunpack.i.l.bf16 %v4711_v22  ;;  %v4718_v25 = vunpack.i.h.bf16 %v4716_v21  ;;  %v4717_v26 = vunpack.i.l.bf16 %v4716_v21 }
 0x187   :  { %v4098_v27 = vpack.c.bf16 %v4713_v23, %v227_v16  ;;  %v237_v28 = vsel %vm236_vm3, %v4712_v24, %v4713_v23  ;;  %v245_v37 = vsel %vm244_vm6, %v4717_v26, %v4718_v25 }
 0x188   :  { %v4726_v29 = vpop.permute.xlu1 %4725  ;;  %v4721_v30 = vpop.permute.xlu0 %4720  ;;  %v4789_v31 = vpack.i.bf16 %v4713_v23, %v237_v28  ;;  %v4101_v32 = vpack.c.bf16 %v237_v28, %v5407_v15 }
 0x189   :  { %v4723_v33 = vunpack.i.h.bf16 %v4721_v30  ;;  %v4722_v34 = vunpack.i.l.bf16 %v4721_v30  ;;  %4100 = vmatprep.subr.msk.bf16.mxu1 %vm4099_vm5, %v4098_v27  ;;  %v4728_v35 = vunpack.i.h.bf16 %v4726_v29  ;;  %v4727_v36 = vunpack.i.l.bf16 %v4726_v29 }
 0x18a   :  { %4790 = vrot.lane.b32.xlu0 %v4789_v31, %s5190_s3  ;;  %4102 = vmatpush1.bf16.msra.mxu1 %v4101_v32  ;;  %vm332_vm5 = vcmask 793600   ;;  %s7531_s3 = smov 98  }
 0x18b   :  { %v253_v38 = vsel %vm252_vm7, %v4722_v34, %v4723_v33  ;;  %v4103_v39 = vpack.c.bf16 %v4723_v33, %v4718_v25  ;;  %v261_v46 = vsel %vm260_vm8, %v4727_v36, %v4728_v35 }
 0x18c   :  { %v4736_v41 = vpop.permute.xlu1 %4735  ;;  %v4731_v42 = vpop.permute.xlu0 %4730  ;;  %v4105_v43 = vpack.c.bf16 %v253_v38, %v245_v37 }
 0x18d   :  { %v4733_v44 = vunpack.i.h.bf16 %v4731_v42  ;;  %v4732_v45 = vunpack.i.l.bf16 %v4731_v42  ;;  %4104 = vmatprep.subr.bf16.mxu1 %v4103_v39  ;;  %v4738_v47 = vunpack.i.h.bf16 %v4736_v41  ;;  %v4737_v48 = vunpack.i.l.bf16 %v4736_v41 }
 0x18e   :  { %379 = vperm.xlu0 %4707, %v371_v40   ;;  %4106 = vmatpush1.bf16.msra.mxu1 %v4105_v43 }
 0x18f   :  { %v269_v49 = vsel %vm268_vm9, %v4732_v45, %v4733_v44  ;;  %v4107_v50 = vpack.c.bf16 %v4733_v44, %v4728_v35  ;;  %v277_v58 = vsel %vm276_vm10, %v4737_v48, %v4738_v47  ;;  %v368_v48 = vld [vmem:[%s7512_s2 + $0x10] sm:$0xff] }
 0x190   :  { %v4746_v51 = vpop.permute.xlu1 %4745  ;;  %v4741_v52 = vpop.permute.xlu0 %4740  ;;  %v4109_v53 = vpack.c.bf16 %v269_v49, %v261_v46  ;;  %v366_v46 = vld [vmem:[%s7512_s2] sm:$0xff] }
 0x191   :  { %v4743_v54 = vunpack.i.h.bf16 %v4741_v52  ;;  %v4742_v55 = vunpack.i.l.bf16 %v4741_v52  ;;  %4108 = vmatprep.subr.bf16.mxu1 %v4107_v50  ;;  %v4748_v56 = vunpack.i.h.bf16 %v4746_v51  ;;  %v4747_v57 = vunpack.i.l.bf16 %v4746_v51  ;;  %v5455_v49 = vld [vmem:[%s7464_s5] sm:$0xff] }
 0x192   :  { %4110 = vmatpush1.bf16.msra.mxu1 %v4109_v53  ;;  %7513 = vst [vmem:[#allocation5_spill] sm:$0xff] %v5455_v49  ;;  %593 = vrot.lane.b32.xlu1 %v5455_v49, %s5193_s20 }
 0x193   :  { %v285_v59 = vsel %vm284_vm11, %v4742_v55, %v4743_v54  ;;  %v4111_v60 = vpack.c.bf16 %v4743_v54, %v4738_v47  ;;  %v293_v2 = vsel %vm292_vm12, %v4747_v57, %v4748_v56  ;;  %vm347_vm12 = vcmask 777216   ;;  %v369_v47 = vld [vmem:[%s7512_s2 + $0x18] sm:$0xff]  ;;  %s7514_s2 = smov 113  }
 0x194   :  { %v4756_v61 = vpop.permute.xlu1 %4755  ;;  %v4751_v62 = vpop.permute.xlu0 %4750  ;;  %v4113_v63 = vpack.c.bf16 %v285_v59, %v277_v58 }
 0x195   :  { %v4753_v0 = vunpack.i.h.bf16 %v4751_v62  ;;  %v4752_v1 = vunpack.i.l.bf16 %v4751_v62  ;;  %4112 = vmatprep.subr.bf16.mxu1 %v4111_v60  ;;  %v4758_v3 = vunpack.i.h.bf16 %v4756_v61  ;;  %v4757_v4 = vunpack.i.l.bf16 %v4756_v61 }
 0x196   :  { %4114 = vmatpush1.bf16.msra.mxu1 %v4113_v63 }
 0x197   :  { %v301_v5 = vsel %vm300_vm13, %v4752_v1, %v4753_v0  ;;  %v4115_v6 = vpack.c.bf16 %v4753_v0, %v4748_v56  ;;  %v309_v15 = vsel %vm308_vm14, %v4757_v4, %v4758_v3  ;;  %vm359_vm13 = vcmask 769024  }
 0x198   :  { %v4766_v8 = vpop.permute.xlu1 %4765  ;;  %v4761_v9 = vpop.permute.xlu0 %4760  ;;  %v4117_v10 = vpack.c.bf16 %v301_v5, %v293_v2  ;;  %vm3372_vm14 = vcmask 1043456  }
 0x199   :  { %v4763_v11 = vunpack.i.h.bf16 %v4761_v9  ;;  %v4762_v12 = vunpack.i.l.bf16 %v4761_v9  ;;  %4116 = vmatprep.subr.bf16.mxu1 %v4115_v6  ;;  %v4768_v13 = vunpack.i.h.bf16 %v4766_v8  ;;  %v4767_v14 = vunpack.i.l.bf16 %v4766_v8  ;;  %v5498_v6 = vld [vmem:[%s7464_s5 + $0x8] sm:$0xff]  ;;  %v5503_v8 = vld [vmem:[%s7464_s5 + $0x20] sm:$0xff] }
 0x19a   :  { %4118 = vmatpush1.bf16.msra.mxu1 %v4117_v10  ;;  %7515 = vst [vmem:[#allocation6_spill] sm:$0xff] %v5503_v8  ;;  %v5512_v9 = vld [vmem:[%s7464_s5 + $0x28] sm:$0xff]  ;;  %v5517_v10 = vld [vmem:[%s7464_s5 + $0x40] sm:$0xff] }
 0x19b   :  { %v317_v16 = vsel %vm316_vm15, %v4762_v12, %v4763_v11  ;;  %v4119_v17 = vpack.c.bf16 %v4763_v11, %v4758_v3  ;;  %v325_v23 = vsel %vm324_vm4, %v4767_v14, %v4768_v13  ;;  %7516 = vst [vmem:[#allocation7_spill] sm:$0xff] %v5517_v10  ;;  %v5526_v11 = vld [vmem:[%s7464_s5 + $0x48] sm:$0xff]  ;;  %v5531_v12 = vld [vmem:[%s7464_s5 + $0x60] sm:$0xff] }
 0x19c   :  { %v4776_v18 = vpop.permute.xlu1 %4775  ;;  %v4771_v19 = vpop.permute.xlu0 %4770  ;;  %v4121_v20 = vpack.c.bf16 %v317_v16, %v309_v15  ;;  %7517 = vst [vmem:[#allocation8_spill] sm:$0xff] %v5531_v12  ;;  %v5545_v14 = vld [vmem:[%s7464_s5 + $0x80] sm:$0xff]  ;;  %v5554_v15 = vld [vmem:[%s7464_s5 + $0x88] sm:$0xff] }
 0x19d   :  { %v4773_v21 = vunpack.i.h.bf16 %v4771_v19  ;;  %v4772_v22 = vunpack.i.l.bf16 %v4771_v19  ;;  %4120 = vmatprep.subr.bf16.mxu1 %v4119_v17  ;;  %v4778_v24 = vunpack.i.h.bf16 %v4776_v18  ;;  %v4777_v25 = vunpack.i.l.bf16 %v4776_v18  ;;  %7518 = vst [vmem:[#allocation9_spill] sm:$0xff] %v5545_v14  ;;  %v5563_v16 = vld [vmem:[%s7464_s5 + $0xa0] sm:$0xff]  ;;  %v5568_v17 = vld [vmem:[%s7464_s5 + $0xa8] sm:$0xff] }
 0x19e   :  { %4122 = vmatpush1.bf16.msra.mxu1 %v4121_v20  ;;  %7519 = vst [vmem:[#allocation10_spill] sm:$0xff] %v5563_v16  ;;  %v5577_v18 = vld [vmem:[%s7464_s5 + $0xc0] sm:$0xff] }
 0x19f   :  { %v333_v26 = vsel %vm332_vm5, %v4772_v22, %v4773_v21  ;;  %v4123_v27 = vpack.c.bf16 %v4773_v21, %v4768_v13  ;;  %v340_v32 = vsel %vm112_vm0, %v4777_v25, %v4778_v24  ;;  %v5540_v13 = vld [vmem:[%s7464_s5 + $0x68] sm:$0xff]  ;;  %7520 = vst [vmem:[#allocation11_spill] sm:$0xff] %v5577_v18 }
 0x1a0   :  { %v4781_v28 = vpop.permute.xlu0 %4780  ;;  %v4125_v29 = vpack.c.bf16 %v333_v26, %v325_v23  ;;  %v4786_v36 = vpop.permute.xlu1 %4785 }
 0x1a1   :  { %v4783_v30 = vunpack.i.h.bf16 %v4781_v28  ;;  %v4782_v31 = vunpack.i.l.bf16 %v4781_v28  ;;  %4124 = vmatprep.subr.bf16.mxu1 %v4123_v27  ;;  %v4788_v37 = vunpack.i.h.bf16 %v4786_v36  ;;  %v4787_v38 = vunpack.i.l.bf16 %v4786_v36 }
 0x1a2   :  { %4126 = vmatpush1.bf16.msra.mxu1 %v4125_v29 }
 0x1a3   :  { %v348_v33 = vsel %vm347_vm12, %v4782_v31, %v4783_v30  ;;  %v4127_v34 = vpack.c.bf16 %v4783_v30, %v4778_v24  ;;  %v360_v42 = vsel %vm359_vm13, %v4787_v38, %v4788_v37 }
 0x1a4   :  { %v4129_v35 = vpack.c.bf16 %v348_v33, %v340_v32 }
 0x1a5   :  { %4128 = vmatprep.subr.bf16.mxu1 %v4127_v34 }
 0x1a6   :  { %4130 = vmatpush1.bf16.msra.mxu1 %v4129_v35 }
 0x1b1   :  { %v375_v50 = vpop.permute.xlu1 %374 }
 0x1fc   :  { %v4791_v39 = vpop.permute.xlu0 %4790 }
 0x1fd   :  { %v4793_v40 = vunpack.i.h.bf16 %v4791_v39  ;;  %v4792_v41 = vunpack.i.l.bf16 %v4791_v39 }
 0x1ff   :  { %v361_v43 = vsel %vm359_vm13, %v4792_v41, %v4793_v40  ;;  %v4131_v44 = vpack.c.bf16 %v4793_v40, %v4788_v37 }
 0x200   :  { %v4133_v45 = vpack.c.bf16 %v361_v43, %v360_v42  ;;  %v5770_v42 = vld [vmem:[%s7464_s5 + $0xe0] sm:$0xff] }
 0x201   :  { %4132 = vmatprep.subr.bf16.mxu1 %v4131_v44  ;;  %7526 = vst [vmem:[#allocation17_spill] sm:$0xff] %v5770_v42 }
 0x202   :  { %4134 = vmatpush1.bf16.msra.mxu1 %v4133_v45 }
 0x204   :  { %v5585_v19 = vpop.permute.xlu1 %593 }
 0x205   :  { %454 = vmatmul.mubr.f32.vlgmr.msra.gmra.mrb[8].mxu1 %v366_v46 }
 0x206   :  { %3417 = vmatprep.mubr.msk.f32.mxu1 %vm382_vm2, %v369_v47 }
 0x209   :  { %460 = vmatmul.mubr.f32.gmra.mrb[10].mxu1 %v368_v48 }
 0x20d   :  { %v380_v55 = vpop.permute.xlu0 %379 }
 0x2d8   :  { %v455_v51 = vpop.f32.mrb[8].mxu1 }
 0x2d9   :  { %v456_v52 = vadd.f32 %v455_v51, %v375_v50  ;;  %v457_v53 = vpop.f32.mrb[9].mxu1 }
 0x2da   :  { %v458_v54 = vadd.f32 %v457_v53, %v375_v50 }
 0x2db   :  { %v466_v58 = vmax.f32 %v456_v52, 0.0 }
 0x2dc   :  { %v467_v56 = vmax.f32 %v458_v54, 0.0  ;;  %v461_v57 = vpop.f32.mrb[10].mxu1 }
 0x2dd   :  { %v462_v59 = vadd.f32 %v461_v57, %v380_v55  ;;  %v463_v60 = vpop.f32.mrb[11].mxu1 }
 0x2de   :  { %v470_v61 = vsel %vm228_vm1, %v467_v56, 0.0  ;;  %v464_v62 = vadd.f32 %v463_v60, %v380_v55 }
 0x2df   :  { %v468_v63 = vmax.f32 %v462_v59, 0.0  ;;  %v5460_v0 = vpack.i.bf16 %v470_v61, %v466_v58 }
 0x2e0   :  { %v469_v1 = vmax.f32 %v464_v62, 0.0 }
 0x2e1   :  { %4795 = vrot.lane.b32.xlu1 %v5460_v0, %s5177_s27  ;;  %v5464_v2 = vpack.c.bf16 %v468_v63, %v466_v58 }
 0x2e2   :  { %v471_v3 = vsel %vm228_vm1, %v469_v1, 0.0  ;;  %v5467_v4 = vpack.c.bf16 %v469_v1, %v467_v56 }
 0x2e3   :  { %v5469_v5 = vpack.i.bf16 %v471_v3, %v468_v63 }
 0x2e5   :  { %4830 = vrot.lane.b32.xlu0 %v5469_v5, %s5177_s27  ;;  %4800 = vrot.lane.b32.xlu1 %v5460_v0, %s5176_s26  ;;  %s5194_s27 = smov 122  }
 0x2e9   :  { %4835 = vrot.lane.b32.xlu0 %v5469_v5, %s5176_s26  ;;  %4805 = vrot.lane.b32.xlu1 %v5460_v0, %s5179_s28 }
 0x2ed   :  { %4840 = vrot.lane.b32.xlu0 %v5469_v5, %s5179_s28  ;;  %4810 = vrot.lane.b32.xlu1 %v5460_v0, %s5178_s25 }
 0x2f1   :  { %4845 = vrot.lane.b32.xlu0 %v5469_v5, %s5178_s25  ;;  %4815 = vrot.lane.b32.xlu1 %v5460_v0, %s5181_s0 }
 0x2f5   :  { %4850 = vrot.lane.b32.xlu0 %v5469_v5, %s5181_s0  ;;  %4820 = vrot.lane.b32.xlu1 %v5460_v0, %s5194_s27 }
 0x2f9   :  { %4855 = vrot.lane.b32.xlu0 %v5469_v5, %s5194_s27  ;;  %4825 = vrot.lane.b32.xlu1 %v5460_v0, %s7514_s2 }
 0x2fd   :  { %595 = vrot.lane.b32.xlu0 %v5498_v6, %s5193_s20  ;;  %597 = vrot.lane.b32.xlu1 %v5503_v8, %s5193_s20 }
 0x301   :  { %599 = vrot.lane.b32.xlu0 %v5512_v9, %s5193_s20  ;;  %601 = vrot.lane.b32.xlu1 %v5517_v10, %s5193_s20 }
 0x305   :  { %603 = vrot.lane.b32.xlu0 %v5526_v11, %s5193_s20  ;;  %605 = vrot.lane.b32.xlu1 %v5531_v12, %s5193_s20  ;;  %v5791_v12 = vld [vmem:[%s7464_s5 + $0x10] sm:$0xff] }
 0x306   :  { %7532 = vst [vmem:[#allocation21_spill] sm:$0xff] %v5791_v12 }
 0x309   :  { %607 = vrot.lane.b32.xlu0 %v5540_v13, %s5193_s20  ;;  %609 = vrot.lane.b32.xlu1 %v5545_v14, %s5193_s20 }
 0x30d   :  { %611 = vrot.lane.b32.xlu0 %v5554_v15, %s5193_s20  ;;  %1306 = vrot.lane.b32.xlu1 %v7487_v7, %s5176_s26 }
 0x311   :  { %613 = vrot.lane.b32.xlu0 %v5563_v16, %s5193_s20  ;;  %615 = vrot.lane.b32.xlu1 %v5568_v17, %s5193_s20 }
 0x315   :  { %1310 = vrot.lane.b32.xlu0 %v7487_v7, %s5179_s28  ;;  %617 = vrot.lane.b32.xlu1 %v5577_v18, %s5193_s20  ;;  %v7528_v18 = vmov 0.0  }
 0x319   :  { %4860 = vrot.lane.b32.xlu0 %v5469_v5, %s7514_s2 }
 0x353   :  { %v4796_v20 = vpop.permute.xlu1 %4795 }
 0x354   :  { %v5587_v21 = vunpack.i.h.bf16 %v4796_v20  ;;  %v4797_v22 = vunpack.i.l.bf16 %v4796_v20 }
 0x356   :  { %v5591_v23 = vsel %vm236_vm3, %v4797_v22, %v5587_v21 }
 0x357   :  { %v4831_v24 = vpop.permute.xlu0 %4830  ;;  %v4801_v25 = vpop.permute.xlu1 %4800  ;;  %v5595_v26 = vpack.i.bf16 %v5587_v21, %v5591_v23 }
 0x358   :  { %v5597_v27 = vunpack.i.h.bf16 %v4831_v24  ;;  %v4832_v28 = vunpack.i.l.bf16 %v4831_v24  ;;  %v5599_v29 = vunpack.i.h.bf16 %v4801_v25  ;;  %v4802_v30 = vunpack.i.l.bf16 %v4801_v25 }
 0x359   :  { %4865 = vrot.lane.b32.xlu1 %v5595_v26, %s7514_s2 }
 0x35a   :  { %v5605_v31 = vsel %vm236_vm3, %v4832_v28, %v5597_v27  ;;  %v5609_v32 = vsel %vm244_vm6, %v4802_v30, %v5599_v29  ;;  %vm554_vm3 = vcmask 998400  }
 0x35b   :  { %v4836_v34 = vpop.permute.xlu0 %4835  ;;  %v4806_v35 = vpop.permute.xlu1 %4805  ;;  %v5615_v36 = vpack.i.bf16 %v5597_v27, %v5605_v31  ;;  %v5619_v37 = vpack.i.bf16 %v5599_v29, %v5609_v32 }
 0x35c   :  { %v5621_v38 = vunpack.i.h.bf16 %v4836_v34  ;;  %v4837_v39 = vunpack.i.l.bf16 %v4836_v34  ;;  %v5623_v40 = vunpack.i.h.bf16 %v4806_v35  ;;  %v4807_v41 = vunpack.i.l.bf16 %v4806_v35 }
 0x35d   :  { %4895 = vrot.lane.b32.xlu0 %v5615_v36, %s7514_s2  ;;  %4870 = vrot.lane.b32.xlu1 %v5619_v37, %s7514_s2 }
 0x35e   :  { %v5633_v43 = vsel %vm244_vm6, %v4837_v39, %v5621_v38  ;;  %v5637_v44 = vsel %vm252_vm7, %v4807_v41, %v5623_v40 }
 0x35f   :  { %7521 = vst [vmem:[#allocation12_spill] sm:$0xff] %v5637_v44  ;;  %v4841_v46 = vpop.permute.xlu0 %4840  ;;  %v4811_v47 = vpop.permute.xlu1 %4810  ;;  %v5643_v48 = vpack.i.bf16 %v5621_v38, %v5633_v43  ;;  %v5647_v50 = vpack.i.bf16 %v5623_v40, %v5637_v44 }
 0x360   :  { %v5649_v51 = vunpack.i.h.bf16 %v4841_v46  ;;  %v4842_v52 = vunpack.i.l.bf16 %v4841_v46  ;;  %v5651_v53 = vunpack.i.h.bf16 %v4811_v47  ;;  %v4812_v54 = vunpack.i.l.bf16 %v4811_v47 }
 0x361   :  { %4900 = vrot.lane.b32.xlu0 %v5643_v48, %s7514_s2  ;;  %4875 = vrot.lane.b32.xlu1 %v5647_v50, %s7514_s2 }
 0x362   :  { %7522 = vst [vmem:[#allocation13_spill] sm:$0xff] %v5649_v51  ;;  %v5661_v56 = vsel %vm252_vm7, %v4842_v52, %v5649_v51  ;;  %v5665_v57 = vsel %vm260_vm8, %v4812_v54, %v5651_v53 }
 0x363   :  { %v4846_v59 = vpop.permute.xlu0 %4845  ;;  %v4816_v60 = vpop.permute.xlu1 %4815  ;;  %v5671_v61 = vpack.i.bf16 %v5649_v51, %v5661_v56  ;;  %v5675_v62 = vpack.i.bf16 %v5651_v53, %v5665_v57 }
 0x364   :  { %v5677_v63 = vunpack.i.h.bf16 %v4846_v59  ;;  %v4847_v1 = vunpack.i.l.bf16 %v4846_v59  ;;  %v5679_v3 = vunpack.i.h.bf16 %v4816_v60  ;;  %v4817_v20 = vunpack.i.l.bf16 %v4816_v60 }
 0x365   :  { %4905 = vrot.lane.b32.xlu0 %v5671_v61, %s7514_s2  ;;  %4880 = vrot.lane.b32.xlu1 %v5675_v62, %s7514_s2 }
 0x366   :  { %v5689_v24 = vsel %vm260_vm8, %v4847_v1, %v5677_v63  ;;  %v5693_v25 = vsel %vm268_vm9, %v4817_v20, %v5679_v3 }
 0x367   :  { %v4851_v28 = vpop.permute.xlu0 %4850  ;;  %v4821_v30 = vpop.permute.xlu1 %4820  ;;  %v5697_v34 = vpack.i.bf16 %v5677_v63, %v5689_v24  ;;  %v5701_v35 = vpack.i.bf16 %v5679_v3, %v5693_v25 }
 0x368   :  { %v5703_v39 = vunpack.i.h.bf16 %v4851_v28  ;;  %v4852_v41 = vunpack.i.l.bf16 %v4851_v28  ;;  %v5705_v46 = vunpack.i.h.bf16 %v4821_v30  ;;  %v4822_v47 = vunpack.i.l.bf16 %v4821_v30 }
 0x369   :  { %4910 = vrot.lane.b32.xlu0 %v5697_v34, %s7514_s2  ;;  %4885 = vrot.lane.b32.xlu1 %v5701_v35, %s7514_s2 }
 0x36a   :  { %v5713_v52 = vsel %vm268_vm9, %v4852_v41, %v5703_v39  ;;  %v5717_v54 = vsel %vm554_vm3, %v4822_v47, %v5705_v46 }
 0x36b   :  { %7523 = vst [vmem:[#allocation14_spill] sm:$0xff] %v5717_v54  ;;  %v4856_v59 = vpop.permute.xlu0 %4855  ;;  %v4826_v60 = vpop.permute.xlu1 %4825  ;;  %v5721_v1 = vpack.i.bf16 %v5703_v39, %v5713_v52  ;;  %v5725_v20 = vpack.i.bf16 %v5705_v46, %v5717_v54 }
 0x36c   :  { %v5727_v28 = vunpack.i.h.bf16 %v4856_v59  ;;  %v4857_v30 = vunpack.i.l.bf16 %v4856_v59  ;;  %v5752_v59 = vld [vmem:[%s7464_s5 + $0xc8] sm:$0xff] }
 0x36d   :  { %4915 = vrot.lane.b32.xlu0 %v5721_v1, %s7514_s2  ;;  %4890 = vrot.lane.b32.xlu1 %v5725_v20, %s7514_s2  ;;  %7524 = vst [vmem:[#allocation15_spill] sm:$0xff] %v5752_v59 }
 0x36e   :  { %v5735_v41 = vsel %vm554_vm3, %v4857_v30, %v5727_v28  ;;  %v5757_v30 = vld [vmem:[%s7464_s5 + $0xe8] sm:$0xff] }
 0x36f   :  { %v5737_v47 = vpop.permute.xlu0 %595  ;;  %v5739_v22 = vpop.permute.xlu1 %597  ;;  %v5743_v58 = vpack.i.bf16 %v5727_v28, %v5735_v41  ;;  %7525 = vst [vmem:[#allocation16_spill] sm:$0xff] %v5757_v30 }
 0x371   :  { %4920 = vrot.lane.b32.xlu0 %v5743_v58, %s7514_s2  ;;  %1314 = vrot.lane.b32.xlu1 %v7487_v7, %s5178_s25 }
 0x373   :  { %v5759_v55 = vpop.permute.xlu0 %599  ;;  %v5761_v45 = vpop.permute.xlu1 %601 }
 0x375   :  { %619 = vrot.lane.b32.xlu0 %v5752_v59, %s5193_s20  ;;  %623 = vrot.lane.b32.xlu1 %v5757_v30, %s5193_s20  ;;  %v5829_v59 = vld [vmem:[%s7464_s5 + $0x50] sm:$0xff] }
 0x377   :  { %v5772_v33 = vpop.permute.xlu0 %603  ;;  %v5774_v7 = vpop.permute.xlu1 %605 }
 0x378   :  { %7527 = vst [vmem:[#allocation18_spill] sm:$0xff] %v5774_v7  ;;  %v4828_v7 = vunpack.i.h.bf16 %v4826_v60 }
 0x379   :  { %621 = vrot.lane.b32.xlu0 %v5770_v42, %s5193_s20  ;;  %1322 = vrot.lane.b32.xlu1 %v7528_v18, %s5194_s27  ;;  %s5196_s20 = smov 83  }
 0x37b   :  { %v5780_v16 = vpop.permute.xlu0 %607  ;;  %v5782_v14 = vpop.permute.xlu1 %609 }
 0x37c   :  { %7529 = vst [vmem:[#allocation19_spill] sm:$0xff] %v5780_v16  ;;  %7530 = vst [vmem:[#allocation20_spill] sm:$0xff] %v5782_v14 }
 0x37d   :  { %1318 = vrot.lane.b32.xlu0 %v7528_v18, %s5181_s0  ;;  %4930 = vrot.lane.b32.xlu1 %v5469_v5, %s7531_s3  ;;  %s5195_s0 = smov 32  }
 0x37f   :  { %v5793_v10 = vpop.permute.xlu0 %611  ;;  %v1307_v42 = vpop.permute.xlu1 %1306 }
 0x380   :  { %7533 = vst [vmem:[#allocation22_spill] sm:$0xff] %v5793_v10  ;;  %v1309_v8 = vsel %vm244_vm6, %v5621_v38, %v1307_v42  ;;  %v1308_v49 = vsel %vm244_vm6, %v5599_v29, %v1307_v42  ;;  %vm4164_vm6 = vmpackc.low %vm228_vm1, %vm228_vm1 }
 0x381   :  { %v5039_v30 = vpack.i.bf16 %v1309_v8, %v5633_v43  ;;  %4925 = vrot.lane.b32.xlu0 %v5460_v0, %s7531_s3  ;;  %1023 = vrot.lane.b32.xlu1 %v5791_v12, %s5195_s0  ;;  %v4979_v14 = vpack.i.bf16 %v1308_v49, %v5609_v32  ;;  %v5814_v8 = vld [vmem:[%s7464_s5 + $0x30] sm:$0xff] }
 0x382   :  { %7535 = vst [vmem:[#allocation24_spill] sm:$0xff] %v5814_v8 }
 0x383   :  { %v5805_v54 = vpop.permute.xlu0 %613 }
 0x384   :  { %7534 = vst [vmem:[#allocation23_spill] sm:$0xff] %v5805_v54 }
 0x385   :  { %4935 = vrot.lane.b32.xlu0 %v5595_v26, %s7531_s3  ;;  %4970 = vrot.lane.b32.xlu1 %v5469_v5, %s5196_s20  ;;  %v4827_v5 = vunpack.i.l.bf16 %v4826_v60 }
 0x387   :  { %v1311_v42 = vpop.permute.xlu0 %1310 }
 0x388   :  { %v1313_v12 = vsel %vm252_vm7, %v5649_v51, %v1311_v42  ;;  %v1312_v49 = vsel %vm252_vm7, %v5623_v40, %v1311_v42  ;;  %vm1053_vm7 = vcmask 261120  }
 0x389   :  { %v5044_v54 = vpack.i.bf16 %v1313_v12, %v5661_v56  ;;  %v4984_v10 = vpack.i.bf16 %v1312_v49, %v5637_v44  ;;  %4940 = vrot.lane.b32.xlu0 %v5619_v37, %s7531_s3  ;;  %1027 = vrot.lane.b32.xlu1 %v5814_v8, %s5195_s0  ;;  %v689_v37 = vsel %vm276_vm10, %v4827_v5, %v4828_v7  ;;  %v5840_v44 = vld [vmem:[%s7464_s5 + $0x70] sm:$0xff] }
 0x38b   :  { %v4861_v16 = vpop.permute.xlu0 %4860 }
 0x38c   :  { %v4862_v51 = vunpack.i.l.bf16 %v4861_v16  ;;  %v4863_v42 = vunpack.i.h.bf16 %v4861_v16 }
 0x38d   :  { %4945 = vrot.lane.b32.xlu0 %v5647_v50, %s7531_s3  ;;  %1031 = vrot.lane.b32.xlu1 %v5829_v59, %s5195_s0 }
 0x38e   :  { %v4135_v12 = vpack.c.bf16 %v4863_v42, %v4828_v7  ;;  %v690_v49 = vsel %vm276_vm10, %v4862_v51, %v4863_v42  ;;  %v5849_v7 = vld [vmem:[%s7464_s5 + $0x90] sm:$0xff] }
 0x38f   :  { %v4137_v8 = vpack.c.bf16 %v690_v49, %v689_v37 }
 0x390   :  { %4136 = vmatprep.subr.bf16.mxu0 %v4135_v12 }
 0x391   :  { %4138 = vmatpush1.bf16.msra.mxu0 %v4137_v8  ;;  %4950 = vrot.lane.b32.xlu0 %v5675_v62, %s7531_s3 }
 0x392   :  { %1035 = vrot.lane.b32.xlu1 %v5840_v44, %s5195_s0 }
 0x395   :  { %4955 = vrot.lane.b32.xlu0 %v5701_v35, %s7531_s3 }
 0x396   :  { %1039 = vrot.lane.b32.xlu1 %v5849_v7, %s5195_s0 }
 0x399   :  { %4960 = vrot.lane.b32.xlu0 %v5725_v20, %s7531_s3 }
 0x39a   :  { %4995 = vrot.lane.b32.xlu1 %v5615_v36, %s7531_s3 }
 0x39d   :  { %1021 = vrot.lane.b32.xlu0 %v5498_v6, %s5195_s0  ;;  %v5890_v6 = vld [vmem:[%s7464_s5 + $0xd0] sm:$0xff] }
 0x39e   :  { %5000 = vrot.lane.b32.xlu1 %v5643_v48, %s7531_s3 }
 0x3a1   :  { %4965 = vrot.lane.b32.xlu0 %v5460_v0, %s5196_s20  ;;  %v5882_v0 = vld [vmem:[%s7464_s5 + $0xb0] sm:$0xff] }
 0x3a2   :  { %5005 = vrot.lane.b32.xlu1 %v5671_v61, %s7531_s3 }
 0x3a5   :  { %1025 = vrot.lane.b32.xlu0 %v5512_v9, %s5195_s0  ;;  %v5902_v9 = vpop.permute.xlu1 %615 }
 0x3a6   :  { %5010 = vrot.lane.b32.xlu1 %v5697_v34, %s7531_s3 }
 0x3a9   :  { %4975 = vrot.lane.b32.xlu0 %v5595_v26, %s5196_s20 }
 0x3aa   :  { %5015 = vrot.lane.b32.xlu1 %v5721_v1, %s7531_s3 }
 0x3ad   :  { %1029 = vrot.lane.b32.xlu0 %v5526_v11, %s5195_s0  ;;  %v5905_v11 = vpop.permute.xlu1 %617 }
 0x3ae   :  { %5020 = vrot.lane.b32.xlu1 %v5743_v58, %s7531_s3 }
 0x3b1   :  { %4980 = vrot.lane.b32.xlu0 %v4979_v14, %s5196_s20 }
 0x3b2   :  { %1043 = vrot.lane.b32.xlu1 %v5882_v0, %s5195_s0 }
 0x3b5   :  { %1033 = vrot.lane.b32.xlu0 %v5540_v13, %s5195_s0 }
 0x3b6   :  { %1047 = vrot.lane.b32.xlu1 %v5890_v6, %s5195_s0 }
 0x3b9   :  { %4985 = vrot.lane.b32.xlu0 %v4984_v10, %s5196_s20 }
 0x3ba   :  { %5035 = vrot.lane.b32.xlu1 %v5615_v36, %s5196_s20 }
 0x3bd   :  { %1037 = vrot.lane.b32.xlu0 %v5554_v15, %s5195_s0 }
 0x3be   :  { %5040 = vrot.lane.b32.xlu1 %v5039_v30, %s5196_s20 }
 0x3c2   :  { %5045 = vrot.lane.b32.xlu1 %v5044_v54, %s5196_s20 }
 0x3cb   :  { %v4866_v13 = vpop.permute.xlu1 %4865 }
 0x3cc   :  { %v4868_v14 = vunpack.i.h.bf16 %v4866_v13  ;;  %v4867_v16 = vunpack.i.l.bf16 %v4866_v13 }
 0x3ce   :  { %v691_v36 = vsel %vm276_vm10, %v4867_v16, %v4868_v14 }
 0x3cf   :  { %v4896_v26 = vpop.permute.xlu0 %4895  ;;  %v4871_v48 = vpop.permute.xlu1 %4870 }
 0x3d0   :  { %v4898_v10 = vunpack.i.h.bf16 %v4896_v26  ;;  %v4897_v50 = vunpack.i.l.bf16 %v4896_v26  ;;  %v4873_v51 = vunpack.i.h.bf16 %v4871_v48  ;;  %v4872_v58 = vunpack.i.l.bf16 %v4871_v48 }
 0x3d2   :  { %v4139_v15 = vpack.c.bf16 %v4898_v10, %v4868_v14  ;;  %v692_v61 = vsel %vm276_vm10, %v4897_v50, %v4898_v10  ;;  %v693_v8 = vsel %vm276_vm10, %v4872_v58, %v4873_v51 }
 0x3d3   :  { %v4901_v62 = vpop.permute.xlu0 %4900  ;;  %v4876_v34 = vpop.permute.xlu1 %4875  ;;  %v4141_v35 = vpack.c.bf16 %v692_v61, %v691_v36 }
 0x3d4   :  { %v4903_v54 = vunpack.i.h.bf16 %v4901_v62  ;;  %v4902_v60 = vunpack.i.l.bf16 %v4901_v62  ;;  %4140 = vmatprep.subr.bf16.mxu0 %v4139_v15  ;;  %v4878_v1 = vunpack.i.h.bf16 %v4876_v34  ;;  %v4877_v20 = vunpack.i.l.bf16 %v4876_v34 }
 0x3d5   :  { %4142 = vmatpush1.bf16.msra.mxu0 %v4141_v35 }
 0x3d6   :  { %v4143_v30 = vpack.c.bf16 %v4903_v54, %v4873_v51  ;;  %v694_v5 = vsel %vm276_vm10, %v4902_v60, %v4903_v54  ;;  %v695_v14 = vsel %vm276_vm10, %v4877_v20, %v4878_v1 }
 0x3d7   :  { %v4906_v42 = vpop.permute.xlu0 %4905  ;;  %v4881_v12 = vpop.permute.xlu1 %4880  ;;  %v4145_v37 = vpack.c.bf16 %v694_v5, %v693_v8 }
 0x3d8   :  { %v4908_v49 = vunpack.i.h.bf16 %v4906_v42  ;;  %v4907_v13 = vunpack.i.l.bf16 %v4906_v42  ;;  %4144 = vmatprep.subr.bf16.mxu0 %v4143_v30  ;;  %v4883_v26 = vunpack.i.h.bf16 %v4881_v12  ;;  %v4882_v48 = vunpack.i.l.bf16 %v4881_v12 }
 0x3d9   :  { %4146 = vmatpush1.bf16.msra.mxu0 %v4145_v37 }
 0x3da   :  { %v4147_v16 = vpack.c.bf16 %v4908_v49, %v4878_v1  ;;  %v696_v10 = vsel %vm276_vm10, %v4907_v13, %v4908_v49  ;;  %v697_v35 = vsel %vm276_vm10, %v4882_v48, %v4883_v26 }
 0x3db   :  { %v4911_v50 = vpop.permute.xlu0 %4910  ;;  %v4886_v36 = vpop.permute.xlu1 %4885  ;;  %v4149_v15 = vpack.c.bf16 %v696_v10, %v695_v14 }
 0x3dc   :  { %v4913_v51 = vunpack.i.h.bf16 %v4911_v50  ;;  %v4912_v58 = vunpack.i.l.bf16 %v4911_v50  ;;  %4148 = vmatprep.subr.bf16.mxu0 %v4147_v16  ;;  %v4888_v61 = vunpack.i.h.bf16 %v4886_v36  ;;  %v4887_v62 = vunpack.i.l.bf16 %v4886_v36 }
 0x3dd   :  { %4150 = vmatpush1.bf16.msra.mxu0 %v4149_v15 }
 0x3de   :  { %v4151_v34 = vpack.c.bf16 %v4913_v51, %v4883_v26  ;;  %v698_v54 = vsel %vm276_vm10, %v4912_v58, %v4913_v51  ;;  %v699_v5 = vsel %vm276_vm10, %v4887_v62, %v4888_v61 }
 0x3df   :  { %v4916_v60 = vpop.permute.xlu0 %4915  ;;  %v4891_v1 = vpop.permute.xlu1 %4890  ;;  %v4153_v20 = vpack.c.bf16 %v698_v54, %v697_v35  ;;  %v625_v54 = vsel %vm382_vm2, %v5585_v19, %v5737_v47 }
 0x3e0   :  { %v4918_v30 = vunpack.i.h.bf16 %v4916_v60  ;;  %v4917_v8 = vunpack.i.l.bf16 %v4916_v60  ;;  %4152 = vmatprep.subr.bf16.mxu0 %v4151_v34  ;;  %v4893_v42 = vunpack.i.h.bf16 %v4891_v1  ;;  %v4892_v12 = vunpack.i.l.bf16 %v4891_v1 }
 0x3e1   :  { %4154 = vmatpush1.bf16.msra.mxu0 %v4153_v20  ;;  %v7536_v20 = vpack.c.bf16 %v5597_v27, %v5587_v21  ;;  %v7537_v27 = vpack.c.bf16 %v5605_v31, %v5591_v23 }
 0x3e2   :  { %v4155_v37 = vpack.c.bf16 %v4918_v30, %v4888_v61  ;;  %v700_v49 = vsel %vm276_vm10, %v4917_v8, %v4918_v30  ;;  %v701_v58 = vsel %vm276_vm10, %v4892_v12, %v4893_v42  ;;  %v627_v8 = vsel %vm382_vm2, %v5761_v45, %v5772_v33  ;;  %v7543_v12 = vld [vmem:[#allocation18_spill] sm:$0xff] }
 0x3e3   :  { %v4921_v13 = vpop.permute.xlu0 %4920  ;;  %v1315_v14 = vpop.permute.xlu1 %1314  ;;  %v4157_v16 = vpack.c.bf16 %v700_v49, %v699_v5 }
 0x3e4   :  { %v4923_v26 = vunpack.i.h.bf16 %v4921_v13  ;;  %v4922_v48 = vunpack.i.l.bf16 %v4921_v13  ;;  %v1317_v10 = vsel %vm260_vm8, %v5677_v63, %v1315_v14  ;;  %v1316_v50 = vsel %vm260_vm8, %v5651_v53, %v1315_v14  ;;  %4156 = vmatprep.subr.bf16.mxu0 %v4155_v37  ;;  %v7544_v13 = vld [vmem:[#allocation15_spill] sm:$0xff]  ;;  %v7545_v14 = vld [vmem:[#allocation14_spill] sm:$0xff] }
 0x3e5   :  { %v5049_v36 = vpack.i.bf16 %v1317_v10, %v5689_v24  ;;  %v4989_v15 = vpack.i.bf16 %v1316_v50, %v5665_v57  ;;  %4158 = vmatpush1.bf16.msra.mxu0 %v4157_v16  ;;  %v7548_v10 = vld [vmem:[#allocation22_spill] sm:$0xff]  ;;  %v7549_v50 = vld [vmem:[#allocation20_spill] sm:$0xff]  ;;  %vm1390_vm8 = vcmask 392192  }
 0x3e6   :  { %v4159_v51 = vpack.c.bf16 %v4923_v26, %v4893_v42  ;;  %v702_v61 = vsel %vm276_vm10, %v4922_v48, %v4923_v26  ;;  %v7542_v42 = vld [vmem:[#allocation19_spill] sm:$0xff]  ;;  %v7546_v26 = vld [vmem:[#allocation12_spill] sm:$0xff]  ;;  %vm2140_vm10 = vcmask 1040384  }
 0x3e7   :  { %v5925_v62 = vpop.permute.xlu0 %619  ;;  %5050 = vrot.lane.b32.xlu1 %v5049_v36, %s5196_s20  ;;  %4990 = vrot.lane.b32.xlu0 %v4989_v15, %s5196_s20  ;;  %v5929_v34 = vpop.permute.xlu1 %623  ;;  %v4161_v35 = vpack.c.bf16 %v702_v61, %v701_v58  ;;  %v628_v37 = vsel %vm382_vm2, %v7543_v12, %v7542_v42  ;;  %v7547_v48 = vpack.c.bf16 %v5661_v56, %v7546_v26  ;;  %v7550_v58 = vld [vmem:[#allocation23_spill] sm:$0xff] }
 0x3e8   :  { %4160 = vmatprep.subr.bf16.mxu0 %v4159_v51  ;;  %v629_v36 = vsel %vm382_vm2, %v7549_v50, %v7548_v10  ;;  %v4182_v56 = vpack.c.bf16 %v5689_v24, %v5665_v57  ;;  %v1327_v51 = vld [vmem:[%s7464_s5 + $0x18] sm:$0xff]  ;;  %v630_v61 = vsel %vm382_vm2, %v7550_v58, %v5902_v9  ;;  %v4186_v24 = vpack.c.bf16 %v5713_v52, %v5693_v25 }
 0x3e9   :  { %4162 = vmatpush1.bf16.msra.mxu0 %v4161_v35  ;;  %v7551_v57 = vld [vmem:[#allocation16_spill] sm:$0xff]  ;;  %v4188_v9 = vpack.c.bf16 %v5727_v28, %v5705_v46 }
 0x3ea   :  { %4165 = vmatprep.subr.msk.bf16.mxu0 %vm4164_vm6, %v5467_v4  ;;  %v626_v4 = vsel %vm382_vm2, %v5739_v22, %v5759_v55  ;;  %v7538_v22 = vpack.c.bf16 %v5621_v38, %v5599_v29  ;;  %v7539_v29 = vpack.c.bf16 %v5633_v43, %v5609_v32  ;;  %v7540_v38 = vld [vmem:[#allocation13_spill] sm:$0xff]  ;;  %v4180_v43 = vpack.c.bf16 %v5677_v63, %v5651_v53  ;;  %v1339_v58 = vld [vmem:[%s7464_s5 + $0xd8] sm:$0xff] }
 0x3eb   :  { %v5937_v60 = vpop.permute.xlu0 %621  ;;  %1041 = vrot.lane.b32.xlu0 %v5568_v17, %s5195_s0  ;;  %v1323_v1 = vpop.permute.xlu1 %1322  ;;  %v7541_v45 = vpack.c.bf16 %v7540_v38, %v5623_v40  ;;  %v6004_v40 = vld [vmem:[%s7464_s5 + $0xf0] sm:$0xff]  ;;  %v4184_v63 = vpack.c.bf16 %v5703_v39, %v5679_v3 }
 0x3ec   :  { %3418 = vmatmul.mubr.msk.f32.vlgmr.msra.gmra.mrb[0].mxu0 %vm284_vm11, %v625_v54  ;;  %v1325_v55 = vsel %vm554_vm3, %v5727_v28, %v1323_v1  ;;  %v1324_v33 = vsel %vm554_vm3, %v5705_v46, %v1323_v1  ;;  %v1329_v54 = vld [vmem:[%s7464_s5 + $0x38] sm:$0xff]  ;;  %v7552_v46 = vld [vmem:[#allocation21_spill] sm:$0xff]  ;;  %v4190_v28 = vpack.c.bf16 %v5735_v41, %v7545_v14 }
 0x3ed   :  { %4167 = vmatpush1.bf16.msra.mxu0 %v5464_v2  ;;  %817 = vmatprep.mubr.f32.mxu0 %v7528_v18  ;;  %v5059_v31 = vpack.i.bf16 %v1325_v55, %v5735_v41  ;;  %v5029_v16 = vpack.i.bf16 %v1324_v33, %v7545_v14  ;;  %v632_v41 = vsel %vm382_vm2, %v5937_v60, %v5929_v34  ;;  %v1337_v14 = vld [vmem:[%s7464_s5 + $0xb8] sm:$0xff] }
 0x3ee   :  { %4169 = vmatprep.subr.bf16.mxu0 %v7536_v20 }
 0x3ef   :  { %v1319_v19 = vpop.permute.xlu0 %1318  ;;  %v5950_v47 = vpop.permute.xlu1 %4930 }
 0x3f0   :  { %v1321_v17 = vsel %vm268_vm9, %v5703_v39, %v1319_v19  ;;  %v1320_v30 = vsel %vm268_vm9, %v5679_v3, %v1319_v19  ;;  %3419 = vmatmul.mubr.msk.f32.gmra.mrb[2].mxu0 %vm284_vm11, %v626_v4  ;;  %v4933_v1 = vunpack.i.h.bf16 %v5950_v47  ;;  %vm1742_vm9 = vcmask 1041408  }
 0x3f1   :  { %v5054_v2 = vpack.i.bf16 %v1321_v17, %v5713_v52  ;;  %v5024_v21 = vpack.i.bf16 %v1320_v30, %v5693_v25  ;;  %4171 = vmatpush1.bf16.msra.mxu0 %v7537_v27  ;;  %823 = vmatprep.mubr.f32.mxu0 %v7528_v18  ;;  %v631_v25 = vsel %vm382_vm2, %v5905_v11, %v5925_v62  ;;  %v1331_v11 = vld [vmem:[%s7464_s5 + $0x58] sm:$0xff]  ;;  %v4932_v62 = vunpack.i.l.bf16 %v5950_v47 }
 0x3f2   :  { %4173 = vmatprep.subr.bf16.mxu0 %v7538_v22  ;;  %v7553_v30 = vld [vmem:[#allocation24_spill] sm:$0xff]  ;;  %vm1455_vm2 = vcmask 678912  }
 0x3f3   :  { %v5971_v5 = vpop.permute.xlu0 %4925  ;;  %5055 = vrot.lane.b32.xlu1 %v5054_v2, %s5196_s20  ;;  %5025 = vrot.lane.b32.xlu0 %v5024_v21, %s5196_s20  ;;  %v5975_v23 = vpop.permute.xlu1 %1023  ;;  %v1333_v47 = vld [vmem:[%s7464_s5 + $0x78] sm:$0xff]  ;;  %v1119_v34 = vsel %vm324_vm4, %v4932_v62, %v4933_v1 }
 0x3f4   :  { %3420 = vmatmul.mubr.msk.f32.gmra.mrb[4].mxu0 %vm284_vm11, %v627_v8  ;;  %v4928_v39 = vunpack.i.h.bf16 %v5971_v5  ;;  %v4927_v20 = vunpack.i.l.bf16 %v5971_v5  ;;  %v7554_v5 = vld [vmem:[#allocation5_spill] sm:$0xff] }
 0x3f5   :  { %4175 = vmatpush1.bf16.msra.mxu0 %v7539_v29  ;;  %829 = vmatprep.mubr.f32.mxu0 %v7528_v18 }
 0x3f6   :  { %4177 = vmatprep.subr.bf16.mxu0 %v7541_v45  ;;  %v4192_v4 = vpack.c.bf16 %v4933_v1, %v4928_v39  ;;  %v1118_v2 = vsel %vm324_vm4, %v4927_v20, %v4928_v39 }
 0x3f7   :  { %v5991_v49 = vpop.permute.xlu0 %4935  ;;  %1045 = vrot.lane.b32.xlu0 %v7544_v13, %s5195_s0  ;;  %5060 = vrot.lane.b32.xlu1 %v5059_v31, %s5196_s20  ;;  %v5996_v32 = vpop.permute.xlu1 %4970  ;;  %v4194_v55 = vpack.c.bf16 %v1119_v34, %v1118_v2  ;;  %v1335_v31 = vld [vmem:[%s7464_s5 + $0x98] sm:$0xff]  ;;  %v7558_v34 = vld [vmem:[#allocation9_spill] sm:$0xff] }
 0x3f8   :  { %3421 = vmatmul.mubr.msk.f32.gmra.mrb[6].mxu0 %vm284_vm11, %v628_v37  ;;  %v4938_v60 = vunpack.i.h.bf16 %v5991_v49  ;;  %v4937_v27 = vunpack.i.l.bf16 %v5991_v49 }
 0x3f9   :  { %4179 = vmatpush1.bf16.msra.mxu0 %v7547_v48  ;;  %835 = vmatprep.mubr.f32.mxu0 %v7528_v18 }
 0x3fa   :  { %4181 = vmatprep.subr.bf16.mxu0 %v4180_v43  ;;  %v1120_v38 = vsel %vm324_vm4, %v4937_v27, %v4938_v60  ;;  %v7555_v43 = vld [vmem:[#allocation6_spill] sm:$0xff] }
 0x3fb   :  { %v6014_v15 = vpop.permute.xlu0 %4940  ;;  %1051 = vrot.lane.b32.xlu1 %v6004_v40, %s5195_s0  ;;  %5030 = vrot.lane.b32.xlu0 %v5029_v16, %s5196_s20  ;;  %v6019_v53 = vpop.permute.xlu1 %1027  ;;  %s5197_s20 = smov 48  }
 0x3fc   :  { %3422 = vmatmul.mubr.msk.f32.gmra.mrb[8].mxu0 %vm284_vm11, %v629_v36  ;;  %v4943_v45 = vunpack.i.h.bf16 %v6014_v15  ;;  %v4942_v42 = vunpack.i.l.bf16 %v6014_v15 }
 0x3fd   :  { %4183 = vmatpush1.bf16.msra.mxu0 %v4182_v56  ;;  %841 = vmatprep.mubr.f32.mxu0 %v7528_v18 }
 0x3fe   :  { %4185 = vmatprep.subr.bf16.mxu0 %v4184_v63 }
 0x3ff   :  { %v6033_v35 = vpop.permute.xlu0 %4945  ;;  %1360 = vrot.lane.b32.xlu1 %v1327_v51, %s5197_s20  ;;  %1049 = vrot.lane.b32.xlu0 %v7551_v57, %s5195_s0  ;;  %v6038_v3 = vpop.permute.xlu1 %1031  ;;  %v7556_v51 = vld [vmem:[#allocation7_spill] sm:$0xff] }
 0x400   :  { %3423 = vmatmul.mubr.msk.f32.gmra.mrb[10].mxu0 %vm284_vm11, %v630_v61  ;;  %v4948_v48 = vunpack.i.h.bf16 %v6033_v35  ;;  %v4947_v10 = vunpack.i.l.bf16 %v6033_v35 }
 0x401   :  { %4187 = vmatpush1.bf16.msra.mxu0 %v4186_v24  ;;  %847 = vmatprep.mubr.f32.mxu0 %v7528_v18 }
 0x402   :  { %4189 = vmatprep.subr.bf16.mxu0 %v4188_v9  ;;  %v1124_v57 = vsel %vm324_vm4, %v4947_v10, %v4948_v48 }
 0x403   :  { %v6054_v52 = vpop.permute.xlu0 %4950  ;;  %1364 = vrot.lane.b32.xlu1 %v1329_v54, %s5197_s20  ;;  %1358 = vrot.lane.b32.xlu0 %v7552_v46, %s5197_s20  ;;  %v7557_v46 = vld [vmem:[#allocation8_spill] sm:$0xff] }
 0x404   :  { %v6062_v19 = vpop.permute.xlu1 %1035  ;;  %3424 = vmatmul.mubr.msk.f32.gmra.mrb[12].mxu0 %vm284_vm11, %v631_v25  ;;  %v4953_v24 = vunpack.i.h.bf16 %v6054_v52 }
 0x405   :  { %4191 = vmatpush1.bf16.msra.mxu0 %v4190_v28  ;;  %853 = vmatprep.mubr.f32.mxu0 %v7528_v18  ;;  %v1341_v28 = vld [vmem:[%s7464_s5 + $0xf8] sm:$0xff]  ;;  %s5199_s5 = smov 64  }
 0x406   :  { %4193 = vmatprep.subr.bf16.mxu0 %v4192_v4 }
 0x407   :  { %v6073_v17 = vpop.permute.xlu0 %4955  ;;  %1368 = vrot.lane.b32.xlu1 %v1331_v11, %s5197_s20  ;;  %1362 = vrot.lane.b32.xlu0 %v7553_v30, %s5197_s20 }
 0x408   :  { %v6079_v21 = vpop.permute.xlu1 %1039  ;;  %3425 = vmatmul.mubr.msk.f32.gmra.mrb[14].mxu0 %vm284_vm11, %v632_v41  ;;  %v4958_v4 = vunpack.i.h.bf16 %v6073_v17  ;;  %v4957_v11 = vunpack.i.l.bf16 %v6073_v17  ;;  %v1671_v17 = vld [vmem:[%s7465_s6 + $0x8] sm:$0xff] }
 0x409   :  { %940 = vmatprep.mubr.f32.mxu0 %v7528_v18 }
 0x40b   :  { %v6089_v22 = vpop.permute.xlu0 %4960  ;;  %1372 = vrot.lane.b32.xlu1 %v1333_v47, %s5197_s20  ;;  %1366 = vrot.lane.b32.xlu0 %v5829_v59, %s5197_s20 }
 0x40c   :  { %v4996_v8 = vpop.permute.xlu1 %4995  ;;  %3428 = vmatmul.mubr.msk.f32.vlgmr.msra.gmra.mrb[0].mxu0 %vm284_vm11, %v7554_v5 }
 0x40d   :  { %v4998_v29 = vunpack.i.h.bf16 %v4996_v8  ;;  %v4997_v33 = vunpack.i.l.bf16 %v4996_v8  ;;  %4195 = vmatpush1.bf16.msra.mxu0 %v4194_v55  ;;  %946 = vmatprep.mubr.f32.mxu0 %v7528_v18  ;;  %v1128_v55 = vsel %vm324_vm4, %v4957_v11, %v4958_v4  ;;  %v4963_v8 = vunpack.i.h.bf16 %v6089_v22 }
 0x40f   :  { %v4196_v59 = vpack.c.bf16 %v4998_v29, %v4938_v60  ;;  %v1121_v12 = vsel %vm324_vm4, %v4997_v33, %v4998_v29  ;;  %v6104_v37 = vpop.permute.xlu0 %1021  ;;  %1376 = vrot.lane.b32.xlu1 %v1335_v31, %s5197_s20  ;;  %1370 = vrot.lane.b32.xlu0 %v5840_v44, %s5197_s20  ;;  %v1122_v44 = vsel %vm324_vm4, %v4942_v42, %v4943_v45  ;;  %v1859_v42 = vld [vmem:[%s7466_s7] sm:$0xff] }
 0x410   :  { %v4198_v49 = vpack.c.bf16 %v1121_v12, %v1120_v38  ;;  %v5001_v13 = vpop.permute.xlu1 %5000  ;;  %3429 = vmatmul.mubr.msk.f32.gmra.mrb[2].mxu0 %vm284_vm11, %v7555_v43 }
 0x411   :  { %v5003_v16 = vunpack.i.h.bf16 %v5001_v13  ;;  %v5002_v26 = vunpack.i.l.bf16 %v5001_v13  ;;  %4197 = vmatprep.subr.bf16.mxu0 %v4196_v59  ;;  %952 = vmatprep.mubr.f32.mxu0 %v7528_v18 }
 0x412   :  { %4199 = vmatpush1.bf16.msra.mxu0 %v4198_v49 }
 0x413   :  { %v4200_v50 = vpack.c.bf16 %v5003_v16, %v4943_v45  ;;  %v1123_v36 = vsel %vm324_vm4, %v5002_v26, %v5003_v16  ;;  %v6119_v15 = vpop.permute.xlu0 %4965  ;;  %1380 = vrot.lane.b32.xlu1 %v1337_v14, %s5197_s20  ;;  %1374 = vrot.lane.b32.xlu0 %v5849_v7, %s5197_s20  ;;  %v4952_v7 = vunpack.i.l.bf16 %v6054_v52  ;;  %v7559_v45 = vld [vmem:[#allocation10_spill] sm:$0xff] }
 0x414   :  { %v4202_v56 = vpack.c.bf16 %v1123_v36, %v1122_v44  ;;  %v5006_v63 = vpop.permute.xlu1 %5005  ;;  %3430 = vmatmul.mubr.msk.f32.gmra.mrb[4].mxu0 %vm284_vm11, %v7556_v51  ;;  %v4968_v59 = vunpack.i.h.bf16 %v6119_v15  ;;  %v4967_v16 = vunpack.i.l.bf16 %v6119_v15  ;;  %v7560_v44 = vld [vmem:[#allocation11_spill] sm:$0xff]  ;;  %v4972_v15 = vunpack.i.l.bf16 %v5996_v32 }
 0x415   :  { %v5008_v61 = vunpack.i.h.bf16 %v5006_v63  ;;  %v5007_v35 = vunpack.i.l.bf16 %v5006_v63  ;;  %4201 = vmatprep.subr.bf16.mxu0 %v4200_v50  ;;  %958 = vmatprep.mubr.f32.mxu0 %v7528_v18  ;;  %v1860_v50 = vld [vmem:[%s7466_s7 + $0x8] sm:$0xff] }
 0x416   :  { %4203 = vmatpush1.bf16.msra.mxu0 %v4202_v56  ;;  %v1672_v56 = vld [vmem:[%s7465_s6 + $0x10] sm:$0xff]  ;;  %v1456_v63 = vsel %vm1455_vm2, %v4967_v16, %v4968_v59  ;;  %v1866_v16 = vld [vmem:[%s7466_s7 + $0x38] sm:$0xff] }
 0x417   :  { %v4204_v39 = vpack.c.bf16 %v5008_v61, %v4948_v48  ;;  %v1125_v9 = vsel %vm324_vm4, %v5007_v35, %v5008_v61  ;;  %v6134_v54 = vpop.permute.xlu0 %1025  ;;  %1384 = vrot.lane.b32.xlu1 %v1339_v58, %s5197_s20  ;;  %1378 = vrot.lane.b32.xlu0 %v5882_v0, %s5197_s20  ;;  %v1126_v0 = vsel %vm324_vm4, %v4952_v7, %v4953_v24  ;;  %v7561_v58 = vld [vmem:[#allocation17_spill] sm:$0xff] }
 0x418   :  { %v4206_v1 = vpack.c.bf16 %v1125_v9, %v1124_v57  ;;  %v5011_v25 = vpop.permute.xlu1 %5010  ;;  %3431 = vmatmul.mubr.msk.f32.gmra.mrb[6].mxu0 %vm284_vm11, %v7557_v46  ;;  %v1674_v61 = vld [vmem:[%s7465_s6 + $0x20] sm:$0xff] }
 0x419   :  { %v5013_v52 = vunpack.i.h.bf16 %v5011_v25  ;;  %v5012_v20 = vunpack.i.l.bf16 %v5011_v25  ;;  %4205 = vmatprep.subr.bf16.mxu0 %v4204_v39  ;;  %964 = vmatprep.mubr.f32.mxu0 %v7528_v18  ;;  %v1916_v25 = vld [vmem:[%s7467_s8 + $0x8] sm:$0xff] }
 0x41a   :  { %4207 = vmatpush1.bf16.msra.mxu0 %v4206_v1 }
 0x41b   :  { %v4208_v62 = vpack.c.bf16 %v5013_v52, %v4953_v24  ;;  %v1127_v41 = vsel %vm324_vm4, %v5012_v20, %v5013_v52  ;;  %v6149_v30 = vpop.permute.xlu0 %4975  ;;  %1388 = vrot.lane.b32.xlu1 %v1341_v28, %s5197_s20  ;;  %1382 = vrot.lane.b32.xlu0 %v5890_v6, %s5197_s20  ;;  %v4962_v6 = vunpack.i.l.bf16 %v6089_v22  ;;  %v1670_v22 = vld [vmem:[%s7465_s6] sm:$0xff]  ;;  %v1054_v24 = vsel %vm1053_vm7, %v6104_v37, %v5975_v23 }
 0x41c   :  { %v4210_v2 = vpack.c.bf16 %v1127_v41, %v1126_v0  ;;  %v5016_v47 = vpop.permute.xlu1 %5015  ;;  %3432 = vmatmul.mubr.msk.f32.gmra.mrb[8].mxu0 %vm284_vm11, %v7558_v34  ;;  %v4978_v39 = vunpack.i.h.bf16 %v6149_v30  ;;  %v4977_v9 = vunpack.i.l.bf16 %v6149_v30  ;;  %v1915_v23 = vld [vmem:[%s7467_s8] sm:$0xff]  ;;  %v1055_v20 = vsel %vm1053_vm7, %v6134_v54, %v6019_v53  ;;  %v1861_v53 = vld [vmem:[%s7466_s7 + $0x10] sm:$0xff] }
 0x41d   :  { %v5018_v60 = vunpack.i.h.bf16 %v5016_v47  ;;  %v5017_v27 = vunpack.i.l.bf16 %v5016_v47  ;;  %4209 = vmatprep.subr.bf16.mxu0 %v4208_v62  ;;  %970 = vmatprep.mubr.f32.mxu0 %v7528_v18  ;;  %v1130_v13 = vsel %vm324_vm4, %v4962_v6, %v4963_v8 }
 0x41e   :  { %4211 = vmatpush1.bf16.msra.mxu0 %v4210_v2  ;;  %v1862_v2 = vld [vmem:[%s7466_s7 + $0x18] sm:$0xff] }
 0x41f   :  { %v4212_v5 = vpack.c.bf16 %v5018_v60, %v4958_v4  ;;  %v1129_v31 = vsel %vm324_vm4, %v5017_v27, %v5018_v60  ;;  %v6164_v29 = vpop.permute.xlu0 %1029  ;;  %1685 = vperm.xlu1 %4708, %v1671_v17   ;;  %1386 = vrot.lane.b32.xlu0 %v6004_v40, %s5197_s20  ;;  %v4973_v40 = vunpack.i.h.bf16 %v5996_v32  ;;  %v1673_v32 = vld [vmem:[%s7465_s6 + $0x18] sm:$0xff]  ;;  %v1458_v4 = vsel %vm1455_vm2, %v4977_v9, %v4978_v39 }
 0x420   :  { %v4214_v33 = vpack.c.bf16 %v1129_v31, %v1128_v55  ;;  %v5021_v38 = vpop.permute.xlu1 %5020  ;;  %3433 = vmatmul.mubr.msk.f32.gmra.mrb[10].mxu0 %vm284_vm11, %v7559_v45  ;;  %v1056_v54 = vsel %vm1053_vm7, %v6164_v29, %v6038_v3  ;;  %v1676_v31 = vld [vmem:[%s7465_s6 + $0x30] sm:$0xff]  ;;  %v1675_v29 = vld [vmem:[%s7465_s6 + $0x28] sm:$0xff] }
 0x421   :  { %v5023_v12 = vunpack.i.h.bf16 %v5021_v38  ;;  %v5022_v49 = vunpack.i.l.bf16 %v5021_v38  ;;  %4213 = vmatprep.subr.bf16.mxu0 %v4212_v5  ;;  %976 = vmatprep.mubr.f32.mxu0 %v7528_v18  ;;  %v4220_v36 = vpack.c.bf16 %v4973_v40, %v4968_v59  ;;  %v1457_v35 = vsel %vm1455_vm2, %v4972_v15, %v4973_v40  ;;  %v1645_v15 = vld [vmem:[%s7468_s9 + $0x10] sm:$0xff] }
 0x422   :  { %4215 = vmatpush1.bf16.msra.mxu0 %v4214_v33  ;;  %v4222_v7 = vpack.c.bf16 %v1457_v35, %v1456_v63  ;;  %v5198_v63 = vmov 0.0|0.0   ;;  %v1647_v35 = vld [vmem:[%s7468_s9 + $0x20] sm:$0xff] }
 0x423   :  { %v4216_v43 = vpack.c.bf16 %v5023_v12, %v4963_v8  ;;  %v1131_v14 = vsel %vm324_vm4, %v5022_v49, %v5023_v12  ;;  %1869 = vperm.xlu1 %4708, %v1859_v42   ;;  %1680 = vperm.xlu0 %4707, %v1670_v22   ;;  %v4981_v48 = vpop.permute.xlu0 %4980  ;;  %v1918_v49 = vld [vmem:[%s7467_s8 + $0x18] sm:$0xff] }
 0x424   :  { %v4218_v26 = vpack.c.bf16 %v1131_v14, %v1130_v13  ;;  %v6182_v10 = vpop.permute.xlu1 %1043  ;;  %3434 = vmatmul.mubr.msk.f32.gmra.mrb[12].mxu0 %vm284_vm11, %v7560_v44  ;;  %v4983_v37 = vunpack.i.h.bf16 %v4981_v48  ;;  %v4982_v52 = vunpack.i.l.bf16 %v4981_v48  ;;  %v1864_v13 = vld [vmem:[%s7466_s7 + $0x28] sm:$0xff]  ;;  %v1677_v14 = vld [vmem:[%s7465_s6 + $0x38] sm:$0xff]  ;;  %4248 = vmatprep.subr.bf16.mxu1 %v5198_v63 }
 0x425   :  { %4217 = vmatprep.subr.bf16.mxu0 %v4216_v43  ;;  %982 = vmatprep.mubr.f32.mxu0 %v7528_v18  ;;  %v1863_v43 = vld [vmem:[%s7466_s7 + $0x20] sm:$0xff]  ;;  %v1922_v48 = vld [vmem:[%s7467_s8 + $0x38] sm:$0xff]  ;;  %v1920_v44 = vld [vmem:[%s7467_s8 + $0x28] sm:$0xff] }
 0x426   :  { %4219 = vmatpush1.bf16.msra.mxu0 %v4218_v26  ;;  %v1460_v17 = vsel %vm1455_vm2, %v4982_v52, %v4983_v37  ;;  %v1919_v26 = vld [vmem:[%s7467_s8 + $0x20] sm:$0xff] }
 0x427   :  { %4221 = vmatprep.subr.bf16.mxu0 %v4220_v36  ;;  %1874 = vperm.xlu1 %4708, %v1860_v50   ;;  %v1034_v57 = vpop.permute.xlu0 %1033  ;;  %v1921_v50 = vld [vmem:[%s7467_s8 + $0x30] sm:$0xff]  ;;  %v1643_v36 = vld [vmem:[%s7468_s9] sm:$0xff] }
 0x428   :  { %1690 = vperm.xlu0 %4707, %v1672_v56   ;;  %v6195_v51 = vpop.permute.xlu1 %1047  ;;  %3435 = vmatmul.mubr.msk.f32.gmra.mrb[14].mxu0 %vm284_vm11, %v7561_v58  ;;  %v1057_v38 = vsel %vm1053_vm7, %v1034_v57, %v6062_v19  ;;  %v1917_v19 = vld [vmem:[%s7467_s8 + $0x10] sm:$0xff]  ;;  %v1644_v56 = vld [vmem:[%s7468_s9 + $0x8] sm:$0xff]  ;;  %v1651_v52 = vld [vmem:[%s7468_s9 + $0x40] sm:$0xff] }
 0x429   :  { %1240 = vmatprep.mubr.f32.mxu0 %v7528_v18  ;;  %v4249_v58 = vpack.c.bf16 %v1644_v56, %v1643_v36  ;;  %v1648_v57 = vld [vmem:[%s7468_s9 + $0x28] sm:$0xff] }
 0x42b   :  { %1700 = vperm.xlu1 %4708, %v1674_v61   ;;  %v4986_v62 = vpop.permute.xlu0 %4985  ;;  %v1646_v61 = vld [vmem:[%s7468_s9 + $0x18] sm:$0xff]  ;;  %4250 = vmatpush1.bf16.msra.mxu1 %v4249_v58 }
 0x42c   :  { %1695 = vperm.xlu0 %4707, %v1673_v32   ;;  %v5036_v1 = vpop.permute.xlu1 %5035  ;;  %3436 = vmatmul.mubr.msk.f32.vlgmr.msra.gmra.mrb[0].mxu0 %vm284_vm11, %v1054_v24  ;;  %v4988_v60 = vunpack.i.h.bf16 %v4986_v62  ;;  %v4987_v27 = vunpack.i.l.bf16 %v4986_v62  ;;  %v4252_v32 = vpack.c.bf16 %v1646_v61, %v1645_v15  ;;  %v4255_v24 = vpack.c.bf16 %v1648_v57, %v1647_v35  ;;  %v1663_v35 = vld [vmem:[%s7468_s9 + $0xa0] sm:$0xff]  ;;  %v1664_v57 = vld [vmem:[%s7468_s9 + $0xa8] sm:$0xff] }
 0x42d   :  { %v5038_v46 = vunpack.i.h.bf16 %v5036_v1  ;;  %v5037_v28 = vunpack.i.l.bf16 %v5036_v1  ;;  %4223 = vmatpush1.bf16.msra.mxu0 %v4222_v7  ;;  %1246 = vmatprep.mubr.f32.mxu0 %v7528_v18  ;;  %v1649_v7 = vld [vmem:[%s7468_s9 + $0x30] sm:$0xff] }
 0x42e   :  { %v1462_v45 = vsel %vm1455_vm2, %v4987_v27, %v4988_v60  ;;  %4251 = vmatprep.subr.bf16.mxu1 %v5198_v63 }
 0x42f   :  { %v4224_v11 = vpack.c.bf16 %v5038_v46, %v4978_v39  ;;  %v1459_v0 = vsel %vm1455_vm2, %v5037_v28, %v5038_v46  ;;  %1930 = vperm.xlu1 %4708, %v1916_v25   ;;  %v1038_v59 = vpop.permute.xlu0 %1037  ;;  %4253 = vmatpush1.bf16.msra.mxu1 %v4252_v32  ;;  %v1650_v39 = vld [vmem:[%s7468_s9 + $0x38] sm:$0xff] }
 0x430   :  { %v4226_v41 = vpack.c.bf16 %v1459_v0, %v1458_v4  ;;  %1925 = vperm.xlu0 %4707, %v1915_v23   ;;  %v5041_v30 = vpop.permute.xlu1 %5040  ;;  %3437 = vmatmul.mubr.msk.f32.gmra.mrb[2].mxu0 %vm284_vm11, %v1055_v20  ;;  %v1058_v40 = vsel %vm1053_vm7, %v1038_v59, %v6079_v21  ;;  %v1865_v21 = vld [vmem:[%s7466_s7 + $0x30] sm:$0xff]  ;;  %v4258_v25 = vpack.c.bf16 %v1650_v39, %v1649_v7  ;;  %v1652_v20 = vld [vmem:[%s7468_s9 + $0x48] sm:$0xff] }
 0x431   :  { %v5043_v47 = vunpack.i.h.bf16 %v5041_v30  ;;  %v5042_v34 = vunpack.i.l.bf16 %v5041_v30  ;;  %4225 = vmatprep.subr.bf16.mxu0 %v4224_v11  ;;  %1252 = vmatprep.mubr.f32.mxu0 %v7528_v18 }
 0x432   :  { %4227 = vmatpush1.bf16.msra.mxu0 %v4226_v41  ;;  %4254 = vmatprep.subr.bf16.mxu1 %v5198_v63 }
 0x433   :  { %v4228_v55 = vpack.c.bf16 %v5043_v47, %v4983_v37  ;;  %v1461_v8 = vsel %vm1455_vm2, %v5042_v34, %v5043_v47  ;;  %1884 = vperm.xlu1 %4708, %v1862_v2   ;;  %4256 = vmatpush1.bf16.msra.mxu1 %v4255_v24  ;;  %v4261_v2 = vpack.c.bf16 %v1652_v20, %v1651_v52  ;;  %v1653_v47 = vld [vmem:[%s7468_s9 + $0x50] sm:$0xff]  ;;  %v1654_v34 = vld [vmem:[%s7468_s9 + $0x58] sm:$0xff]  ;;  %v1667_v52 = vld [vmem:[%s7468_s9 + $0xc0] sm:$0xff] }
 0x434   :  { %v4230_v6 = vpack.c.bf16 %v1461_v8, %v1460_v17  ;;  %1879 = vperm.xlu0 %4707, %v1861_v53   ;;  %v5046_v5 = vpop.permute.xlu1 %5045  ;;  %3438 = vmatmul.mubr.msk.f32.gmra.mrb[4].mxu0 %vm284_vm11, %v1056_v54  ;;  %v1655_v53 = vld [vmem:[%s7468_s9 + $0x60] sm:$0xff]  ;;  %v1656_v54 = vld [vmem:[%s7468_s9 + $0x68] sm:$0xff] }
 0x435   :  { %v5048_v33 = vunpack.i.h.bf16 %v5046_v5  ;;  %v5047_v3 = vunpack.i.l.bf16 %v5046_v5  ;;  %4229 = vmatprep.subr.bf16.mxu0 %v4228_v55  ;;  %1258 = vmatprep.mubr.f32.mxu0 %v7528_v18  ;;  %v4267_v27 = vpack.c.bf16 %v1656_v54, %v1655_v53  ;;  %v1668_v20 = vld [vmem:[%s7468_s9 + $0xc8] sm:$0xff] }
 0x436   :  { %4231 = vmatpush1.bf16.msra.mxu0 %v4230_v6  ;;  %4257 = vmatprep.subr.bf16.mxu1 %v5198_v63 }
 0x437   :  { %v4232_v42 = vpack.c.bf16 %v5048_v33, %v4988_v60  ;;  %v1463_v22 = vsel %vm1455_vm2, %v5047_v3, %v5048_v33  ;;  %1710 = vperm.xlu1 %4708, %v1676_v31   ;;  %4259 = vmatpush1.bf16.msra.mxu1 %v4258_v25  ;;  %v1657_v31 = vld [vmem:[%s7468_s9 + $0x70] sm:$0xff]  ;;  %v1658_v33 = vld [vmem:[%s7468_s9 + $0x78] sm:$0xff] }
 0x438   :  { %v4234_v12 = vpack.c.bf16 %v1463_v22, %v1462_v45  ;;  %1705 = vperm.xlu0 %4707, %v1675_v29   ;;  %3439 = vmatmul.mubr.msk.f32.gmra.mrb[6].mxu0 %vm284_vm11, %v1057_v38  ;;  %v1666_v25 = vld [vmem:[%s7468_s9 + $0xb8] sm:$0xff] }
 0x439   :  { %4233 = vmatprep.subr.bf16.mxu0 %v4232_v42  ;;  %1264 = vmatprep.mubr.f32.mxu0 %v7528_v18 }
 0x43a   :  { %4235 = vmatpush1.bf16.msra.mxu0 %v4234_v12  ;;  %4260 = vmatprep.subr.bf16.mxu1 %v5198_v63  ;;  %v4270_v12 = vpack.c.bf16 %v1658_v33, %v1657_v31 }
 0x43b   :  { %1940 = vperm.xlu1 %4708, %v1918_v49   ;;  %4262 = vmatpush1.bf16.msra.mxu1 %v4261_v2  ;;  %v1659_v49 = vld [vmem:[%s7468_s9 + $0x80] sm:$0xff] }
 0x43c   :  { %1935 = vperm.xlu0 %4707, %v1917_v19   ;;  %3440 = vmatmul.mubr.msk.f32.gmra.mrb[8].mxu0 %vm284_vm11, %v1058_v40  ;;  %v1660_v19 = vld [vmem:[%s7468_s9 + $0x88] sm:$0xff] }
 0x43d   :  { %1270 = vmatprep.mubr.f32.mxu0 %v7528_v18  ;;  %4263 = vmatprep.subr.bf16.mxu1 %v5198_v63 }
 0x43f   :  { %1894 = vperm.xlu1 %4708, %v1864_v13  }
 0x440   :  { %1889 = vperm.xlu0 %4707, %v1863_v43  }
 0x443   :  { %1899 = vperm.xlu1 %4708, %v1865_v21  }
 0x444   :  { %1715 = vperm.xlu0 %4707, %v1677_v14  }
 0x447   :  { %1904 = vperm.xlu1 %4708, %v1866_v16   ;;  %v4273_v16 = vpack.c.bf16 %v1660_v19, %v1659_v49 }
 0x448   :  { %1945 = vperm.xlu0 %4707, %v1919_v26   ;;  %v1661_v26 = vld [vmem:[%s7468_s9 + $0x90] sm:$0xff] }
 0x44b   :  { %1960 = vperm.xlu1 %4708, %v1922_v48   ;;  %v1662_v48 = vld [vmem:[%s7468_s9 + $0x98] sm:$0xff] }
 0x44c   :  { %1950 = vperm.xlu0 %4707, %v1920_v44   ;;  %v4276_v32 = vpack.c.bf16 %v1662_v48, %v1661_v26 }
 0x450   :  { %1955 = vperm.xlu0 %4707, %v1921_v50  }
 0x459   :  { %v4991_v9 = vpop.permute.xlu0 %4990  ;;  %v5051_v1 = vpop.permute.xlu1 %5050 }
 0x45a   :  { %v4993_v46 = vunpack.i.h.bf16 %v4991_v9  ;;  %v4992_v28 = vunpack.i.l.bf16 %v4991_v9  ;;  %v5053_v23 = vunpack.i.h.bf16 %v5051_v1  ;;  %v5052_v37 = vunpack.i.l.bf16 %v5051_v1  ;;  %v1665_v1 = vld [vmem:[%s7468_s9 + $0xb0] sm:$0xff] }
 0x45b   :  { %v4279_v9 = vpack.c.bf16 %v1664_v57, %v1663_v35 }
 0x45c   :  { %v1464_v4 = vsel %vm1455_vm2, %v4992_v28, %v4993_v46  ;;  %v4236_v11 = vpack.c.bf16 %v5053_v23, %v4993_v46  ;;  %v1465_v0 = vsel %vm1455_vm2, %v5052_v37, %v5053_v23  ;;  %v4282_v37 = vpack.c.bf16 %v1666_v25, %v1665_v1 }
 0x45d   :  { %v4238_v62 = vpack.c.bf16 %v1465_v0, %v1464_v4  ;;  %v1042_v41 = vpop.permute.xlu0 %1041 }
 0x45e   :  { %v1059_v30 = vsel %vm1053_vm7, %v1042_v41, %v6182_v10  ;;  %4237 = vmatprep.subr.bf16.mxu0 %v4236_v11  ;;  %v4264_v10 = vpack.c.bf16 %v1654_v34, %v1653_v47 }
 0x45f   :  { %3441 = vmatmul.mubr.msk.f32.gmra.mrb[10].mxu0 %vm284_vm11, %v1059_v30 }
 0x460   :  { %4239 = vmatpush1.bf16.msra.mxu0 %v4238_v62  ;;  %1276 = vmatprep.mubr.f32.mxu0 %v7528_v18  ;;  %v4285_v62 = vpack.c.bf16 %v1668_v20, %v1667_v52 }
 0x461   :  { %4265 = vmatpush1.bf16.msra.mxu1 %v4264_v10 }
 0x462   :  { %4266 = vmatprep.subr.bf16.mxu1 %v5198_v63 }
 0x465   :  { %v5026_v17 = vpop.permute.xlu0 %5025  ;;  %v5056_v60 = vpop.permute.xlu1 %5055  ;;  %4268 = vmatpush1.bf16.msra.mxu1 %v4267_v27 }
 0x466   :  { %v5028_v55 = vunpack.i.h.bf16 %v5026_v17  ;;  %v5027_v8 = vunpack.i.l.bf16 %v5026_v17  ;;  %v5058_v6 = vunpack.i.h.bf16 %v5056_v60  ;;  %v5057_v5 = vunpack.i.l.bf16 %v5056_v60  ;;  %4269 = vmatprep.subr.bf16.mxu1 %v5198_v63 }
 0x468   :  { %v1466_v3 = vsel %vm1455_vm2, %v5027_v8, %v5028_v55  ;;  %v4240_v29 = vpack.c.bf16 %v5058_v6, %v5028_v55  ;;  %v1467_v38 = vsel %vm1455_vm2, %v5057_v5, %v5058_v6  ;;  %v1669_v5 = vld [vmem:[%s7468_s9 + $0xd0] sm:$0x3] }
 0x469   :  { %v4242_v45 = vpack.c.bf16 %v1467_v38, %v1466_v3  ;;  %v1046_v42 = vpop.permute.xlu0 %1045  ;;  %v5061_v22 = vpop.permute.xlu1 %5060  ;;  %4271 = vmatpush1.bf16.msra.mxu1 %v4270_v12 }
 0x46a   :  { %v1060_v59 = vsel %vm1053_vm7, %v1046_v42, %v6195_v51  ;;  %4241 = vmatprep.subr.bf16.mxu0 %v4240_v29  ;;  %v5063_v40 = vunpack.i.h.bf16 %v5061_v22  ;;  %v5062_v13 = vunpack.i.l.bf16 %v5061_v22  ;;  %4272 = vmatprep.subr.bf16.mxu1 %v5198_v63 }
 0x46b   :  { %3442 = vmatmul.mubr.msk.f32.gmra.mrb[12].mxu0 %vm284_vm11, %v1060_v59 }
 0x46c   :  { %4243 = vmatpush1.bf16.msra.mxu0 %v4242_v45  ;;  %1282 = vmatprep.mubr.f32.mxu0 %v7528_v18  ;;  %v1469_v44 = vsel %vm1455_vm2, %v5062_v13, %v5063_v40 }
 0x46d   :  { %v5031_v51 = vpop.permute.xlu0 %5030  ;;  %v1052_v43 = vpop.permute.xlu1 %1051  ;;  %4274 = vmatpush1.bf16.msra.mxu1 %v4273_v16 }
 0x46e   :  { %v5033_v21 = vunpack.i.h.bf16 %v5031_v51  ;;  %v5032_v14 = vunpack.i.l.bf16 %v5031_v51  ;;  %4275 = vmatprep.subr.bf16.mxu1 %v5198_v63 }
 0x470   :  { %v1468_v50 = vsel %vm1455_vm2, %v5032_v14, %v5033_v21  ;;  %v4244_v36 = vpack.c.bf16 %v5063_v40, %v5033_v21 }
 0x471   :  { %v4246_v56 = vpack.c.bf16 %v1469_v44, %v1468_v50  ;;  %v1050_v15 = vpop.permute.xlu0 %1049  ;;  %v1361_v58 = vpop.permute.xlu1 %1360  ;;  %4277 = vmatpush1.bf16.msra.mxu1 %v4276_v32 }
 0x472   :  { %v1061_v61 = vsel %vm1053_vm7, %v1050_v15, %v1052_v43  ;;  %4245 = vmatprep.subr.bf16.mxu0 %v4244_v36  ;;  %4278 = vmatprep.subr.bf16.mxu1 %v5198_v63 }
 0x473   :  { %3443 = vmatmul.mubr.msk.f32.gmra.mrb[14].mxu0 %vm284_vm11, %v1061_v61 }
 0x474   :  { %4247 = vmatpush1.bf16.msra.mxu0 %v4246_v56  ;;  %1578 = vmatprep.mubr.f32.mxu0 %v7528_v18 }
 0x475   :  { %v1359_v24 = vpop.permute.xlu0 %1358  ;;  %v1365_v7 = vpop.permute.xlu1 %1364  ;;  %4280 = vmatpush1.bf16.msra.mxu1 %v4279_v9 }
 0x476   :  { %v1391_v39 = vsel %vm1390_vm8, %v1359_v24, %v1361_v58  ;;  %4281 = vmatprep.subr.bf16.mxu1 %v5198_v63 }
 0x477   :  { %3444 = vmatmul.mubr.msk.f32.vlgmr.msra.gmra.mrb[0].mxu0 %vm284_vm11, %v1391_v39 }
 0x478   :  { %1584 = vmatprep.mubr.f32.mxu0 %v7528_v18 }
 0x479   :  { %v1363_v46 = vpop.permute.xlu0 %1362  ;;  %v1369_v28 = vpop.permute.xlu1 %1368  ;;  %4283 = vmatpush1.bf16.msra.mxu1 %v4282_v37 }
 0x47a   :  { %v1392_v23 = vsel %vm1390_vm8, %v1363_v46, %v1365_v7  ;;  %4284 = vmatprep.subr.bf16.mxu1 %v5198_v63 }
 0x47b   :  { %3445 = vmatmul.mubr.msk.f32.gmra.mrb[2].mxu0 %vm284_vm11, %v1392_v23 }
 0x47c   :  { %1590 = vmatprep.mubr.f32.mxu0 %v7528_v18 }
 0x47d   :  { %v1367_v4 = vpop.permute.xlu0 %1366  ;;  %v1373_v11 = vpop.permute.xlu1 %1372  ;;  %4286 = vmatpush1.bf16.msra.mxu1 %v4285_v62 }
 0x47e   :  { %v1393_v0 = vsel %vm1390_vm8, %v1367_v4, %v1369_v28  ;;  %1798 = vmatprep.subr.mxu1 %v7528_v18 }
 0x47f   :  { %3446 = vmatmul.mubr.msk.f32.gmra.mrb[4].mxu0 %vm284_vm11, %v1393_v0 }
 0x480   :  { %1596 = vmatprep.mubr.f32.mxu0 %v7528_v18 }
 0x481   :  { %v1371_v41 = vpop.permute.xlu0 %1370  ;;  %v1377_v30 = vpop.permute.xlu1 %1376  ;;  %3452 = vmatpush1.msk.msra.mxu1 %vm1742_vm9, %v1669_v5 }
 0x482   :  { %v1394_v2 = vsel %vm1390_vm8, %v1371_v41, %v1373_v11 }
 0x483   :  { %3447 = vmatmul.mubr.msk.f32.gmra.mrb[6].mxu0 %vm284_vm11, %v1394_v2 }
 0x484   :  { %1602 = vmatprep.mubr.f32.mxu0 %v7528_v18 }
 0x485   :  { %v1375_v47 = vpop.permute.xlu0 %1374  ;;  %v1381_v34 = vpop.permute.xlu1 %1380 }
 0x486   :  { %v1395_v10 = vsel %vm1390_vm8, %v1375_v47, %v1377_v30 }
 0x487   :  { %3448 = vmatmul.mubr.msk.f32.gmra.mrb[8].mxu0 %vm284_vm11, %v1395_v10 }
 0x488   :  { %1608 = vmatprep.mubr.f32.mxu0 %v7528_v18 }
 0x489   :  { %v1379_v53 = vpop.permute.xlu0 %1378  ;;  %v1385_v54 = vpop.permute.xlu1 %1384 }
 0x48a   :  { %v1396_v17 = vsel %vm1390_vm8, %v1379_v53, %v1381_v34 }
 0x48b   :  { %3449 = vmatmul.mubr.msk.f32.gmra.mrb[10].mxu0 %vm284_vm11, %v1396_v17 }
 0x48c   :  { %1614 = vmatprep.mubr.f32.mxu0 %v7528_v18 }
 0x48d   :  { %v1383_v60 = vpop.permute.xlu0 %1382  ;;  %v1389_v55 = vpop.permute.xlu1 %1388 }
 0x48e   :  { %v1397_v27 = vsel %vm1390_vm8, %v1383_v60, %v1385_v54 }
 0x48f   :  { %3450 = vmatmul.mubr.msk.f32.gmra.mrb[12].mxu0 %vm284_vm11, %v1397_v27 }
 0x490   :  { %1620 = vmatprep.mubr.f32.mxu0 %v7528_v18 }
 0x491   :  { %v1387_v8 = vpop.permute.xlu0 %1386 }
 0x492   :  { %v1398_v6 = vsel %vm1390_vm8, %v1387_v8, %v1389_v55 }
 0x493   :  { %3451 = vmatmul.mubr.msk.f32.gmra.mrb[14].mxu0 %vm284_vm11, %v1398_v6  ;;  %vm2145_vm11 = vcmask 1042432  }
 0x49e   :  { %v1686_v14 = vpop.permute.xlu1 %1685 }
 0x4a2   :  { %v1681_v21 = vpop.permute.xlu0 %1680  ;;  %v1870_v26 = vpop.permute.xlu1 %1869 }
 0x4a6   :  { %v1875_v44 = vpop.permute.xlu1 %1874 }
 0x4a7   :  { %v1691_v16 = vpop.permute.xlu0 %1690 }
 0x4aa   :  { %v1701_v36 = vpop.permute.xlu1 %1700 }
 0x4ab   :  { %v1696_v48 = vpop.permute.xlu0 %1695 }
 0x4ae   :  { %v1931_v15 = vpop.permute.xlu1 %1930 }
 0x4af   :  { %v1926_v50 = vpop.permute.xlu0 %1925 }
 0x4b2   :  { %v1885_v61 = vpop.permute.xlu1 %1884 }
 0x4b3   :  { %v1880_v56 = vpop.permute.xlu0 %1879 }
 0x4b6   :  { %v1711_v39 = vpop.permute.xlu1 %1710 }
 0x4b7   :  { %v1706_v58 = vpop.permute.xlu0 %1705 }
 0x4ba   :  { %v1941_v0 = vpop.permute.xlu1 %1940 }
 0x4bb   :  { %v1936_v32 = vpop.permute.xlu0 %1935 }
 0x4be   :  { %v1895_v17 = vpop.permute.xlu1 %1894 }
 0x4bf   :  { %v1890_v28 = vpop.permute.xlu0 %1889 }
 0x4c3   :  { %v1716_v30 = vpop.permute.xlu0 %1715 }
 0x4c7   :  { %v1946_v6 = vpop.permute.xlu0 %1945 }
 0x54a   :  { %v1580_v31 = vpop.f32.mrb[0].mxu0 }
 0x54b   :  { %v1582_v33 = vpop.f32.mrb[1].mxu0 }
 0x54c   :  { %3453 = vmatprep.mubr.msk.f32.mxu1 %vm228_vm1, %v1582_v33 }
 0x54d   :  { %1811 = vmatmul.mubr.f32.vlgmr.msra.gmra.mrb[12].mxu1 %v1580_v31 }
 0x54e   :  { %v1586_v3 = vpop.f32.mrb[2].mxu0 }
 0x54f   :  { %v1588_v29 = vpop.f32.mrb[3].mxu0 }
 0x550   :  { %3454 = vmatprep.mubr.msk.f32.mxu1 %vm228_vm1, %v1588_v29 }
 0x551   :  { %1816 = vmatmul.mubr.f32.gmra.mrb[14].mxu1 %v1586_v3 }
 0x552   :  { %v1592_v38 = vpop.f32.mrb[4].mxu0 }
 0x553   :  { %v1594_v45 = vpop.f32.mrb[5].mxu0 }
 0x554   :  { %3455 = vmatprep.mubr.msk.f32.mxu1 %vm228_vm1, %v1594_v45  ;;  %v1900_v45 = vpop.permute.xlu1 %1899 }
 0x555   :  { %1821 = vmatmul.mubr.f32.gmra.mrb[16].mxu1 %v1592_v38 }
 0x556   :  { %v1598_v42 = vpop.f32.mrb[6].mxu0 }
 0x557   :  { %v1600_v22 = vpop.f32.mrb[7].mxu0 }
 0x558   :  { %3456 = vmatprep.mubr.msk.f32.mxu1 %vm228_vm1, %v1600_v22 }
 0x559   :  { %1826 = vmatmul.mubr.f32.gmra.mrb[18].mxu1 %v1598_v42 }
 0x55a   :  { %v1604_v59 = vpop.f32.mrb[8].mxu0 }
 0x55b   :  { %v1606_v12 = vpop.f32.mrb[9].mxu0 }
 0x55c   :  { %3457 = vmatprep.mubr.msk.f32.mxu1 %vm228_vm1, %v1606_v12 }
 0x55d   :  { %1831 = vmatmul.mubr.f32.gmra.mrb[20].mxu1 %v1604_v59  ;;  %v1951_v59 = vpop.permute.xlu0 %1950 }
 0x55e   :  { %v1610_v49 = vpop.f32.mrb[10].mxu0 }
 0x55f   :  { %v1612_v19 = vpop.f32.mrb[11].mxu0 }
 0x560   :  { %3458 = vmatprep.mubr.msk.f32.mxu1 %vm228_vm1, %v1612_v19 }
 0x561   :  { %1836 = vmatmul.mubr.f32.gmra.mrb[22].mxu1 %v1610_v49 }
 0x562   :  { %v1616_v40 = vpop.f32.mrb[12].mxu0 }
 0x563   :  { %v1618_v13 = vpop.f32.mrb[13].mxu0 }
 0x564   :  { %3459 = vmatprep.mubr.msk.f32.mxu1 %vm228_vm1, %v1618_v13 }
 0x565   :  { %1841 = vmatmul.mubr.f32.gmra.mrb[24].mxu1 %v1616_v40 }
 0x566   :  { %v1622_v51 = vpop.f32.mrb[14].mxu0 }
 0x567   :  { %v1624_v43 = vpop.f32.mrb[15].mxu0 }
 0x568   :  { %3460 = vmatprep.mubr.msk.f32.mxu1 %vm228_vm1, %v1624_v43  ;;  %v1905_v43 = vpop.permute.xlu1 %1904  ;;  %vm2031_vm1 = vcmask 523264  }
 0x569   :  { %1846 = vmatmul.mubr.f32.gmra.mrb[26].mxu1 %v1622_v51 }
 0x620   :  { %v1812_v35 = vpop.f32.mrb[12].mxu1 }
 0x621   :  { %v1813_v57 = vadd.f32 %v1812_v35, %v1681_v21  ;;  %v1814_v24 = vpop.f32.mrb[13].mxu1 }
 0x623   :  { %v1851_v7 = vmax.f32 %v1813_v57, 0.0 }
 0x624   :  { %v1817_v9 = vpop.f32.mrb[14].mxu1 }
 0x625   :  { %v1907_v1 = vmul.f32 %v1870_v26, %v1851_v7  ;;  %v1818_v25 = vadd.f32 %v1817_v9, %v1686_v14  ;;  %v1819_v46 = vpop.f32.mrb[15].mxu1  ;;  %v2164_v9 = vld [vmem:[%s7469_s10 + $0x200] sm:$0xff] }
 0x627   :  { %v1963_v23 = vadd.f32 %v1926_v50, %v1907_v1  ;;  %v1852_v37 = vmax.f32 %v1818_v25, 0.0  ;;  %v2165_v1 = vld [vmem:[%s7469_s10 + $0x220] sm:$0xff]  ;;  %v2382_v25 = vld [vmem:[%s7469_s10 + $0x210] sm:$0xff] }
 0x628   :  { %v1822_v52 = vpop.f32.mrb[16].mxu1 }
 0x629   :  { %v1908_v20 = vmul.f32 %v1875_v44, %v1852_v37  ;;  %v1823_v4 = vadd.f32 %v1822_v52, %v1691_v16  ;;  %1971 = vxpose.xlu0.b32.start [1/8] (short) (narrow) %v1963_v23, 16  ;;  %v1824_v11 = vpop.f32.mrb[17].mxu1  ;;  %v4287_v23 = vpack.c.bf16 %v2165_v1, %v2164_v9  ;;  %v2383_v37 = vld [vmem:[%s7469_s10 + $0x230] sm:$0xff]  ;;  %v2148_v52 = vld [vmem:[%s7469_s10] sm:$0xff] }
 0x62a   :  { %v2172_v1 = vld [vmem:[%s7469_s10 + $0x300] sm:$0xff] }
 0x62b   :  { %v1964_v62 = vadd.f32 %v1931_v15, %v1908_v20  ;;  %v1853_v41 = vmax.f32 %v1823_v4, 0.0  ;;  %v2149_v20 = vld [vmem:[%s7469_s10 + $0x20] sm:$0xff]  ;;  %v4351_v4 = vpack.c.bf16 %v2383_v37, %v2382_v25  ;;  %4288 = vmatprep.subr.bf16.mxu1 %v4287_v23  ;;  %v2391_v23 = vld [vmem:[%s7469_s10 + $0x330] sm:$0xff] }
 0x62c   :  { %v1827_v2 = vpop.f32.mrb[18].mxu1  ;;  %v4289_v11 = vpack.c.bf16 %v2149_v20, %v2148_v52  ;;  %v2173_v25 = vld [vmem:[%s7469_s10 + $0x320] sm:$0xff] }
 0x62d   :  { %v1909_v47 = vmul.f32 %v1880_v56, %v1853_v41  ;;  %v1828_v34 = vadd.f32 %v1827_v2, %v1696_v48  ;;  %1972 = vxpose.xlu0.b32.cont [2/8] (short) (narrow) %v1964_v62, 16  ;;  %v1829_v10 = vpop.f32.mrb[19].mxu1  ;;  %v1956_v48 = vpop.permute.xlu0 %1955  ;;  %v2367_v62 = vld [vmem:[%s7469_s10 + $0x30] sm:$0xff]  ;;  %4352 = vmatprep.subr.bf16.mxu0 %v4351_v4  ;;  %v2167_v2 = vld [vmem:[%s7469_s10 + $0x260] sm:$0xff] }
 0x62e   :  { %v1961_v56 = vpop.permute.xlu1 %1960  ;;  %4290 = vmatpush3.bf16.msra.mxu1 %v4289_v11  ;;  %v2156_v37 = vld [vmem:[%s7469_s10 + $0x100] sm:$0xff] }
 0x62f   :  { %v1965_v53 = vadd.f32 %v1936_v32, %v1909_v47  ;;  %v1854_v54 = vmax.f32 %v1828_v34, 0.0  ;;  %v2384_v47 = vld [vmem:[%s7469_s10 + $0x250] sm:$0xff]  ;;  %v2157_v52 = vld [vmem:[%s7469_s10 + $0x120] sm:$0xff] }
 0x630   :  { %v1832_v60 = vpop.f32.mrb[20].mxu1  ;;  %v4305_v11 = vpack.c.bf16 %v2157_v52, %v2156_v37 }
 0x631   :  { %v1910_v27 = vmul.f32 %v1885_v61, %v1854_v54  ;;  %v1833_v55 = vadd.f32 %v1832_v60, %v1701_v36  ;;  %1973 = vxpose.xlu0.b32.cont [3/8] (short) (narrow) %v1965_v53, 16  ;;  %v1834_v8 = vpop.f32.mrb[21].mxu1  ;;  %v2385_v53 = vld [vmem:[%s7469_s10 + $0x270] sm:$0xff]  ;;  %v2150_v54 = vld [vmem:[%s7469_s10 + $0x40] sm:$0xff] }
 0x632   :  { %v2368_v8 = vld [vmem:[%s7469_s10 + $0x50] sm:$0xff] }
 0x633   :  { %v1966_v5 = vadd.f32 %v1941_v0, %v1910_v27  ;;  %v1855_v31 = vmax.f32 %v1833_v55, 0.0  ;;  %v2366_v0 = vld [vmem:[%s7469_s10 + $0x10] sm:$0xff]  ;;  %v4355_v27 = vpack.c.bf16 %v2385_v53, %v2384_v47  ;;  %v2174_v47 = vld [vmem:[%s7469_s10 + $0x340] sm:$0xff] }
 0x634   :  { %v1837_v33 = vpop.f32.mrb[22].mxu1  ;;  %v4353_v41 = vpack.c.bf16 %v2367_v62, %v2366_v0  ;;  %v2374_v0 = vld [vmem:[%s7469_s10 + $0x110] sm:$0xff] }
 0x635   :  { %v1911_v3 = vmul.f32 %v1890_v28, %v1855_v31  ;;  %v1838_v29 = vadd.f32 %v1837_v33, %v1706_v58  ;;  %1974 = vxpose.xlu0.b32.cont [4/8] (short) (narrow) %v1966_v5, 16  ;;  %v1839_v38 = vpop.f32.mrb[23].mxu1  ;;  %v2375_v62 = vld [vmem:[%s7469_s10 + $0x130] sm:$0xff] }
 0x636   :  { %4354 = vmatpush3.bf16.msra.mxu0 %v4353_v41  ;;  %v2386_v38 = vld [vmem:[%s7469_s10 + $0x290] sm:$0xff]  ;;  %v4369_v41 = vpack.c.bf16 %v2375_v62, %v2374_v0 }
 0x637   :  { %v1967_v42 = vadd.f32 %v1946_v6, %v1911_v3  ;;  %v1856_v22 = vmax.f32 %v1838_v29, 0.0  ;;  %v2369_v6 = vld [vmem:[%s7469_s10 + $0x70] sm:$0xff]  ;;  %4356 = vmatprep.subr.bf16.mxu0 %v4355_v27  ;;  %v2168_v3 = vld [vmem:[%s7469_s10 + $0x280] sm:$0xff] }
 0x638   :  { %v1842_v12 = vpop.f32.mrb[24].mxu1  ;;  %v4357_v33 = vpack.c.bf16 %v2369_v6, %v2368_v8  ;;  %v2169_v29 = vld [vmem:[%s7469_s10 + $0x2a0] sm:$0xff]  ;;  %v2376_v6 = vld [vmem:[%s7469_s10 + $0x150] sm:$0xff] }
 0x639   :  { %v1912_v49 = vmul.f32 %v1895_v17, %v1856_v22  ;;  %v1843_v19 = vadd.f32 %v1842_v12, %v1711_v39  ;;  %1975 = vxpose.xlu0.b32.cont [5/8] (short) (narrow) %v1967_v42, 16  ;;  %v1844_v40 = vpop.f32.mrb[25].mxu1  ;;  %v2151_v17 = vld [vmem:[%s7469_s10 + $0x60] sm:$0xff]  ;;  %v4295_v42 = vpack.c.bf16 %v2169_v29, %v2168_v3  ;;  %v2387_v22 = vld [vmem:[%s7469_s10 + $0x2b0] sm:$0xff] }
 0x63a   :  { %v4293_v55 = vpack.c.bf16 %v2151_v17, %v2150_v54  ;;  %4358 = vmatpush3.bf16.msra.mxu0 %v4357_v33  ;;  %v2153_v12 = vld [vmem:[%s7469_s10 + $0xa0] sm:$0xff]  ;;  %v2370_v40 = vld [vmem:[%s7469_s10 + $0x90] sm:$0xff] }
 0x63b   :  { %v1968_v13 = vadd.f32 %v1951_v59, %v1912_v49  ;;  %v1857_v51 = vmax.f32 %v1843_v19, 0.0  ;;  %v2152_v59 = vld [vmem:[%s7469_s10 + $0x80] sm:$0xff]  ;;  %v4359_v49 = vpack.c.bf16 %v2387_v22, %v2386_v38  ;;  %v2393_v54 = vld [vmem:[%s7469_s10 + $0x370] sm:$0xff] }
 0x63c   :  { %v1847_v21 = vpop.f32.mrb[26].mxu1  ;;  %v4297_v19 = vpack.c.bf16 %v2153_v12, %v2152_v59  ;;  %v2158_v17 = vld [vmem:[%s7469_s10 + $0x140] sm:$0xff]  ;;  %v2377_v33 = vld [vmem:[%s7469_s10 + $0x170] sm:$0xff] }
 0x63d   :  { %v1913_v14 = vmul.f32 %v1900_v45, %v1857_v51  ;;  %v1848_v16 = vadd.f32 %v1847_v21, %v1716_v30  ;;  %1976 = vxpose.xlu0.b32.cont [6/8] (short) (narrow) %v1968_v13, 16  ;;  %v1849_v26 = vpop.f32.mrb[27].mxu1  ;;  %v2166_v30 = vld [vmem:[%s7469_s10 + $0x240] sm:$0xff]  ;;  %v2371_v13 = vld [vmem:[%s7469_s10 + $0xb0] sm:$0xff]  ;;  %4360 = vmatprep.subr.bf16.mxu0 %v4359_v49  ;;  %v4373_v3 = vpack.c.bf16 %v2377_v33, %v2376_v6 }
 0x63e   :  { %v4291_v10 = vpack.c.bf16 %v2167_v2, %v2166_v30  ;;  %v2171_v26 = vld [vmem:[%s7469_s10 + $0x2e0] sm:$0xff]  ;;  %v2395_v12 = vld [vmem:[%s7469_s10 + $0x3b0] sm:$0xff] }
 0x63f   :  { %v1969_v44 = vadd.f32 %v1956_v48, %v1913_v14  ;;  %v1858_v50 = vmax.f32 %v1848_v16, 0.0  ;;  %v2170_v16 = vld [vmem:[%s7469_s10 + $0x2c0] sm:$0xff]  ;;  %v2388_v48 = vld [vmem:[%s7469_s10 + $0x2d0] sm:$0xff] }
 0x640   :  { %4292 = vmatprep.subr.bf16.mxu1 %v4291_v10  ;;  %v2392_v10 = vld [vmem:[%s7469_s10 + $0x350] sm:$0xff]  ;;  %v2159_v27 = vld [vmem:[%s7469_s10 + $0x160] sm:$0xff] }
 0x641   :  { %v1914_v36 = vmul.f32 %v1905_v43, %v1858_v50  ;;  %1977 = vxpose.xlu0.b32.cont [7/8] (short) (narrow) %v1969_v44, 16  ;;  %4294 = vmatpush3.bf16.msra.mxu1 %v4293_v55  ;;  %v4361_v43 = vpack.c.bf16 %v2371_v13, %v2370_v40  ;;  %v4299_v44 = vpack.c.bf16 %v2171_v26, %v2170_v16  ;;  %v2389_v50 = vld [vmem:[%s7469_s10 + $0x2f0] sm:$0xff]  ;;  %v2176_v29 = vld [vmem:[%s7469_s10 + $0x380] sm:$0xff] }
 0x642   :  { %4296 = vmatprep.subr.bf16.mxu1 %v4295_v42  ;;  %v4371_v55 = vpack.c.bf16 %v2393_v54, %v2392_v10  ;;  %v4309_v8 = vpack.c.bf16 %v2159_v27, %v2158_v17  ;;  %v2177_v38 = vld [vmem:[%s7469_s10 + $0x3a0] sm:$0xff] }
 0x643   :  { %v1970_v15 = vadd.f32 %v1961_v56, %v1914_v36  ;;  %4362 = vmatpush3.bf16.msra.mxu0 %v4361_v43  ;;  %v2154_v36 = vld [vmem:[%s7469_s10 + $0xc0] sm:$0xff]  ;;  %v4311_v59 = vpack.c.bf16 %v2177_v38, %v2176_v29  ;;  %v2379_v43 = vld [vmem:[%s7469_s10 + $0x1b0] sm:$0xff] }
 0x644   :  { %v2155_v56 = vld [vmem:[%s7469_s10 + $0xe0] sm:$0xff] }
 0x645   :  { %1978 = vxpose.xlu0.b32.end [8/8] (short) (narrow) %v1970_v15, 16  ;;  %4298 = vmatpush3.bf16.msra.mxu1 %v4297_v19  ;;  %v4363_v15 = vpack.c.bf16 %v2389_v50, %v2388_v48  ;;  %v2160_v49 = vld [vmem:[%s7469_s10 + $0x180] sm:$0xff]  ;;  %v2396_v48 = vld [vmem:[%s7469_s10 + $0x3d0] sm:$0xff] }
 0x646   :  { %4300 = vmatprep.subr.bf16.mxu1 %v4299_v44  ;;  %v2161_v19 = vld [vmem:[%s7469_s10 + $0x1a0] sm:$0xff]  ;;  %v2397_v50 = vld [vmem:[%s7469_s10 + $0x3f0] sm:$0xff] }
 0x647   :  { %4364 = vmatprep.subr.bf16.mxu0 %v4363_v15  ;;  %v4313_v13 = vpack.c.bf16 %v2161_v19, %v2160_v49  ;;  %v2178_v16 = vld [vmem:[%s7469_s10 + $0x3c0] sm:$0xff]  ;;  %v4379_v15 = vpack.c.bf16 %v2397_v50, %v2396_v48 }
 0x648   :  { %v2179_v26 = vld [vmem:[%s7469_s10 + $0x3e0] sm:$0xff] }
 0x649   :  { %v4315_v44 = vpack.c.bf16 %v2179_v26, %v2178_v16 }
 0x6a9   :  { %v6433_v58 = vpop.trf.xlu0 }
 0x6aa   :  { %v2018_v61 = vrot.slane %v6433_v58, 5  ;;  %v2022_v32 = vrot.slane %v6433_v58, 6  ;;  %v2004_v57 = vrot.slane %v6433_v58, 1  ;;  %v2008_v24 = vrot.slane %v6433_v58, 2 }
 0x6ab   :  { %v2026_v39 = vrot.slane %v6433_v58, 7  ;;  %v2012_v28 = vrot.slane %v6433_v58, 3  ;;  %v2016_v20 = vrot.slane %v6433_v58, 4 }
 0x6ac   :  { %v5064_v35 = vpack.i.bf16 %v2022_v32, %v2018_v61  ;;  %v5069_v7 = vpack.i.bf16 %v2008_v24, %v2004_v57 }
 0x6ad   :  { %v5074_v46 = vpack.i.bf16 %v2026_v39, %v2022_v32  ;;  %v5079_v34 = vpack.i.bf16 %v2012_v28, %v2008_v24  ;;  %v6490_v60 = vpop.trf.xlu0  ;;  %v5084_v45 = vpack.i.bf16 %v2012_v28, %v2026_v39  ;;  %v4301_v32 = vpack.c.bf16 %v2155_v56, %v2154_v36  ;;  %v2373_v24 = vld [vmem:[%s7469_s10 + $0xf0] sm:$0xff]  ;;  %v2162_v36 = vld [vmem:[%s7469_s10 + $0x1c0] sm:$0xff] }
 0x6ae   :  { %5065 = vrot.lane.b32.xlu1 %v5064_v35, %s5195_s0  ;;  %v2038_v5 = vrot.slane %v6490_v60, 1  ;;  %v2052_v31 = vrot.slane %v6490_v60, 5  ;;  %v2042_v21 = vrot.slane %v6490_v60, 2  ;;  %v2056_v14 = vrot.slane %v6490_v60, 6  ;;  %v2372_v35 = vld [vmem:[%s7469_s10 + $0xd0] sm:$0xff]  ;;  %v2163_v56 = vld [vmem:[%s7469_s10 + $0x1e0] sm:$0xff] }
 0x6af   :  { %v2060_v9 = vrot.slane %v6490_v60, 7  ;;  %4302 = vmatpush3.bf16.msra.mxu1 %v4301_v32  ;;  %v4303_v28 = vpack.c.bf16 %v2173_v25, %v2172_v1  ;;  %v2050_v2 = vrot.slane %v6490_v60, 4  ;;  %v2046_v22 = vrot.slane %v6490_v60, 3  ;;  %v2273_v1 = vld [vmem:[%s7469_s10 + $0x208] sm:$0xff] }
 0x6b0   :  { %v5089_v51 = vpack.i.bf16 %v2038_v5, %v2052_v31  ;;  %v6557_v39 = vpack.i.bf16 %v2042_v21, %v2056_v14  ;;  %v4317_v32 = vpack.c.bf16 %v2163_v56, %v2162_v36  ;;  %v2274_v25 = vld [vmem:[%s7469_s10 + $0x228] sm:$0xff] }
 0x6b1   :  { %4304 = vmatprep.subr.bf16.mxu1 %v4303_v28  ;;  %v5099_v30 = vpack.i.bf16 %v2060_v9, %v2016_v20  ;;  %v5104_v42 = vpack.i.bf16 %v2050_v2, %v6433_v58  ;;  %v5109_v14 = vpack.i.bf16 %v6490_v60, %v2046_v22  ;;  %v5119_v28 = vpack.i.bf16 %v2046_v22, %v2060_v9 }
 0x6b2   :  { %5070 = vrot.lane.b32.xlu1 %v5069_v7, %s5195_s0  ;;  %v4365_v7 = vpack.c.bf16 %v2373_v24, %v2372_v35  ;;  %v2380_v35 = vld [vmem:[%s7469_s10 + $0x1d0] sm:$0xff] }
 0x6b3   :  { %4306 = vmatpush3.bf16.msra.mxu1 %v4305_v11  ;;  %v2381_v24 = vld [vmem:[%s7469_s10 + $0x1f0] sm:$0xff] }
 0x6b4   :  { %4366 = vmatpush3.bf16.msra.mxu0 %v4365_v7  ;;  %v4381_v7 = vpack.c.bf16 %v2381_v24, %v2380_v35 }
 0x6b6   :  { %5075 = vrot.lane.b32.xlu1 %v5074_v46, %s5199_s5  ;;  %v2390_v46 = vld [vmem:[%s7469_s10 + $0x310] sm:$0xff] }
 0x6b7   :  { %v4367_v4 = vpack.c.bf16 %v2391_v23, %v2390_v46  ;;  %v4319_v46 = vpack.c.bf16 %v2274_v25, %v2273_v1 }
 0x6b9   :  { %4368 = vmatprep.subr.bf16.mxu0 %v4367_v4 }
 0x6ba   :  { %5080 = vrot.lane.b32.xlu1 %v5079_v34, %s5199_s5  ;;  %v2175_v34 = vld [vmem:[%s7469_s10 + $0x360] sm:$0xff]  ;;  %4370 = vmatpush3.bf16.msra.mxu0 %v4369_v41 }
 0x6bb   :  { %v4307_v53 = vpack.c.bf16 %v2175_v34, %v2174_v47  ;;  %4372 = vmatprep.subr.bf16.mxu0 %v4371_v55 }
 0x6bd   :  { %4308 = vmatprep.subr.bf16.mxu1 %v4307_v53 }
 0x6be   :  { %5085 = vrot.lane.b32.xlu1 %v5084_v45, %s5188_s23  ;;  %v2394_v45 = vld [vmem:[%s7469_s10 + $0x390] sm:$0xff]  ;;  %4310 = vmatpush3.bf16.msra.mxu1 %v4309_v8 }
 0x6bf   :  { %4374 = vmatpush3.bf16.msra.mxu0 %v4373_v3  ;;  %v4375_v40 = vpack.c.bf16 %v2395_v12, %v2394_v45  ;;  %4312 = vmatprep.subr.bf16.mxu1 %v4311_v59 }
 0x6c1   :  { %4376 = vmatprep.subr.bf16.mxu0 %v4375_v40 }
 0x6c2   :  { %5090 = vrot.lane.b32.xlu1 %v5089_v51, %s5195_s0  ;;  %v2378_v51 = vld [vmem:[%s7469_s10 + $0x190] sm:$0xff]  ;;  %4314 = vmatpush3.bf16.msra.mxu1 %v4313_v13 }
 0x6c3   :  { %v4377_v21 = vpack.c.bf16 %v2379_v43, %v2378_v51  ;;  %4316 = vmatprep.subr.bf16.mxu1 %v4315_v44 }
 0x6c5   :  { %4378 = vmatpush3.bf16.msra.mxu0 %v4377_v21 }
 0x6c6   :  { %5095 = vrot.lane.b32.xlu1 %v6557_v39, %s5199_s5  ;;  %4380 = vmatprep.subr.bf16.mxu0 %v4379_v15 }
 0x6c7   :  { %4318 = vmatpush3.bf16.msra.mxu1 %v4317_v32 }
 0x6c8   :  { %4320 = vmatprep.subr.bf16.mxu1 %v4319_v46 }
 0x6c9   :  { %4382 = vmatpush3.bf16.msra.mxu0 %v4381_v7 }
 0x6ca   :  { %5100 = vrot.lane.b32.xlu1 %v5099_v30, %s5188_s23  ;;  %4415 = vmatprep.subr.bf16.mxu0 %v5198_v63 }
 0x6ce   :  { %5105 = vrot.lane.b32.xlu1 %v5104_v42, %s5188_s23 }
 0x6d2   :  { %5110 = vrot.lane.b32.xlu1 %v5109_v14, %s5188_s23 }
 0x6d6   :  { %5115 = vrot.lane.b32.xlu1 %v6557_v39, %s5195_s0 }
 0x6da   :  { %5120 = vrot.lane.b32.xlu1 %v5119_v28, %s5199_s5 }
 0x720   :  { %v5066_v23 = vpop.permute.xlu1 %5065 }
 0x721   :  { %v5067_v47 = vunpack.i.l.bf16 %v5066_v23  ;;  %v5068_v55 = vunpack.i.h.bf16 %v5066_v23  ;;  %v2257_v23 = vld [vmem:[%s7469_s10 + $0x8] sm:$0xff] }
 0x723   :  { %v2034_v8 = vsel %vm1053_vm7, %v2016_v20, %v5067_v47  ;;  %v2276_v47 = vld [vmem:[%s7469_s10 + $0x268] sm:$0xff] }
 0x724   :  { %v5071_v37 = vpop.permute.xlu1 %5070 }
 0x725   :  { %v5073_v6 = vunpack.i.h.bf16 %v5071_v37  ;;  %v5072_v33 = vunpack.i.l.bf16 %v5071_v37 }
 0x728   :  { %v5076_v52 = vpop.permute.xlu1 %5075 }
 0x729   :  { %v5078_v29 = vunpack.i.h.bf16 %v5076_v52  ;;  %v5077_v12 = vunpack.i.l.bf16 %v5076_v52 }
 0x72b   :  { %v2035_v56 = vsel %vm2031_vm1, %v2034_v8, %v5077_v12  ;;  %v2591_v12 = vld [vmem:[%s7471_s12 + $0xa0] sm:$0xff] }
 0x72c   :  { %v5081_v4 = vpop.permute.xlu1 %5080 }
 0x72d   :  { %v5082_v49 = vunpack.i.l.bf16 %v5081_v4  ;;  %v5083_v13 = vunpack.i.h.bf16 %v5081_v4 }
 0x730   :  { %v5086_v11 = vpop.permute.xlu1 %5085 }
 0x731   :  { %v5088_v51 = vunpack.i.h.bf16 %v5086_v11  ;;  %v5087_v43 = vunpack.i.l.bf16 %v5086_v11 }
 0x733   :  { %v2036_v32 = vsel %vm112_vm0, %v2035_v56, %v5087_v43  ;;  %v2264_v43 = vld [vmem:[%s7469_s10 + $0xe8] sm:$0xff]  ;;  %v2594_v56 = vld [vmem:[%s7471_s12 + $0x100] sm:$0xff] }
 0x734   :  { %v5091_v0 = vpop.permute.xlu1 %5090 }
 0x735   :  { %v5093_v39 = vunpack.i.h.bf16 %v5091_v0  ;;  %v5092_v10 = vunpack.i.l.bf16 %v5091_v0 }
 0x737   :  { %v2064_v38 = vsel %vm1053_vm7, %v6490_v60, %v5093_v39  ;;  %v2067_v45 = vsel %vm1053_vm7, %v2050_v2, %v5092_v10  ;;  %v2030_v2 = vsel %vm1053_vm7, %v6433_v58, %v5072_v33  ;;  %v2258_v60 = vld [vmem:[%s7469_s10 + $0x28] sm:$0xff]  ;;  %v2588_v33 = vld [vmem:[%s7471_s12 + $0x40] sm:$0xff] }
 0x738   :  { %v5096_v62 = vpop.permute.xlu1 %5095  ;;  %v2032_v15 = vsel %vm2031_vm1, %v2030_v2, %v5082_v49  ;;  %v2279_v49 = vld [vmem:[%s7469_s10 + $0x2c8] sm:$0xff] }
 0x739   :  { %v5098_v53 = vunpack.i.h.bf16 %v5096_v62  ;;  %v5097_v54 = vunpack.i.l.bf16 %v5096_v62  ;;  %v2033_v58 = vsel %vm112_vm0, %v2032_v15, %v5088_v51  ;;  %v2595_v15 = vld [vmem:[%s7471_s12 + $0x120] sm:$0xff] }
 0x73b   :  { %v2065_v22 = vsel %vm2031_vm1, %v2064_v38, %v5098_v53  ;;  %v2278_v38 = vld [vmem:[%s7469_s10 + $0x2a8] sm:$0xff] }
 0x73c   :  { %v5101_v41 = vpop.permute.xlu1 %5100 }
 0x73d   :  { %v5102_v30 = vunpack.i.l.bf16 %v5101_v41  ;;  %v5103_v9 = vunpack.i.h.bf16 %v5101_v41 }
 0x73f   :  { %v2093_v27 = vsel %vm1053_vm7, %v5102_v30, %v2018_v61  ;;  %v2068_v61 = vsel %vm2031_vm1, %v2067_v45, %v5097_v54  ;;  %v2275_v30 = vld [vmem:[%s7469_s10 + $0x248] sm:$0xff]  ;;  %v4321_v54 = vpack.c.bf16 %v2258_v60, %v2257_v23 }
 0x740   :  { %v5106_v34 = vpop.permute.xlu1 %5105  ;;  %v2094_v59 = vsel %vm2031_vm1, %v2093_v27, %v5068_v55  ;;  %v2069_v19 = vsel %vm112_vm0, %v2068_v61, %v5103_v9  ;;  %v2259_v9 = vld [vmem:[%s7469_s10 + $0x48] sm:$0xff]  ;;  %v4323_v8 = vpack.c.bf16 %v2276_v47, %v2275_v30 }
 0x741   :  { %v5107_v17 = vunpack.i.l.bf16 %v5106_v34  ;;  %v5108_v14 = vunpack.i.h.bf16 %v5106_v34  ;;  %v2095_v48 = vsel %vm112_vm0, %v2094_v59, %v5078_v29  ;;  %v2277_v29 = vld [vmem:[%s7469_s10 + $0x288] sm:$0xff] }
 0x742   :  { %v2131_v7 = vrot.slane %v2095_v48, 6  ;;  %v4327_v61 = vpack.c.bf16 %v2278_v38, %v2277_v29  ;;  %v2262_v59 = vld [vmem:[%s7469_s10 + $0xa8] sm:$0xff]  ;;  %v2475_v29 = vld [vmem:[%s7469_s10 + $0x18] sm:$0xff] }
 0x743   :  { %v2090_v20 = vsel %vm1053_vm7, %v5107_v17, %v2004_v57  ;;  %v2125_v57 = vrot.slane %v2069_v19, 7  ;;  %v2119_v1 = vsel %vm1053_vm7, %v5108_v14, %v2052_v31  ;;  %v2587_v31 = vld [vmem:[%s7471_s12 + $0x20] sm:$0xff]  ;;  %v2280_v19 = vld [vmem:[%s7469_s10 + $0x2e8] sm:$0xff]  ;;  %v2476_v38 = vld [vmem:[%s7469_s10 + $0x38] sm:$0xff] }
 0x744   :  { %v5111_v3 = vpop.permute.xlu1 %5110  ;;  %v2091_v16 = vsel %vm2031_vm1, %v2090_v20, %v5073_v6  ;;  %v2260_v6 = vld [vmem:[%s7469_s10 + $0x68] sm:$0xff]  ;;  %v2590_v20 = vld [vmem:[%s7471_s12 + $0x80] sm:$0xff]  ;;  %v4331_v51 = vpack.c.bf16 %v2280_v19, %v2279_v49 }
 0x745   :  { %v5112_v42 = vunpack.i.l.bf16 %v5111_v3  ;;  %v5113_v26 = vunpack.i.h.bf16 %v5111_v3  ;;  %v2092_v35 = vsel %vm112_vm0, %v2091_v16, %v5083_v13  ;;  %v2142_v4 = vsel %vm2140_vm10, %v2036_v32, %v2125_v57  ;;  %v2589_v3 = vld [vmem:[%s7471_s12 + $0x60] sm:$0xff]  ;;  %v2263_v13 = vld [vmem:[%s7469_s10 + $0xc8] sm:$0xff] }
 0x746   :  { %v2130_v0 = vrot.slane %v2092_v35, 6  ;;  %v2144_v10 = vsel %vm1742_vm9, %v2142_v4, %v2131_v7  ;;  %v4325_v45 = vpack.c.bf16 %v2260_v6, %v2259_v9  ;;  %v6800_v2 = vpack.c.bf16 %v2591_v12, %v2590_v20  ;;  %v2593_v14 = vld [vmem:[%s7471_s12 + $0xe0] sm:$0xff]  ;;  %v2281_v16 = vld [vmem:[%s7469_s10 + $0x308] sm:$0xff]  ;;  %v2491_v9 = vld [vmem:[%s7469_s10 + $0x218] sm:$0xff] }
 0x747   :  { %v2066_v40 = vsel %vm112_vm0, %v2065_v22, %v5112_v42  ;;  %v2116_v25 = vsel %vm1053_vm7, %v5113_v26, %v2038_v5  ;;  %v2586_v5 = vld [vmem:[%s7471_s12] sm:$0xff]  ;;  %v6775_v42 = vpack.c.bf16 %v2589_v3, %v2588_v33  ;;  %v2261_v22 = vld [vmem:[%s7469_s10 + $0x88] sm:$0xff]  ;;  %v4333_v48 = vpack.c.bf16 %v2264_v43, %v2263_v13  ;;  %v2478_v13 = vld [vmem:[%s7469_s10 + $0x78] sm:$0xff] }
 0x748   :  { %v5116_v21 = vpop.permute.xlu1 %5115  ;;  %v2124_v44 = vrot.slane %v2066_v40, 7  ;;  %v6744_v17 = vpack.c.bf16 %v2587_v31, %v2586_v5  ;;  %v4329_v40 = vpack.c.bf16 %v2262_v59, %v2261_v22  ;;  %v2282_v26 = vld [vmem:[%s7469_s10 + $0x328] sm:$0xff]  ;;  %v2598_v31 = vld [vmem:[%s7471_s12 + $0x180] sm:$0xff]  ;;  %v2769_v22 = vld [vmem:[%s7471_s12 + $0x30] sm:$0xff]  ;;  %v4385_v12 = vpack.c.bf16 %v2476_v38, %v2475_v29 }
 0x749   :  { %v5118_v50 = vunpack.i.h.bf16 %v5116_v21  ;;  %v5117_v36 = vunpack.i.l.bf16 %v5116_v21  ;;  %v2592_v21 = vld [vmem:[%s7471_s12 + $0xc0] sm:$0xff]  ;;  %v2284_v32 = vld [vmem:[%s7469_s10 + $0x368] sm:$0xff]  ;;  %v2494_v59 = vld [vmem:[%s7469_s10 + $0x278] sm:$0xff] }
 0x74a   :  { %v2141_v11 = vsel %vm2140_vm10, %v2033_v58, %v2124_v44  ;;  %v6822_v57 = vpack.c.bf16 %v2593_v14, %v2592_v21  ;;  %v2265_v44 = vld [vmem:[%s7469_s10 + $0x108] sm:$0xff]  ;;  %v6935_v20 = vld [vmem:[%s7472_s13] sm:$0x3]  ;;  %v2771_v43 = vld [vmem:[%s7471_s12 + $0x70] sm:$0xff] }
 0x74b   :  { %v2117_v37 = vsel %vm2031_vm1, %v2116_v25, %v5118_v50  ;;  %v2120_v52 = vsel %vm2031_vm1, %v2119_v1, %v5117_v36  ;;  %v2143_v53 = vsel %vm1742_vm9, %v2141_v11, %v2130_v0  ;;  %v4335_v50 = vpack.c.bf16 %v2282_v26, %v2281_v16  ;;  %v2266_v36 = vld [vmem:[%s7469_s10 + $0x128] sm:$0xff]  ;;  %v2599_v0 = vld [vmem:[%s7471_s12 + $0x1a0] sm:$0xff]  ;;  %v2495_v21 = vld [vmem:[%s7469_s10 + $0x298] sm:$0xff] }
 0x74c   :  { %v5121_v24 = vpop.permute.xlu1 %5120  ;;  %v2283_v58 = vld [vmem:[%s7469_s10 + $0x348] sm:$0xff]  ;;  %v4337_v35 = vpack.c.bf16 %v2266_v36, %v2265_v44  ;;  %v6888_v47 = vpack.c.bf16 %v2599_v0, %v2598_v31  ;;  %v2496_v14 = vld [vmem:[%s7469_s10 + $0x2b8] sm:$0xff]  ;;  %v2772_v36 = vld [vmem:[%s7471_s12 + $0x90] sm:$0xff] }
 0x74d   :  { %v5123_v46 = vunpack.i.h.bf16 %v5121_v24  ;;  %v5122_v28 = vunpack.i.l.bf16 %v5121_v24  ;;  %v6844_v24 = vpack.c.bf16 %v2595_v15, %v2594_v56  ;;  %v2267_v7 = vld [vmem:[%s7469_s10 + $0x148] sm:$0xff]  ;;  %v4339_v1 = vpack.c.bf16 %v2284_v32, %v2283_v58  ;;  %v2479_v44 = vld [vmem:[%s7469_s10 + $0x98] sm:$0xff]  ;;  %v2776_v31 = vld [vmem:[%s7471_s12 + $0x110] sm:$0xff] }
 0x74e   :  { %v2268_v25 = vld [vmem:[%s7469_s10 + $0x168] sm:$0xff]  ;;  %v2497_v56 = vld [vmem:[%s7469_s10 + $0x2d8] sm:$0xff]  ;;  %v2777_v0 = vld [vmem:[%s7471_s12 + $0x130] sm:$0xff] }
 0x74f   :  { %v2118_v62 = vsel %vm112_vm0, %v2117_v37, %v5123_v46  ;;  %v2121_v41 = vsel %vm112_vm0, %v2120_v52, %v5122_v28  ;;  %vm5200_vm0 = vmmov 0   ;;  %v2596_v46 = vld [vmem:[%s7471_s12 + $0x140] sm:$0xff]  ;;  %v2285_v23 = vld [vmem:[%s7469_s10 + $0x388] sm:$0xff]  ;;  %v4341_v52 = vpack.c.bf16 %v2268_v25, %v2267_v7  ;;  %v2498_v15 = vld [vmem:[%s7469_s10 + $0x2f8] sm:$0xff] }
 0x750   :  { %v2136_v34 = vrot.slane %v2118_v62, 5  ;;  %v2137_v39 = vrot.slane %v2121_v41, 5  ;;  %v2597_v28 = vld [vmem:[%s7471_s12 + $0x160] sm:$0xff]  ;;  %v2286_v37 = vld [vmem:[%s7469_s10 + $0x3a8] sm:$0xff]  ;;  %v2481_v7 = vld [vmem:[%s7469_s10 + $0xd8] sm:$0xff] }
 0x751   :  { %v6866_v4 = vpack.c.bf16 %v2597_v28, %v2596_v46  ;;  %v2269_v11 = vld [vmem:[%s7469_s10 + $0x188] sm:$0xff]  ;;  %v4343_v60 = vpack.c.bf16 %v2286_v37, %v2285_v23  ;;  %v2774_v25 = vld [vmem:[%s7471_s12 + $0xd0] sm:$0xff]  ;;  %v2499_v28 = vld [vmem:[%s7469_s10 + $0x318] sm:$0xff] }
 0x752   :  { %v6750_v27 = vsel %vm2145_vm11, %v2144_v10, %v2137_v39  ;;  %v6753_v55 = vsel %vm2145_vm11, %v2143_v53, %v2136_v34  ;;  %v2270_v5 = vld [vmem:[%s7469_s10 + $0x1a8] sm:$0xff]  ;;  %v2600_v53 = vld [vmem:[%s7471_s12 + $0x1c0] sm:$0xff]  ;;  %v2775_v46 = vld [vmem:[%s7471_s12 + $0xf0] sm:$0xff] }
 0x753   :  { %2251 = vmatprep.mubr.f32.mxu1 %v6750_v27  ;;  %2469 = vmatprep.mubr.f32.mxu0 %v6750_v27  ;;  %v2287_v62 = vld [vmem:[%s7469_s10 + $0x3c8] sm:$0xff]  ;;  %v4345_v30 = vpack.c.bf16 %v2270_v5, %v2269_v11  ;;  %v2500_v23 = vld [vmem:[%s7469_s10 + $0x338] sm:$0xff] }
 0x754   :  { %2252 = vmatmul.mubr.f32.vlgmr.msra.gmra.mrb[28].mxu1 %v6753_v55  ;;  %2470 = vmatmul.mubr.f32.vlgmr.msra.gmra.mrb[16].mxu0 %v6753_v55  ;;  %v2288_v41 = vld [vmem:[%s7469_s10 + $0x3e8] sm:$0xff]  ;;  %v4399_v11 = vpack.c.bf16 %v2500_v23, %v2499_v28  ;;  %v2484_v5 = vld [vmem:[%s7469_s10 + $0x138] sm:$0xff] }
 0x755   :  { %4322 = vmatpush3.bf16.msra.mxu1 %v4321_v54  ;;  %4417 = vmatpush3.bf16.msra.mxu0 %v6744_v17  ;;  %v2271_v34 = vld [vmem:[%s7469_s10 + $0x1c8] sm:$0xff]  ;;  %v4347_v39 = vpack.c.bf16 %v2288_v41, %v2287_v62  ;;  %v2601_v54 = vld [vmem:[%s7471_s12 + $0x1e0] sm:$0xff]  ;;  %v2501_v62 = vld [vmem:[%s7469_s10 + $0x358] sm:$0xff] }
 0x756   :  { %2360 = vmatprep.mubr.f32.mxu1 %v6750_v27  ;;  %4324 = vmatprep.subr.bf16.mxu1 %v4323_v8  ;;  %v2272_v10 = vld [vmem:[%s7469_s10 + $0x1e8] sm:$0xff]  ;;  %v2492_v8 = vld [vmem:[%s7469_s10 + $0x238] sm:$0xff]  ;;  %v6910_v33 = vpack.c.bf16 %v2601_v54, %v2600_v53  ;;  %v2778_v54 = vld [vmem:[%s7471_s12 + $0x150] sm:$0xff] }
 0x757   :  { %4418 = vmatprep.subr.bf16.mxu0 %v5198_v63  ;;  %3791 = vmatprep.mubr.msk.f32.mxu0 %vm5200_vm0, %v7528_v18  ;;  %v4349_v6 = vpack.c.bf16 %v2272_v10, %v2271_v34  ;;  %v4383_v3 = vpack.c.bf16 %v2492_v8, %v2491_v9  ;;  %v2502_v41 = vld [vmem:[%s7469_s10 + $0x378] sm:$0xff]  ;;  %v7030_v34 = vpack.c.bf16 %v2777_v0, %v2776_v31  ;;  %v2779_v9 = vld [vmem:[%s7471_s12 + $0x170] sm:$0xff]  ;;  %v2686_v28 = vld [vmem:[%s7471_s12 + $0x128] sm:$0xff] }
 0x758   :  { %v2485_v10 = vld [vmem:[%s7469_s10 + $0x158] sm:$0xff]  ;;  %v7052_v29 = vpack.c.bf16 %v2779_v9, %v2778_v54  ;;  %v2687_v23 = vld [vmem:[%s7471_s12 + $0x148] sm:$0xff] }
 0x759   :  { %4326 = vmatpush3.bf16.msra.mxu1 %v4325_v45  ;;  %4420 = vmatpush3.bf16.msra.mxu0 %v6775_v42  ;;  %v2768_v45 = vld [vmem:[%s7471_s12 + $0x10] sm:$0xff]  ;;  %v2486_v53 = vld [vmem:[%s7469_s10 + $0x178] sm:$0xff]  ;;  %v2692_v31 = vld [vmem:[%s7471_s12 + $0x1e8] sm:$0xff] }
 0x75a   :  { %4328 = vmatprep.subr.bf16.mxu1 %v4327_v61  ;;  %4421 = vmatprep.subr.bf16.mxu0 %v5198_v63  ;;  %v2493_v61 = vld [vmem:[%s7469_s10 + $0x258] sm:$0xff]  ;;  %v6938_v49 = vpack.c.bf16 %v2769_v22, %v2768_v45 }
 0x75b   :  { %v4387_v19 = vpack.c.bf16 %v2494_v59, %v2493_v61  ;;  %v2503_v8 = vld [vmem:[%s7469_s10 + $0x398] sm:$0xff]  ;;  %v2780_v61 = vld [vmem:[%s7471_s12 + $0x190] sm:$0xff] }
 0x75c   :  { %v2487_v45 = vld [vmem:[%s7469_s10 + $0x198] sm:$0xff]  ;;  %v2781_v59 = vld [vmem:[%s7471_s12 + $0x1b0] sm:$0xff] }
 0x75d   :  { %4330 = vmatpush3.bf16.msra.mxu1 %v4329_v40  ;;  %4423 = vmatpush3.bf16.msra.mxu0 %v6800_v2  ;;  %v2477_v40 = vld [vmem:[%s7469_s10 + $0x58] sm:$0xff] }
 0x75e   :  { %4332 = vmatprep.subr.bf16.mxu1 %v4331_v51  ;;  %4424 = vmatprep.subr.bf16.mxu0 %v5198_v63  ;;  %v2770_v51 = vld [vmem:[%s7471_s12 + $0x50] sm:$0xff]  ;;  %v4389_v16 = vpack.c.bf16 %v2478_v13, %v2477_v40  ;;  %v2488_v22 = vld [vmem:[%s7469_s10 + $0x1b8] sm:$0xff]  ;;  %v7074_v13 = vpack.c.bf16 %v2781_v59, %v2780_v61 }
 0x75f   :  { %v6962_v26 = vpack.c.bf16 %v2771_v43, %v2770_v51  ;;  %v4409_v40 = vpack.c.bf16 %v2488_v22, %v2487_v45  ;;  %v2489_v43 = vld [vmem:[%s7469_s10 + $0x1d8] sm:$0xff] }
 0x760   :  { %v2856_v0 = vld [vmem:[%s7471_s12 + $0x18] sm:$0xff] }
 0x761   :  { %4334 = vmatpush3.bf16.msra.mxu1 %v4333_v48  ;;  %4426 = vmatpush3.bf16.msra.mxu0 %v6822_v57  ;;  %v4391_v48 = vpack.c.bf16 %v2496_v14, %v2495_v21  ;;  %v2490_v21 = vld [vmem:[%s7469_s10 + $0x1f8] sm:$0xff]  ;;  %v2782_v14 = vld [vmem:[%s7471_s12 + $0x1d0] sm:$0xff] }
 0x762   :  { %4336 = vmatprep.subr.bf16.mxu1 %v4335_v50  ;;  %4427 = vmatprep.subr.bf16.mxu0 %v5198_v63  ;;  %v2480_v50 = vld [vmem:[%s7469_s10 + $0xb8] sm:$0xff] }
 0x763   :  { %v4393_v58 = vpack.c.bf16 %v2480_v50, %v2479_v44  ;;  %v2677_v50 = vld [vmem:[%s7471_s12 + $0x8] sm:$0xff]  ;;  %v2863_v54 = vld [vmem:[%s7471_s12 + $0xf8] sm:$0xff] }
 0x764   :  { %v2867_v45 = vld [vmem:[%s7471_s12 + $0x178] sm:$0xff] }
 0x765   :  { %4338 = vmatpush3.bf16.msra.mxu1 %v4337_v35  ;;  %4429 = vmatpush3.bf16.msra.mxu0 %v6844_v24  ;;  %v4395_v35 = vpack.c.bf16 %v2498_v15, %v2497_v56  ;;  %v2679_v56 = vld [vmem:[%s7471_s12 + $0x48] sm:$0xff]  ;;  %v2868_v61 = vld [vmem:[%s7471_s12 + $0x198] sm:$0xff] }
 0x766   :  { %4340 = vmatprep.subr.bf16.mxu1 %v4339_v1  ;;  %4430 = vmatprep.subr.bf16.mxu0 %v5198_v63  ;;  %v2482_v1 = vld [vmem:[%s7469_s10 + $0xf8] sm:$0xff]  ;;  %v2680_v15 = vld [vmem:[%s7471_s12 + $0x68] sm:$0xff] }
 0x767   :  { %v4397_v37 = vpack.c.bf16 %v2482_v1, %v2481_v7  ;;  %v2682_v7 = vld [vmem:[%s7471_s12 + $0xa8] sm:$0xff]  ;;  %v2869_v59 = vld [vmem:[%s7471_s12 + $0x1b8] sm:$0xff] }
 0x768   :  { %v2683_v1 = vld [vmem:[%s7471_s12 + $0xc8] sm:$0xff] }
 0x769   :  { %4342 = vmatpush3.bf16.msra.mxu1 %v4341_v52  ;;  %4432 = vmatpush3.bf16.msra.mxu0 %v6866_v4  ;;  %v7008_v52 = vpack.c.bf16 %v2775_v46, %v2774_v25  ;;  %v2684_v25 = vld [vmem:[%s7471_s12 + $0xe8] sm:$0xff] }
 0x76a   :  { %4344 = vmatprep.subr.bf16.mxu1 %v4343_v60  ;;  %4433 = vmatprep.subr.bf16.mxu0 %v5198_v63  ;;  %v2483_v60 = vld [vmem:[%s7469_s10 + $0x118] sm:$0xff]  ;;  %v2685_v46 = vld [vmem:[%s7471_s12 + $0x108] sm:$0xff] }
 0x76d   :  { %4346 = vmatpush3.bf16.msra.mxu1 %v4345_v30  ;;  %4435 = vmatpush3.bf16.msra.mxu0 %v6888_v47  ;;  %v4401_v30 = vpack.c.bf16 %v2484_v5, %v2483_v60  ;;  %v2690_v60 = vld [vmem:[%s7471_s12 + $0x1a8] sm:$0xff] }
 0x76e   :  { %4348 = vmatprep.subr.bf16.mxu1 %v4347_v39  ;;  %4436 = vmatprep.subr.bf16.mxu0 %v5198_v63  ;;  %v4403_v39 = vpack.c.bf16 %v2502_v41, %v2501_v62  ;;  %v2691_v5 = vld [vmem:[%s7471_s12 + $0x1c8] sm:$0xff]  ;;  %v2857_v62 = vld [vmem:[%s7471_s12 + $0x38] sm:$0xff] }
 0x76f   :  { %v2858_v41 = vld [vmem:[%s7471_s12 + $0x58] sm:$0xff] }
 0x771   :  { %4350 = vmatpush3.bf16.msra.mxu1 %v4349_v6  ;;  %4438 = vmatpush3.bf16.msra.mxu0 %v6910_v33  ;;  %v2504_v6 = vld [vmem:[%s7469_s10 + $0x3b8] sm:$0xff] }
 0x772   :  { %4384 = vmatprep.subr.bf16.mxu1 %v4383_v3  ;;  %4463 = vmatprep.subr.bf16.mxu0 %v5198_v63  ;;  %v4405_v3 = vpack.c.bf16 %v2486_v53, %v2485_v10  ;;  %v4407_v38 = vpack.c.bf16 %v2504_v6, %v2503_v8  ;;  %v2862_v53 = vld [vmem:[%s7471_s12 + $0xd8] sm:$0xff] }
 0x773   :  { %v7236_v9 = vpack.c.bf16 %v2863_v54, %v2862_v53  ;;  %v2864_v8 = vld [vmem:[%s7471_s12 + $0x118] sm:$0xff]  ;;  %v2585_v53 = vld [vmem:[%s7473_s14] sm:$0x3] }
 0x774   :  { %2361 = vmatmul.mubr.f32.vlgmr.msra.gmra.mrb[30].mxu1 %v6753_v55  ;;  %3792 = vmatmul.mubr.f32.vlgmr.msra.gmra.mrb[18].mxu0 %v6935_v20  ;;  %v2865_v6 = vld [vmem:[%s7471_s12 + $0x138] sm:$0xff] }
 0x775   :  { %4386 = vmatpush3.bf16.msra.mxu1 %v4385_v12  ;;  %2578 = vmatprep.mubr.f32.mxu1 %v6750_v27  ;;  %v2773_v27 = vld [vmem:[%s7471_s12 + $0xb0] sm:$0xff]  ;;  %v2505_v12 = vld [vmem:[%s7469_s10 + $0x3d8] sm:$0xff] }
 0x776   :  { %4465 = vmatpush3.bf16.msra.mxu0 %v6938_v49  ;;  %4388 = vmatprep.subr.bf16.mxu1 %v4387_v19  ;;  %v6986_v32 = vpack.c.bf16 %v2773_v27, %v2772_v36  ;;  %v2506_v19 = vld [vmem:[%s7469_s10 + $0x3f8] sm:$0xff]  ;;  %v2678_v36 = vld [vmem:[%s7471_s12 + $0x28] sm:$0xff] }
 0x777   :  { %4466 = vmatprep.subr.bf16.mxu0 %v5198_v63  ;;  %3861 = vmatprep.mubr.msk.f32.mxu0 %vm5200_vm0, %v7528_v18  ;;  %v4411_v51 = vpack.c.bf16 %v2506_v19, %v2505_v12  ;;  %v7099_v27 = vpack.c.bf16 %v2678_v36, %v2677_v50  ;;  %v7266_v12 = vpack.c.bf16 %v2869_v59, %v2868_v61  ;;  %v2870_v19 = vld [vmem:[%s7471_s12 + $0x1d8] sm:$0xff] }
 0x779   :  { %4390 = vmatpush3.bf16.msra.mxu1 %v4389_v16  ;;  %v2783_v16 = vld [vmem:[%s7471_s12 + $0x1f0] sm:$0xff] }
 0x77a   :  { %4468 = vmatpush3.bf16.msra.mxu0 %v6962_v26  ;;  %4392 = vmatprep.subr.bf16.mxu1 %v4391_v48  ;;  %v4413_v48 = vpack.c.bf16 %v2490_v21, %v2489_v43  ;;  %v7090_v44 = vpack.c.bf16 %v2783_v16, %v2782_v14 }
 0x77b   :  { %4469 = vmatprep.subr.bf16.mxu0 %v5198_v63 }
 0x77d   :  { %4394 = vmatpush3.bf16.msra.mxu1 %v4393_v58  ;;  %v7113_v58 = vpack.c.bf16 %v2680_v15, %v2679_v56 }
 0x77e   :  { %4471 = vmatpush3.bf16.msra.mxu0 %v6986_v32  ;;  %4396 = vmatprep.subr.bf16.mxu1 %v4395_v35  ;;  %v2681_v35 = vld [vmem:[%s7471_s12 + $0x88] sm:$0xff] }
 0x77f   :  { %4472 = vmatprep.subr.bf16.mxu0 %v5198_v63 }
 0x781   :  { %4398 = vmatpush3.bf16.msra.mxu1 %v4397_v37  ;;  %v2688_v37 = vld [vmem:[%s7471_s12 + $0x168] sm:$0xff] }
 0x782   :  { %4474 = vmatpush3.bf16.msra.mxu0 %v7008_v52  ;;  %4400 = vmatprep.subr.bf16.mxu1 %v4399_v11  ;;  %v2689_v11 = vld [vmem:[%s7471_s12 + $0x188] sm:$0xff] }
 0x783   :  { %4475 = vmatprep.subr.bf16.mxu0 %v5198_v63 }
 0x785   :  { %4402 = vmatpush3.bf16.msra.mxu1 %v4401_v30  ;;  %v2859_v30 = vld [vmem:[%s7471_s12 + $0x78] sm:$0xff] }
 0x786   :  { %4477 = vmatpush3.bf16.msra.mxu0 %v7030_v34  ;;  %4404 = vmatprep.subr.bf16.mxu1 %v4403_v39  ;;  %v2860_v39 = vld [vmem:[%s7471_s12 + $0x98] sm:$0xff] }
 0x787   :  { %4478 = vmatprep.subr.bf16.mxu0 %v5198_v63 }
 0x789   :  { %4406 = vmatpush3.bf16.msra.mxu1 %v4405_v3  ;;  %v7246_v3 = vpack.c.bf16 %v2865_v6, %v2864_v8 }
 0x78a   :  { %4480 = vmatpush3.bf16.msra.mxu0 %v7052_v29  ;;  %4408 = vmatprep.subr.bf16.mxu1 %v4407_v38  ;;  %v2866_v38 = vld [vmem:[%s7471_s12 + $0x158] sm:$0xff] }
 0x78b   :  { %4481 = vmatprep.subr.bf16.mxu0 %v5198_v63  ;;  %v7256_v22 = vpack.c.bf16 %v2867_v45, %v2866_v38  ;;  %v3464_v38 = vld [vmem:[%s7470_s11 + $0x3] ss:$0 sm:$0xff] }
 0x78d   :  { %4410 = vmatpush3.bf16.msra.mxu1 %v4409_v40  ;;  %v2871_v40 = vld [vmem:[%s7471_s12 + $0x1f8] sm:$0xff] }
 0x78e   :  { %4483 = vmatpush3.bf16.msra.mxu0 %v7074_v13  ;;  %4412 = vmatprep.subr.bf16.mxu1 %v4411_v51  ;;  %v7276_v51 = vpack.c.bf16 %v2871_v40, %v2870_v19 }
 0x78f   :  { %4484 = vmatprep.subr.bf16.mxu0 %v5198_v63 }
 0x791   :  { %4414 = vmatpush3.bf16.msra.mxu1 %v4413_v48 }
 0x792   :  { %4486 = vmatpush3.bf16.msra.mxu0 %v7090_v44  ;;  %4439 = vmatprep.subr.bf16.mxu1 %v5198_v63 }
 0x793   :  { %4511 = vmatprep.subr.bf16.mxu0 %v5198_v63 }
 0x794   :  { %2579 = vmatmul.mubr.f32.vlgmr.msra.gmra.mrb[32].mxu1 %v6753_v55  ;;  %v7129_v55 = vpack.c.bf16 %v2682_v7, %v2681_v35 }
 0x795   :  { %3862 = vmatmul.mubr.f32.vlgmr.msra.gmra.mrb[20].mxu0 %v6935_v20  ;;  %4441 = vmatpush3.bf16.msra.mxu1 %v7099_v27 }
 0x796   :  { %4442 = vmatprep.subr.bf16.mxu1 %v5198_v63  ;;  %3826 = vmatprep.mubr.msk.f32.mxu1 %vm5200_vm0, %v7528_v18 }
 0x797   :  { %4513 = vmatpush3.bf16.msra.mxu0 %v6744_v17  ;;  %3931 = vmatprep.mubr.msk.f32.mxu0 %vm5200_vm0, %v7528_v18  ;;  %v7141_v17 = vpack.c.bf16 %v2684_v25, %v2683_v1  ;;  %v3463_v1 = vld [vmem:[%s7470_s11 + $0x2] ss:$0 sm:$0xff] }
 0x798   :  { %4514 = vmatprep.subr.bf16.mxu0 %v5198_v63 }
 0x799   :  { %4444 = vmatpush3.bf16.msra.mxu1 %v7113_v58 }
 0x79a   :  { %4445 = vmatprep.subr.bf16.mxu1 %v5198_v63 }
 0x79b   :  { %4516 = vmatpush3.bf16.msra.mxu0 %v6775_v42  ;;  %v7153_v42 = vpack.c.bf16 %v2686_v28, %v2685_v46 }
 0x79c   :  { %4517 = vmatprep.subr.bf16.mxu0 %v5198_v63 }
 0x79d   :  { %4447 = vmatpush3.bf16.msra.mxu1 %v7129_v55 }
 0x79e   :  { %4448 = vmatprep.subr.bf16.mxu1 %v5198_v63 }
 0x79f   :  { %4519 = vmatpush3.bf16.msra.mxu0 %v6800_v2  ;;  %v7165_v2 = vpack.c.bf16 %v2688_v37, %v2687_v23 }
 0x7a0   :  { %4520 = vmatprep.subr.bf16.mxu0 %v5198_v63 }
 0x7a1   :  { %4450 = vmatpush3.bf16.msra.mxu1 %v7141_v17 }
 0x7a2   :  { %4451 = vmatprep.subr.bf16.mxu1 %v5198_v63 }
 0x7a3   :  { %4522 = vmatpush3.bf16.msra.mxu0 %v6822_v57  ;;  %v7177_v57 = vpack.c.bf16 %v2690_v60, %v2689_v11 }
 0x7a4   :  { %4523 = vmatprep.subr.bf16.mxu0 %v5198_v63 }
 0x7a5   :  { %4453 = vmatpush3.bf16.msra.mxu1 %v7153_v42 }
 0x7a6   :  { %4454 = vmatprep.subr.bf16.mxu1 %v5198_v63 }
 0x7a7   :  { %4525 = vmatpush3.bf16.msra.mxu0 %v6844_v24  ;;  %v7189_v24 = vpack.c.bf16 %v2692_v31, %v2691_v5  ;;  %v3462_v31 = vld [vmem:[%s7470_s11 + $0x1] ss:$0 sm:$0xff] }
 0x7a8   :  { %4526 = vmatprep.subr.bf16.mxu0 %v5198_v63 }
 0x7a9   :  { %4456 = vmatpush3.bf16.msra.mxu1 %v7165_v2 }
 0x7aa   :  { %4457 = vmatprep.subr.bf16.mxu1 %v5198_v63 }
 0x7ab   :  { %4528 = vmatpush3.bf16.msra.mxu0 %v6866_v4  ;;  %v7201_v4 = vpack.c.bf16 %v2857_v62, %v2856_v0 }
 0x7ac   :  { %4529 = vmatprep.subr.bf16.mxu0 %v5198_v63 }
 0x7ad   :  { %4459 = vmatpush3.bf16.msra.mxu1 %v7177_v57 }
 0x7ae   :  { %4460 = vmatprep.subr.bf16.mxu1 %v5198_v63 }
 0x7af   :  { %4531 = vmatpush3.bf16.msra.mxu0 %v6888_v47  ;;  %v7214_v47 = vpack.c.bf16 %v2859_v30, %v2858_v41 }
 0x7b0   :  { %4532 = vmatprep.subr.bf16.mxu0 %v5198_v63 }
 0x7b1   :  { %4462 = vmatpush3.bf16.msra.mxu1 %v7189_v24 }
 0x7b2   :  { %4487 = vmatprep.subr.bf16.mxu1 %v5198_v63 }
 0x7b3   :  { %4534 = vmatpush3.bf16.msra.mxu0 %v6910_v33  ;;  %v2861_v33 = vld [vmem:[%s7471_s12 + $0xb8] sm:$0xff] }
 0x7b4   :  { %3827 = vmatmul.mubr.f32.vlgmr.msra.gmra.mrb[34].mxu1 %v6935_v20  ;;  %4559 = vmatprep.subr.bf16.mxu0 %v5198_v63  ;;  %v7226_v10 = vpack.c.bf16 %v2861_v33, %v2860_v39 }
 0x7b5   :  { %4489 = vmatpush3.bf16.msra.mxu1 %v7201_v4  ;;  %3896 = vmatprep.mubr.msk.f32.mxu1 %vm5200_vm0, %v7528_v18 }
 0x7b6   :  { %4490 = vmatprep.subr.bf16.mxu1 %v5198_v63 }
 0x7b9   :  { %4492 = vmatpush3.bf16.msra.mxu1 %v7214_v47 }
 0x7ba   :  { %4493 = vmatprep.subr.bf16.mxu1 %v5198_v63 }
 0x7bd   :  { %4495 = vmatpush3.bf16.msra.mxu1 %v7226_v10 }
 0x7be   :  { %4496 = vmatprep.subr.bf16.mxu1 %v5198_v63 }
 0x7c1   :  { %4498 = vmatpush3.bf16.msra.mxu1 %v7236_v9 }
 0x7c2   :  { %4499 = vmatprep.subr.bf16.mxu1 %v5198_v63 }
 0x7c5   :  { %4501 = vmatpush3.bf16.msra.mxu1 %v7246_v3 }
 0x7c6   :  { %4502 = vmatprep.subr.bf16.mxu1 %v5198_v63 }
 0x7c9   :  { %4504 = vmatpush3.bf16.msra.mxu1 %v7256_v22 }
 0x7ca   :  { %4505 = vmatprep.subr.bf16.mxu1 %v5198_v63 }
 0x7cd   :  { %4507 = vmatpush3.bf16.msra.mxu1 %v7266_v12 }
 0x7ce   :  { %4508 = vmatprep.subr.bf16.mxu1 %v5198_v63 }
 0x7d1   :  { %4510 = vmatpush3.bf16.msra.mxu1 %v7276_v51 }
 0x7d2   :  { %4535 = vmatprep.subr.bf16.mxu1 %v5198_v63 }
 0x7d4   :  { %3897 = vmatmul.mubr.f32.vlgmr.msra.gmra.mrb[36].mxu1 %v6935_v20 }
 0x7d5   :  { %4537 = vmatpush3.bf16.msra.mxu1 %v7099_v27  ;;  %3966 = vmatprep.mubr.msk.f32.mxu1 %vm5200_vm0, %v7528_v18 }
 0x7d6   :  { %4538 = vmatprep.subr.bf16.mxu1 %v5198_v63 }
 0x7d9   :  { %4540 = vmatpush3.bf16.msra.mxu1 %v7113_v58  ;;  %v3461_v58 = vld [vmem:[%s7470_s11] ss:$0 sm:$0xff] }
 0x7da   :  { %4541 = vmatprep.subr.bf16.mxu1 %v5198_v63 }
 0x7dd   :  { %4543 = vmatpush3.bf16.msra.mxu1 %v7129_v55 }
 0x7de   :  { %4544 = vmatprep.subr.bf16.mxu1 %v5198_v63 }
 0x7e1   :  { %4546 = vmatpush3.bf16.msra.mxu1 %v7141_v17 }
 0x7e2   :  { %4547 = vmatprep.subr.bf16.mxu1 %v5198_v63 }
 0x7e5   :  { %4549 = vmatpush3.bf16.msra.mxu1 %v7153_v42 }
 0x7e6   :  { %4550 = vmatprep.subr.bf16.mxu1 %v5198_v63 }
 0x7e9   :  { %4552 = vmatpush3.bf16.msra.mxu1 %v7165_v2 }
 0x7ea   :  { %4553 = vmatprep.subr.bf16.mxu1 %v5198_v63 }
 0x7ed   :  { %4555 = vmatpush3.bf16.msra.mxu1 %v7177_v57 }
 0x7ee   :  { %4556 = vmatprep.subr.bf16.mxu1 %v5198_v63 }
 0x7f1   :  { %4558 = vmatpush3.bf16.msra.mxu1 %v7189_v24 }
 0x7f2   :  { %4583 = vmatprep.subr.bf16.mxu1 %v5198_v63 }
 0x827   :  { %v3498_v20 = vpop.f32.mrb[28].mxu1  ;;  %v3568_v43 = vpop.f32.mrb[16].mxu0 }
 0x828   :  { %v3499_v21 = vpop.f32.mrb[29].mxu1  ;;  %v3569_v14 = vpop.f32.mrb[17].mxu0 }
 0x829   :  { %v3500_v16 = vadd.f32 %v3499_v21, %v3498_v20  ;;  %v3570_v48 = vadd.f32 %v3569_v14, %v3568_v43 }
 0x82b   :  { %v7303_v35 = vadd.f32 %v3500_v16, %v3461_v58  ;;  %v7309_v17 = vadd.f32 %v3570_v48, %v3463_v1 }
 0x847   :  { %v3533_v50 = vpop.f32.mrb[30].mxu1  ;;  %v2668_v36 = vpop.f32.mrb[18].mxu0 }
 0x848   :  { %v3534_v27 = vpop.f32.mrb[31].mxu1  ;;  %v3793_v56 = vpop.f32.mrb[19].mxu0  ;;  %v2672_v7 = vadd.f32 %v2668_v36, %v7303_v35  ;;  %v3292_v36 = vld [vmem:[%s7474_s15 + $0x68] sm:$0xff] }
 0x849   :  { %v3535_v15 = vadd.f32 %v3534_v27, %v3533_v50  ;;  %v3291_v50 = vld [vmem:[%s7474_s15 + $0x60] sm:$0xff]  ;;  %v3293_v56 = vld [vmem:[%s7474_s15 + $0x70] sm:$0xff] }
 0x84a   :  { %v2673_v55 = vmul.f32 0.5, %v2672_v7  ;;  %v4626_v27 = vpack.c.bf16 %v3292_v36, %v3291_v50 }
 0x84b   :  { %v7315_v24 = vadd.f32 %v3535_v15, %v3462_v31  ;;  %v3294_v15 = vld [vmem:[%s7474_s15 + $0x78] sm:$0xff] }
 0x84c   :  { %5124 = vtanh.f32 %v2673_v55  ;;  %v4629_v58 = vpack.c.bf16 %v3294_v15, %v3293_v56 }
 0x856   :  { %v5125_v2 = vpop.eup %5124 }
 0x857   :  { %v2675_v11 = vadd.f32 1.0, %v5125_v2 }
 0x859   :  { %v2676_v60 = vmul.f32 0.5, %v2675_v11 }
 0x867   :  { %v3603_v25 = vpop.f32.mrb[32].mxu1 }
 0x868   :  { %v2850_v46 = vpop.f32.mrb[20].mxu0  ;;  %v3604_v28 = vpop.f32.mrb[33].mxu1 }
 0x869   :  { %v2854_v42 = vadd.f32 %v2850_v46, %v7309_v17  ;;  %v3605_v23 = vadd.f32 %v3604_v28, %v3603_v25  ;;  %v3863_v37 = vpop.f32.mrb[21].mxu0 }
 0x86b   :  { %5126 = vtanh.f32 %v2854_v42  ;;  %v7326_v45 = vadd.f32 %v3605_v23, %v3464_v38 }
 0x875   :  { %v5127_v57 = vpop.eup %5126 }
 0x876   :  { %v2948_v5 = vmul.f32 %v5127_v57, %v2676_v60 }
 0x887   :  { %v2759_v0 = vpop.f32.mrb[34].mxu1 }
 0x888   :  { %v2763_v62 = vadd.f32 %v2759_v0, %v7315_v24  ;;  %v3828_v41 = vpop.f32.mrb[35].mxu1 }
 0x88a   :  { %v2764_v30 = vmul.f32 0.5, %v2763_v62 }
 0x88c   :  { %5128 = vtanh.f32 %v2764_v30 }
 0x896   :  { %v5129_v39 = vpop.eup %5128 }
 0x897   :  { %v2766_v33 = vadd.f32 1.0, %v5129_v39 }
 0x899   :  { %v2767_v54 = vmul.f32 0.5, %v2766_v33 }
 0x89b   :  { %v2947_v8 = vmul.f32 %v2767_v54, %v2585_v53 }
 0x89d   :  { %v7321_v6 = vadd.f32 %v2948_v5, %v2947_v8 }
 0x89f   :  { %v3262_v57 = vrot.slane %v7321_v6, 6 }
 0x8a7   :  { %v2938_v61 = vpop.f32.mrb[36].mxu1 }
 0x8a8   :  { %v2942_v59 = vadd.f32 %v2938_v61, %v7326_v45  ;;  %v3898_v19 = vpop.f32.mrb[37].mxu1 }
 0x8aa   :  { %v2943_v40 = vmul.f32 0.5, %v2942_v59 }
 0x8ac   :  { %5130 = vtanh.f32 %v2943_v40 }
 0x8ad   :  { %5132 = vtanh.f32 %v7321_v6 }
 0x8b6   :  { %v5131_v20 = vpop.eup %5130 }
 0x8b7   :  { %v2945_v43 = vadd.f32 1.0, %v5131_v20  ;;  %v5133_v14 = vpop.eup %5132 }
 0x8b9   :  { %v2946_v21 = vmul.f32 0.5, %v2945_v43 }
 0x8bb   :  { %v7330_v16 = vmul.f32 %v5133_v14, %v2946_v21 }
 0x8bd   :  { %3932 = vmatmul.mubr.f32.vlgmr.msra.gmra.mrb[22].mxu0 %v7330_v16  ;;  %3967 = vmatmul.mubr.f32.vlgmr.msra.gmra.mrb[38].mxu1 %v7330_v16  ;;  %v3273_v43 = vrot.slane %v7330_v16, 7 }
 0x8be   :  { %4561 = vmatpush3.bf16.msra.mxu0 %v6938_v49  ;;  %4585 = vmatpush3.bf16.msra.mxu1 %v7201_v4  ;;  %v3279_v49 = vld [vmem:[%s7474_s15] sm:$0xff]  ;;  %v3285_v4 = vld [vmem:[%s7474_s15 + $0x30] sm:$0xff] }
 0x8bf   :  { %4562 = vmatprep.subr.bf16.mxu0 %v5198_v63  ;;  %4586 = vmatprep.subr.bf16.mxu1 %v5198_v63 }
 0x8c0   :  { %4001 = vmatprep.mubr.msk.f32.mxu0 %vm5200_vm0, %v7528_v18  ;;  %4036 = vmatprep.mubr.msk.f32.mxu1 %vm5200_vm0, %v7528_v18 }
 0x8c2   :  { %4564 = vmatpush3.bf16.msra.mxu0 %v6962_v26  ;;  %4588 = vmatpush3.bf16.msra.mxu1 %v7214_v47  ;;  %v3280_v26 = vld [vmem:[%s7474_s15 + $0x8] sm:$0xff]  ;;  %v3286_v47 = vld [vmem:[%s7474_s15 + $0x38] sm:$0xff] }
 0x8c3   :  { %4565 = vmatprep.subr.bf16.mxu0 %v5198_v63  ;;  %4589 = vmatprep.subr.bf16.mxu1 %v5198_v63 }
 0x8c6   :  { %4567 = vmatpush3.bf16.msra.mxu0 %v6986_v32  ;;  %4591 = vmatpush3.bf16.msra.mxu1 %v7226_v10  ;;  %v4608_v32 = vpack.c.bf16 %v3280_v26, %v3279_v49  ;;  %v4617_v10 = vpack.c.bf16 %v3286_v47, %v3285_v4 }
 0x8c7   :  { %4568 = vmatprep.subr.bf16.mxu0 %v5198_v63  ;;  %4592 = vmatprep.subr.bf16.mxu1 %v5198_v63 }
 0x8ca   :  { %4570 = vmatpush3.bf16.msra.mxu0 %v7008_v52  ;;  %4594 = vmatpush3.bf16.msra.mxu1 %v7236_v9  ;;  %v3281_v52 = vld [vmem:[%s7474_s15 + $0x10] sm:$0xff]  ;;  %v3287_v9 = vld [vmem:[%s7474_s15 + $0x40] sm:$0xff] }
 0x8cb   :  { %4571 = vmatprep.subr.bf16.mxu0 %v5198_v63  ;;  %4595 = vmatprep.subr.bf16.mxu1 %v5198_v63 }
 0x8ce   :  { %4573 = vmatpush3.bf16.msra.mxu0 %v7030_v34  ;;  %4597 = vmatpush3.bf16.msra.mxu1 %v7246_v3  ;;  %v3288_v3 = vld [vmem:[%s7474_s15 + $0x48] sm:$0xff] }
 0x8cf   :  { %4574 = vmatprep.subr.bf16.mxu0 %v5198_v63  ;;  %4598 = vmatprep.subr.bf16.mxu1 %v5198_v63 }
 0x8d2   :  { %4576 = vmatpush3.bf16.msra.mxu0 %v7052_v29  ;;  %4600 = vmatpush3.bf16.msra.mxu1 %v7256_v22  ;;  %v3283_v29 = vld [vmem:[%s7474_s15 + $0x20] sm:$0xff]  ;;  %v4620_v22 = vpack.c.bf16 %v3288_v3, %v3287_v9 }
 0x8d3   :  { %4577 = vmatprep.subr.bf16.mxu0 %v5198_v63  ;;  %4601 = vmatprep.subr.bf16.mxu1 %v5198_v63 }
 0x8d6   :  { %4579 = vmatpush3.bf16.msra.mxu0 %v7074_v13  ;;  %4603 = vmatpush3.bf16.msra.mxu1 %v7266_v12  ;;  %v3284_v13 = vld [vmem:[%s7474_s15 + $0x28] sm:$0xff]  ;;  %v3289_v12 = vld [vmem:[%s7474_s15 + $0x50] sm:$0xff] }
 0x8d7   :  { %4580 = vmatprep.subr.bf16.mxu0 %v5198_v63  ;;  %4604 = vmatprep.subr.bf16.mxu1 %v5198_v63 }
 0x8da   :  { %4582 = vmatpush3.bf16.msra.mxu0 %v7090_v44  ;;  %4606 = vmatpush3.bf16.msra.mxu1 %v7276_v51  ;;  %v4614_v44 = vpack.c.bf16 %v3284_v13, %v3283_v29  ;;  %v3290_v51 = vld [vmem:[%s7474_s15 + $0x58] sm:$0xff] }
 0x8db   :  { %4607 = vmatprep.subr.bf16.mxu0 %v5198_v63  ;;  %v4623_v48 = vpack.c.bf16 %v3290_v51, %v3289_v12 }
 0x8dd   :  { %4002 = vmatmul.mubr.f32.vlgmr.msra.gmra.mrb[24].mxu0 %v7330_v16  ;;  %4037 = vmatmul.mubr.f32.vlgmr.msra.gmra.mrb[40].mxu1 %v7330_v16 }
 0x8de   :  { %4071 = vmatprep.mubr.msk.f32.mxu0 %vm5200_vm0, %v7528_v18  ;;  %4609 = vmatpush3.bf16.msra.mxu0 %v4608_v32  ;;  %v3282_v18 = vld [vmem:[%s7474_s15 + $0x18] sm:$0xff]  ;;  %v3465_v32 = vld [vmem:[%s7475_s16] ss:$0 sm:$0xff] }
 0x8df   :  { %4610 = vmatprep.subr.bf16.mxu0 %v5198_v63  ;;  %v4611_v34 = vpack.c.bf16 %v3282_v18, %v3281_v52 }
 0x8e2   :  { %4612 = vmatpush3.bf16.msra.mxu0 %v4611_v34 }
 0x8e3   :  { %4613 = vmatprep.subr.bf16.mxu0 %v5198_v63 }
 0x8e6   :  { %4615 = vmatpush3.bf16.msra.mxu0 %v4614_v44 }
 0x8e7   :  { %4616 = vmatprep.subr.bf16.mxu0 %v5198_v63 }
 0x8ea   :  { %4618 = vmatpush3.bf16.msra.mxu0 %v4617_v10 }
 0x8eb   :  { %4619 = vmatprep.subr.bf16.mxu0 %v5198_v63 }
 0x8ee   :  { %4621 = vmatpush3.bf16.msra.mxu0 %v4620_v22 }
 0x8ef   :  { %4622 = vmatprep.subr.bf16.mxu0 %v5198_v63 }
 0x8f2   :  { %4624 = vmatpush3.bf16.msra.mxu0 %v4623_v48 }
 0x8f3   :  { %4625 = vmatprep.subr.bf16.mxu0 %v5198_v63 }
 0x8f6   :  { %4627 = vmatpush3.bf16.msra.mxu0 %v4626_v27 }
 0x8f7   :  { %4628 = vmatprep.subr.bf16.mxu0 %v5198_v63 }
 0x8fa   :  { %4630 = vmatpush3.bf16.msra.mxu0 %v4629_v58 }
 0x990   :  { %v3018_v7 = vpop.f32.mrb[22].mxu0  ;;  %v3096_v55 = vpop.f32.mrb[38].mxu1 }
 0x991   :  { %v3101_v1 = vrot.slane %v3096_v55, 6  ;;  %v3933_v25 = vpop.f32.mrb[23].mxu0  ;;  %v3968_v46 = vpop.f32.mrb[39].mxu1  ;;  %v3023_v23 = vrot.slane %v3018_v7, 6 }
 0x993   :  { %v3103_v28 = vadd.f32 %v3101_v1, %v7315_v24  ;;  %v3025_v11 = vadd.f32 %v3023_v23, %v7303_v35 }
 0x995   :  { %v3104_v42 = vmul.f32 0.5, %v3103_v28  ;;  %v3026_v63 = vmul.f32 0.5, %v3025_v11 }
 0x997   :  { %5134 = vtanh.f32 %v3104_v42 }
 0x998   :  { %5136 = vtanh.f32 %v3026_v63 }
 0x9a1   :  { %v5135_v37 = vpop.eup %5134 }
 0x9a2   :  { %v3106_v2 = vadd.f32 1.0, %v5135_v37  ;;  %v5137_v53 = vpop.eup %5136 }
 0x9a3   :  { %v3028_v35 = vadd.f32 1.0, %v5137_v53 }
 0x9a4   :  { %v3107_v60 = vmul.f32 0.5, %v3106_v2 }
 0x9a5   :  { %v3029_v8 = vmul.f32 0.5, %v3028_v35 }
 0x9a6   :  { %v3264_v5 = vmul.f32 %v3262_v57, %v3107_v60 }
 0x9b0   :  { %v3174_v31 = vpop.f32.mrb[24].mxu0  ;;  %v3249_v0 = vpop.f32.mrb[40].mxu1 }
 0x9b1   :  { %v3179_v62 = vrot.slane %v3174_v31, 6  ;;  %v3254_v41 = vrot.slane %v3249_v0, 6  ;;  %v4003_v30 = vpop.f32.mrb[25].mxu0  ;;  %v4038_v39 = vpop.f32.mrb[41].mxu1 }
 0x9b3   :  { %v3181_v24 = vadd.f32 %v3179_v62, %v7309_v17  ;;  %v3256_v33 = vadd.f32 %v3254_v41, %v7326_v45 }
 0x9b5   :  { %5138 = vtanh.f32 %v3181_v24  ;;  %v3257_v54 = vmul.f32 0.5, %v3256_v33 }
 0x9b7   :  { %5140 = vtanh.f32 %v3257_v54 }
 0x9bf   :  { %v5139_v6 = vpop.eup %5138 }
 0x9c0   :  { %v3265_v38 = vmul.f32 %v5139_v6, %v3029_v8 }
 0x9c1   :  { %v5141_v59 = vpop.eup %5140 }
 0x9c2   :  { %v3266_v61 = vadd.f32 %v3265_v38, %v3264_v5  ;;  %v3259_v19 = vadd.f32 1.0, %v5141_v59 }
 0x9c4   :  { %5142 = vtanh.f32 %v3266_v61  ;;  %3388 = vst [vmem:[%s7478_s19 - $0x2] sm:$0xc] %v3266_v61  ;;  %v3260_v40 = vmul.f32 0.5, %v3259_v19 }
 0x9ce   :  { %v5143_v17 = vpop.eup %5142 }
 0x9cf   :  { %v3268_v20 = vmul.f32 %v5143_v17, %v3260_v40 }
 0x9d1   :  { %v3270_v45 = vrot.slane %v3268_v20, 1  ;;  %3387 = vst [vmem:[%s7477_s18 - $0x2] sm:$0xc] %v3268_v20  ;;  %s5201_s18 = smov [#allocation2]  }
 0x9d2   :  { %s3395_s3 = sshll.u32 %s5201_s18, 4  ;;  %s3396_s3 = int_to_ptr.vmem [resolvable:$true] %s3395_s3 }
 0x9d3   :  { %v3275_v21 = vsel %vm2140_vm10, %v7330_v16, %v3270_v45  ;;  %s5150_s16 = scalar_lea.vmem %s3396_s3, 64  ;;  %p5155_p1 = scmp.lt.s32.totalorder %s3396_s3, %s3396_s3 }
 0x9d4   :  { %v3276_v14 = vsel %vm1742_vm9, %v3275_v21, %v3273_v43  ;;  %p5151_p0 = scmp.ne.s32.totalorder %s3396_s3, %s5150_s16  ;;  %p5156_p2 = scmp.lt.s32.totalorder %s5150_s16, %s5150_s16 }
 0x9d5   :  { %v3277_v49 = vsel %vm2145_vm11, %v3276_v14, %v3268_v20 }
 0x9d6   :  { %5144 = vtanh.f32 %v3277_v49  ;;  %p5157_p3 = por %p5156_p2, %p5155_p1 }
 0x9d8   :  { %p5158_p4 = pnand %p5157_p3, %p5151_p0 }
 0x9e0   :  { %v5145_v26 = vpop.eup %5144 }
 0x9e1   :  { %4072 = vmatmul.mubr.f32.vlgmr.msra.gmra.mrb[26].mxu0 %v5145_v26 }
 0xab4   :  { %v3368_v52 = vpop.f32.mrb[26].mxu0 }
 0xab5   :  { %v3369_v18 = vadd.f32 %v3465_v32, %v3368_v52  ;;  %v4073_v34 = vpop.f32.mrb[27].mxu0 }
 0xab7   :  { %v3373_v29 = vsel %vm3372_vm14, %v3369_v18, -inf }
 0xab8   :  { %3374 = vmax.xlane.f32.xlu1 %v3373_v29 }
 0xb45   :  { %v3375_v13 = vpop.xlane.xlu1 %3374 }
 0xb46   :  { %v3376_v44 = vsub.f32 %v3369_v18, %v3375_v13 }
 0xb48   :  { %v3377_v16 = vmul.f32 1.442695, %v3376_v44 }
 0xb4a   :  { %5146 = vpow2.f32 %v3377_v16 }
 0xb54   :  { %v5147_v4 = vpop.eup %5146 }
 0xb55   :  { %v3379_v47 = vsel %vm3372_vm14, %v5147_v4, 0.0 }
 0xb56   :  { %3380 = vadd.xlane.f32.xlu0 %v3379_v47 }
 0xbe3   :  { %v3381_v10 = vpop.xlane.xlu0 %3380 }
 0xbe4   :  { %5148 = vlog2.f32 %v3381_v10 }
 0xbee   :  { %v5149_v9 = vpop.eup %5148 }
 0xbef   :  { %v3383_v3 = vmul.f32 0.6931472, %v5149_v9 }
 0xbf1   :  { %v3384_v22 = vadd.f32 %v3383_v3, %v3375_v13 }
 0xbf3   :  { %v3385_v12 = vsub.f32 %v3369_v18, %v3384_v22 }
 0xbf5   :  { %3386 = vst [vmem:[#allocation2] sm:$0xf] %v3385_v12 }
 0xbf6   :  { %5161 = shalt.err (!%p5158_p4)
}
 0xbf7   :  { %s5162_s13 = scalar_lea.hbm %s7476_s17, 64 }
 0xbf8   :  { %p5163_p5 = scmp.ne.s32.totalorder %s7476_s17, %s5162_s13  ;;  %p5166_p6 = scmp.lt.u32.totalorder %s5162_s13, %s7476_s17 }
 0xbfa   :  { %p5168_p7 = pnand %p5166_p6, %p5163_p5 }
 0xbfc   :  { %5171 = shalt.err (!%p5168_p7)
}
 0xbfd   :  { %3398 = dma.vmem_to_hbm [thread:$0]  %s3396_s3, 64, %s7476_s17, [#allocation3]  }
 0xbfe   :  { %5172 = dma.done.wait [#allocation3], 64  }
 0xbff   :  { %5173 = vsyncadd [#allocation3], 4294967232 }
 0xc00   :  { %3410 = vsyncpa [#allocation3], 1 }

</bundles_post_ra>
